<compile_context>
chip_gen: v7x
topology: tpu7x:2x2x1
jax: 0.10.0
libtpu: 0.0.40
codegen_flags: <defaults>
</compile_context>

<pallas_src>
import functools

import jax
import jax.numpy as jnp
from jax.experimental import pallas as pl
from jax.experimental.pallas import tpu as pltpu

HIDDEN = 200       # logical hidden width of lr1/lr2/lr3
HIDDEN_PAD = 256   # padded width: multiple of 128 lanes / MXU tile
TB = 2048          # max batch tile (lane axis); multiple of 128


def _mlp_kernel(x_ref, w1_ref, b1_ref, w2_ref, b2_ref, w3_ref, b3_ref,
                w4_ref, b4_ref, a_ref, o_ref, *, act_dtype):
    # x_ref : (1, TB) f32 lane-dense batch tile (the /2000 is folded into w1).
    x = x_ref[...]

    # lr1: K=1 contraction -> VPU broadcast FMA (no MXU pass), f32 for accuracy.
    h = w1_ref[...] * x + b1_ref[...]                       # (Hp, TB) f32

    # PReLU, slope is an SMEM scalar.
    a = a_ref[0, 0]
    h = jnp.where(h >= 0.0, h, a * h)
    h = h.astype(jnp.bfloat16)

    # lr2 (+ par1 folded into b2): bf16 MXU operands, f32 accumulation,
    # bias-add in f32, then sigmoid via a single tanh EUP push.
    s = jnp.dot(w2_ref[...], h, preferred_element_type=jnp.float32) + b2_ref[...]
    s = s.astype(act_dtype)                                 # bf16 on v6e/v7x
    h = 0.5 * jnp.tanh(0.5 * s) + 0.5                       # sigmoid
    h = h.astype(jnp.bfloat16)

    # lr3 (+ par2 folded into b3).
    s = jnp.dot(w3_ref[...], h, preferred_element_type=jnp.float32) + b3_ref[...]
    s = s.astype(act_dtype)
    h = 0.5 * jnp.tanh(0.5 * s) + 0.5                       # sigmoid

    # lr4: N=1 output -> VPU multiply + sublane reduce; lane-dense (1, TB) store.
    o_ref[...] = (jnp.sum(w4_ref[...] * h.astype(jnp.float32), axis=0,
                          keepdims=True) + b4_ref[0, 0])


def _round_up(n, m):
    return ((n + m - 1) // m) * m


def _supports_bf16_elementwise():
    """bf16 VALU/EUP exists on v6e/v7x only; be conservative if detection fails."""
    try:
        kind = jax.devices()[0].device_kind.lower()
    except Exception:
        return False
    return any(tag in kind for tag in ("v6", "v7", "tpu7"))


def _pad_rows(a, rows):
    """Zero-pad the leading (hidden) axis of a 2-D array to `rows`."""
    return jnp.pad(a, ((0, rows - a.shape[0]), (0, a.shape[1] and 0)))


def prepare_kernel_params(p, hp=HIDDEN_PAD):
    """One-time parameter transform: fold constants, transpose, zero-pad the
    hidden dim 200->256 (weights AND biases, so padded units cancel), cast the
    big weights to bf16."""
    def padr(a):   # pad rows (hidden axis) with zeros
        return jnp.pad(a, ((0, hp - a.shape[0]), (0, 0)))

    def padrc(a):  # pad rows and cols (hidden x hidden) with zeros
        return jnp.pad(a, ((0, hp - a.shape[0]), (0, hp - a.shape[1])))

    return dict(
        w1c=padr((p["w1"] * (1.0 / 2000.0)).T),              # (Hp, 1), /2000 folded
        b1c=padr(p["b1"].T),                                  # (Hp, 1)
        w2t=padrc(p["w2"].T).astype(jnp.bfloat16),            # (Hp, Hp) out x in
        b2c=padr((p["b2"] + p["par1"]).T),                    # (Hp, 1) par1 folded
        w3t=padrc(p["w3"].T).astype(jnp.bfloat16),            # (Hp, Hp)
        b3c=padr((p["b3"] + p["par2"]).T),                    # (Hp, 1) par2 folded
        w4c=padr(p["w4"]),                                    # (Hp, 1)
        b4s=p["b4"],                                          # (1, 1) SMEM scalar
        a_s=p["prelu_a"],                                     # (1, 1) SMEM scalar
    )


def net_forward(x, kp, *, tb=TB, act_dtype=None):
    """x: (B, 1) float32; kp: output of prepare_kernel_params."""
    if act_dtype is None:
        act_dtype = jnp.bfloat16 if _supports_bf16_elementwise() else jnp.float32

    B = x.shape[0]
    Hp = HIDDEN_PAD

    # Batch-on-lanes: (B, 1) -> (1, B).  Pick the tile so the grid has >=2
    # steps whenever the batch allows it (v7x megacore split of the
    # ("parallel",) axis), keeping lanes a multiple of 128.
    half = _round_up((B + 1) // 2, 128)
    tb_eff = max(128, min(tb, half))
    B_pad = _round_up(B, tb_eff)

    x_t = x.reshape(1, B)
    if B_pad != B:
        x_t = jnp.pad(x_t, ((0, 0), (0, B_pad - B)))

    grid = (B_pad // tb_eff,)
    const = lambda i: (0, 0)
    smem = pltpu.MemorySpace.SMEM

    kernel = functools.partial(_mlp_kernel, act_dtype=act_dtype)

    out = pl.pallas_call(
        kernel,
        out_shape=jax.ShapeDtypeStruct((1, B_pad), jnp.float32),
        grid=grid,
        in_specs=[
            pl.BlockSpec((1, tb_eff), lambda i: (0, i)),          # x tile
            pl.BlockSpec((Hp, 1), const),                         # w1c
            pl.BlockSpec((Hp, 1), const),                         # b1c
            pl.BlockSpec((Hp, Hp), const),                        # w2t (bf16)
            pl.BlockSpec((Hp, 1), const),                         # b2c
            pl.BlockSpec((Hp, Hp), const),                        # w3t (bf16)
            pl.BlockSpec((Hp, 1), const),                         # b3c
            pl.BlockSpec((Hp, 1), const),                         # w4c
            pl.BlockSpec((1, 1), const, memory_space=smem),       # b4 scalar
            pl.BlockSpec((1, 1), const, memory_space=smem),       # prelu slope
        ],
        out_specs=pl.BlockSpec((1, tb_eff), lambda i: (0, i)),
        compiler_params=pltpu.CompilerParams(
            dimension_semantics=("parallel",)),
    )(x_t, kp["w1c"], kp["b1c"], kp["w2t"], kp["b2c"],
      kp["w3t"], kp["b3c"], kp["w4c"], kp["b4s"], kp["a_s"])

    return out[:, :B].reshape(B, 1)


def init_params(key, hidden=HIDDEN):
    """PyTorch-default-style init (uniform +-1/sqrt(fan_in); torch.rand for
    par1/par2; PReLU slope = 0.25). Stored in (in, out) convention."""
    ks = jax.random.split(key, 10)

    def linear(kw, kb, fan_in, fan_out):
        bound = 1.0 / jnp.sqrt(float(fan_in))
        w = jax.random.uniform(kw, (fan_in, fan_out), jnp.float32, -bound, bound)
        b = jax.random.uniform(kb, (1, fan_out), jnp.float32, -bound, bound)
        return w, b

    w1, b1 = linear(ks[0], ks[1], 1, hidden)
    w2, b2 = linear(ks[2], ks[3], hidden, hidden)
    w3, b3 = linear(ks[4], ks[5], hidden, hidden)
    w4, b4 = linear(ks[6], ks[7], hidden, 1)
    par1 = jax.random.uniform(ks[8], (1, hidden), jnp.float32, 0.0, 1.0)
    par2 = jax.random.uniform(ks[9], (1, hidden), jnp.float32, 0.0, 1.0)
    prelu_a = jnp.full((1, 1), 0.25, jnp.float32)

    return dict(w1=w1, b1=b1, w2=w2, b2=b2, w3=w3, b3=b3, w4=w4, b4=b4,
                par1=par1, par2=par2, prelu_a=prelu_a)


def net_forward_ref(x, p):
    """Pure-JAX f32 reference with the original PyTorch semantics."""
    h = x / 2000.0
    h = h @ p["w1"] + p["b1"]
    a = p["prelu_a"][0, 0]
    h = jnp.where(h >= 0.0, h, a * h)
    h = jax.nn.sigmoid(h @ p["w2"] + p["b2"] + p["par1"])
    h = jax.nn.sigmoid(h @ p["w3"] + p["b3"] + p["par2"])
    return h @ p["w4"] + p["b4"]


if __name__ == "__main__":
    key = jax.random.PRNGKey(0)
    kx, kp_key = jax.random.split(key)

    # Synthetic stand-in for rec[:, 0] (values ~thousands, matching the /2000
    # normalization).  B=1000 exercises padding (-> 1024) and a 2-step grid.
    B = 1000
    x = jax.random.uniform(kx, (B, 1), jnp.float32, 0.0, 4000.0)

    params = init_params(kp_key)
    kernel_params = prepare_kernel_params(params)   # one-time transform

    out = net_forward(x, kernel_params)
    out = jax.block_until_ready(out)

    ref = net_forward_ref(x, params)
    assert out.shape == (B, 1), out.shape
    # Tolerance relaxed vs the pure-f32 reference: w2/w3 stored in bf16 (f32
    # MXU accumulation) and, on v6e/v7x, the sigmoid chain runs in bf16.
    # Observed error is a few 1e-3; bound set to 2e-2.
    assert jnp.allclose(out, ref, atol=2e-2, rtol=2e-2), (
        float(jnp.max(jnp.abs(out - ref))))

    print("KERNEL_OK")
</pallas_src>

<mosaic_0001>
module attributes {stable_mosaic.version = 11 : i64} {
  func.func @_mlp_kernel(%arg0: i32, %arg1: memref<1x512xf32, #tpu.memory_space<vmem>>, %arg2: memref<256x1xf32, #tpu.memory_space<vmem>>, %arg3: memref<256x1xf32, #tpu.memory_space<vmem>>, %arg4: memref<256x256xbf16, #tpu.memory_space<vmem>>, %arg5: memref<256x1xf32, #tpu.memory_space<vmem>>, %arg6: memref<256x256xbf16, #tpu.memory_space<vmem>>, %arg7: memref<256x1xf32, #tpu.memory_space<vmem>>, %arg8: memref<256x1xf32, #tpu.memory_space<vmem>>, %arg9: memref<1x1xf32, #tpu.memory_space<smem>>, %arg10: memref<1x1xf32, #tpu.memory_space<smem>>, %arg11: memref<1x512xf32, #tpu.memory_space<vmem>>) attributes {dimension_semantics = [#tpu.dimension_semantics<parallel>], iteration_bounds = array<i64: 2>, scalar_prefetch = 0 : i64, scratch_operands = 0 : i64, tpu.core_type = #tpu.core_type<tc>, window_params = [{transform_indices = @transform_0, window_bounds = array<i64: 1, 512>}, {pipeline_mode = #tpu.pipeline_mode<synchronous>, transform_indices = @transform_1, window_bounds = array<i64: 256, 1>}, {pipeline_mode = #tpu.pipeline_mode<synchronous>, transform_indices = @transform_2, window_bounds = array<i64: 256, 1>}, {pipeline_mode = #tpu.pipeline_mode<synchronous>, transform_indices = @transform_3, window_bounds = array<i64: 256, 256>}, {pipeline_mode = #tpu.pipeline_mode<synchronous>, transform_indices = @transform_4, window_bounds = array<i64: 256, 1>}, {pipeline_mode = #tpu.pipeline_mode<synchronous>, transform_indices = @transform_5, window_bounds = array<i64: 256, 256>}, {pipeline_mode = #tpu.pipeline_mode<synchronous>, transform_indices = @transform_6, window_bounds = array<i64: 256, 1>}, {pipeline_mode = #tpu.pipeline_mode<synchronous>, transform_indices = @transform_7, window_bounds = array<i64: 256, 1>}, {transform_indices = @transform_8, window_bounds = array<i64: 1, 1>}, {transform_indices = @transform_9, window_bounds = array<i64: 1, 1>}, {transform_indices = @transform_10, window_bounds = array<i64: 1, 512>}]} {
    %c0 = arith.constant 0 : index
    %c0_0 = arith.constant 0 : index
    %0 = vector.load %arg1[%c0, %c0_0] : memref<1x512xf32, #tpu.memory_space<vmem>>, vector<1x512xf32>
    %c0_1 = arith.constant 0 : index
    %c0_2 = arith.constant 0 : index
    %1 = vector.load %arg2[%c0_1, %c0_2] : memref<256x1xf32, #tpu.memory_space<vmem>>, vector<256x1xf32>
    %2 = vector.broadcast %1 : vector<256x1xf32> to vector<256x512xf32>
    %3 = vector.broadcast %0 : vector<1x512xf32> to vector<256x512xf32>
    %4 = arith.mulf %2, %3 : vector<256x512xf32>
    %c0_3 = arith.constant 0 : index
    %c0_4 = arith.constant 0 : index
    %5 = vector.load %arg3[%c0_3, %c0_4] : memref<256x1xf32, #tpu.memory_space<vmem>>, vector<256x1xf32>
    %6 = vector.broadcast %5 : vector<256x1xf32> to vector<256x512xf32>
    %7 = arith.addf %4, %6 : vector<256x512xf32>
    %c0_5 = arith.constant 0 : index
    %c0_6 = arith.constant 0 : index
    %8 = memref.load %arg10[%c0_5, %c0_6] : memref<1x1xf32, #tpu.memory_space<smem>>
    %cst = arith.constant 0.000000e+00 : f32
    %9 = vector.broadcast %cst : f32 to vector<256x512xf32>
    %10 = arith.cmpf oge, %7, %9 : vector<256x512xf32>
    %11 = vector.broadcast %8 : f32 to vector<256x512xf32>
    %12 = arith.mulf %11, %7 : vector<256x512xf32>
    %13 = arith.select %10, %7, %12 : vector<256x512xi1>, vector<256x512xf32>
    %14 = arith.truncf %13 : vector<256x512xf32> to vector<256x512xbf16>
    %c0_7 = arith.constant 0 : index
    %c0_8 = arith.constant 0 : index
    %15 = vector.load %arg4[%c0_7, %c0_8] : memref<256x256xbf16, #tpu.memory_space<vmem>>, vector<256x256xbf16>
    %cst_9 = arith.constant dense<0.000000e+00> : vector<256x512xf32>
    %16 = tpu.matmul %15, %14, %cst_9 {dimension_numbers = #tpu.dot_dimension_numbers<[1], [0], [0], [1], [0, 0, 1, 1], [], []>} : vector<256x256xbf16>, vector<256x512xbf16>, vector<256x512xf32> -> vector<256x512xf32>
    %c0_10 = arith.constant 0 : index
    %c0_11 = arith.constant 0 : index
    %17 = vector.load %arg5[%c0_10, %c0_11] : memref<256x1xf32, #tpu.memory_space<vmem>>, vector<256x1xf32>
    %18 = vector.broadcast %17 : vector<256x1xf32> to vector<256x512xf32>
    %19 = arith.addf %16, %18 : vector<256x512xf32>
    %cst_12 = arith.constant 5.000000e-01 : f32
    %20 = vector.broadcast %cst_12 : f32 to vector<256x512xf32>
    %21 = arith.mulf %20, %19 : vector<256x512xf32>
    %22 = math.tanh %21 : vector<256x512xf32>
    %cst_13 = arith.constant 5.000000e-01 : f32
    %23 = vector.broadcast %cst_13 : f32 to vector<256x512xf32>
    %24 = arith.mulf %23, %22 : vector<256x512xf32>
    %cst_14 = arith.constant 5.000000e-01 : f32
    %25 = vector.broadcast %cst_14 : f32 to vector<256x512xf32>
    %26 = arith.addf %24, %25 : vector<256x512xf32>
    %27 = arith.truncf %26 : vector<256x512xf32> to vector<256x512xbf16>
    %c0_15 = arith.constant 0 : index
    %c0_16 = arith.constant 0 : index
    %28 = vector.load %arg6[%c0_15, %c0_16] : memref<256x256xbf16, #tpu.memory_space<vmem>>, vector<256x256xbf16>
    %cst_17 = arith.constant dense<0.000000e+00> : vector<256x512xf32>
    %29 = tpu.matmul %28, %27, %cst_17 {dimension_numbers = #tpu.dot_dimension_numbers<[1], [0], [0], [1], [0, 0, 1, 1], [], []>} : vector<256x256xbf16>, vector<256x512xbf16>, vector<256x512xf32> -> vector<256x512xf32>
    %c0_18 = arith.constant 0 : index
    %c0_19 = arith.constant 0 : index
    %30 = vector.load %arg7[%c0_18, %c0_19] : memref<256x1xf32, #tpu.memory_space<vmem>>, vector<256x1xf32>
    %31 = vector.broadcast %30 : vector<256x1xf32> to vector<256x512xf32>
    %32 = arith.addf %29, %31 : vector<256x512xf32>
    %cst_20 = arith.constant 5.000000e-01 : f32
    %33 = vector.broadcast %cst_20 : f32 to vector<256x512xf32>
    %34 = arith.mulf %33, %32 : vector<256x512xf32>
    %35 = math.tanh %34 : vector<256x512xf32>
    %cst_21 = arith.constant 5.000000e-01 : f32
    %36 = vector.broadcast %cst_21 : f32 to vector<256x512xf32>
    %37 = arith.mulf %36, %35 : vector<256x512xf32>
    %cst_22 = arith.constant 5.000000e-01 : f32
    %38 = vector.broadcast %cst_22 : f32 to vector<256x512xf32>
    %39 = arith.addf %37, %38 : vector<256x512xf32>
    %c0_23 = arith.constant 0 : index
    %c0_24 = arith.constant 0 : index
    %40 = vector.load %arg8[%c0_23, %c0_24] : memref<256x1xf32, #tpu.memory_space<vmem>>, vector<256x1xf32>
    %41 = vector.broadcast %40 : vector<256x1xf32> to vector<256x512xf32>
    %42 = arith.mulf %41, %39 : vector<256x512xf32>
    %cst_25 = arith.constant dense<0.000000e+00> : vector<512xf32>
    %43 = vector.multi_reduction <add>, %42, %cst_25 [0] : vector<256x512xf32> to vector<512xf32>
    %44 = vector.shape_cast %43 : vector<512xf32> to vector<1x512xf32>
    %c0_26 = arith.constant 0 : index
    %c0_27 = arith.constant 0 : index
    %45 = memref.load %arg9[%c0_26, %c0_27] : memref<1x1xf32, #tpu.memory_space<smem>>
    %46 = vector.broadcast %45 : f32 to vector<1x512xf32>
    %47 = arith.addf %44, %46 : vector<1x512xf32>
    %c0_28 = arith.constant 0 : index
    %c0_29 = arith.constant 0 : index
    %48 = vector.load %arg11[%c0_28, %c0_29] : memref<1x512xf32, #tpu.memory_space<vmem>>, vector<1x512xf32>
    tpu.vector_store %arg11[%c0_28, %c0_29], %47 {strides = array<i32>} : memref<1x512xf32, #tpu.memory_space<vmem>>, vector<1x512xf32>,
    return
  }
  func.func @transform_0(%arg0: i32) -> (i32, i32) {
    %c0_i32 = arith.constant 0 : i32
    %c0_i32_0 = arith.constant 0 : i32
    return %c0_i32, %arg0 : i32, i32
  }
  func.func @transform_1(%arg0: i32) -> (i32, i32) {
    %c0_i32 = arith.constant 0 : i32
    %c0_i32_0 = arith.constant 0 : i32
    %c0_i32_1 = arith.constant 0 : i32
    return %c0_i32, %c0_i32_0 : i32, i32
  }
  func.func @transform_2(%arg0: i32) -> (i32, i32) {
    %c0_i32 = arith.constant 0 : i32
    %c0_i32_0 = arith.constant 0 : i32
    %c0_i32_1 = arith.constant 0 : i32
    return %c0_i32, %c0_i32_0 : i32, i32
  }
  func.func @transform_3(%arg0: i32) -> (i32, i32) {
    %c0_i32 = arith.constant 0 : i32
    %c0_i32_0 = arith.constant 0 : i32
    %c0_i32_1 = arith.constant 0 : i32
    return %c0_i32, %c0_i32_0 : i32, i32
  }
  func.func @transform_4(%arg0: i32) -> (i32, i32) {
    %c0_i32 = arith.constant 0 : i32
    %c0_i32_0 = arith.constant 0 : i32
    %c0_i32_1 = arith.constant 0 : i32
    return %c0_i32, %c0_i32_0 : i32, i32
  }
  func.func @transform_5(%arg0: i32) -> (i32, i32) {
    %c0_i32 = arith.constant 0 : i32
    %c0_i32_0 = arith.constant 0 : i32
    %c0_i32_1 = arith.constant 0 : i32
    return %c0_i32, %c0_i32_0 : i32, i32
  }
  func.func @transform_6(%arg0: i32) -> (i32, i32) {
    %c0_i32 = arith.constant 0 : i32
    %c0_i32_0 = arith.constant 0 : i32
    %c0_i32_1 = arith.constant 0 : i32
    return %c0_i32, %c0_i32_0 : i32, i32
  }
  func.func @transform_7(%arg0: i32) -> (i32, i32) {
    %c0_i32 = arith.constant 0 : i32
    %c0_i32_0 = arith.constant 0 : i32
    %c0_i32_1 = arith.constant 0 : i32
    return %c0_i32, %c0_i32_0 : i32, i32
  }
  func.func @transform_8(%arg0: i32) -> (i32, i32) {
    %c0_i32 = arith.constant 0 : i32
    %c0_i32_0 = arith.constant 0 : i32
    %c0_i32_1 = arith.constant 0 : i32
    return %c0_i32, %c0_i32_0 : i32, i32
  }
  func.func @transform_9(%arg0: i32) -> (i32, i32) {
    %c0_i32 = arith.constant 0 : i32
    %c0_i32_0 = arith.constant 0 : i32
    %c0_i32_1 = arith.constant 0 : i32
    return %c0_i32, %c0_i32_0 : i32, i32
  }
  func.func @transform_10(%arg0: i32) -> (i32, i32) {
    %c0_i32 = arith.constant 0 : i32
    %c0_i32_0 = arith.constant 0 : i32
    return %c0_i32, %arg0 : i32, i32
  }
}

</mosaic_0001>

<bundles_post_ra>
// kernel: tpu_custom_call.1
= control target key start
LH: loop header
LB: loop body
LE: loop exit
PB: predicated region body
PF: predicated region fallthrough
CT: control target
= control target key end

     0   :  { %s8622_s0 = inlined_call_operand.vmem [shape: f32[1,1024], index: 0, kind: input, shape index: {}]   ;;  %s8623_s1 = inlined_call_operand.vmem [shape: f32[256,1], index: 1, kind: input, shape index: {}]   ;;  %s8624_s2 = inlined_call_operand.vmem [shape: f32[256,1], index: 2, kind: input, shape index: {}]   ;;  %s8625_s3 = inlined_call_operand.vmem [shape: bf16[256,256], index: 3, kind: input, shape index: {}]   ;;  %s8626_s4 = inlined_call_operand.vmem [shape: f32[256,1], index: 4, kind: input, shape index: {}]   ;;  %s8627_s5 = inlined_call_operand.vmem [shape: bf16[256,256], index: 5, kind: input, shape index: {}]   ;;  %s8628_s6 = inlined_call_operand.vmem [shape: f32[256,1], index: 6, kind: input, shape index: {}]   ;;  %s8629_s7 = inlined_call_operand.vmem [shape: f32[256,1], index: 7, kind: input, shape index: {}]   ;;  %s8630_s8 = inlined_call_operand.<no memory space> [shape: f32[1,1], index: 8, kind: input, shape index: {}]   ;;  %s8631_s9 = inlined_call_operand.<no memory space> [shape: f32[1,1], index: 9, kind: input, shape index: {}]   ;;  %s8632_s10 = inlined_call_operand.hbm [shape: f32[1,1024], index: 10, kind: output, shape index: {}]  }
   0x1   :  { %15 = sst [smem:[#allocation2]] %s8630_s8 }
   0x2   :  { %16 = sst [smem:[#allocation3]] %s8631_s9 }
   0x3   :  { %17 = vsyncpa [#allocation5], 0 }
   0x4   :  { %19 = vsyncpa [#allocation5 + $0x1], 0  ;;  %s5534_s17 = smov 0   ;;  %s5536_s18 = smov 0  }
   0x5   :  { %s5538_s19 = smov 0   ;;  %s5540_s20 = smov 0  }
   0x6 LB: > { %s5555_s8 = sadd.s32 4294967295, %s5468_s20   ;;  %s4679_s9 = sadd.s32 4294967294, %s5468_s20   ;;  %s5468_s20 = sphi %s5540_s20, %s8746_s20   ;;  %s5464_s19 = sphi %s5538_s19, %s8745_s19   ;;  %s5460_s18 = sphi %s5536_s18, %s8744_s18   ;;  %s5456_s17 = sphi %s5534_s17, %s8743_s17  }
   0x7   : > { %s5559_s21 = sadd.s32 1, %s5468_s20   ;;  %s247_s22 = sadd.s32 1, %s5464_s19 }
   0x8   : > { %s244_s23 = ssub.s32 %s5468_s20, %s5559_s21  ;;  %p257_p0 = scmp.ne.s32.totalorder %s5464_s19, %s5460_s18 }
   0x9   : > { %p245_p1 = scmp.eq.s32.totalorder %s244_s23, 0  ;;  %p258_p2 = scmp.eq.s32.totalorder %s5555_s8, 1 }
   0xa   : > { %p263_p3 = scmp.ne.s32.totalorder %s5460_s18, %s5456_s17  ;;  %p264_p4 = scmp.eq.s32.totalorder %s4679_s9, 1 }
   0xb   : > { %s5570_s24 = scalar_select %p245_p1, %s5464_s19, %s247_s22  }
   0xc   : > { %p5572_p5 = por %p258_p2, %p257_p0  ;;  %p5576_p6 = por %p264_p4, %p263_p3 }
   0xd   : > { %p4682_p7 = scmp.ge.s32.totalorder %s5468_s20, 1  ;;  %p317_p8 = scmp.lt.s32.totalorder %s5468_s20, 3 }
   0xf   : > { %p318_p9 = pnand %p4682_p7, %p317_p8 }
  0x11   : > { %321 = sbr.rel (%p318_p9) target bundleno = 1231 (0x4cf), region = 60 }
  0x18   : > { %v702_v0 = vld [vmem:[%s8624_s2] sm:$0xff]  ;;  %v5470_v2 = vmov 0   ;;  %v703_v3 = vld [vmem:[%s8624_s2 + $0x8] sm:$0xff]  ;;  %v364_v5 = vld [vmem:[%s8623_s1 + $0x18] sm:$0xff]  ;;  %s4684_s15 = sshll.u32 %s5555_s8, 2  ;;  %v8633_v59 = vlaneseq  ;;  %s4568_s23 = sld [smem:[#allocation2]] }
  0x19   : > { %v361_v1 = vld [vmem:[%s8623_s1] sm:$0xff]  ;;  %4797 = vset.pattern.permute.xlu1 %v5470_v2  ;;  %4796 = vset.pattern.permute.xlu0 %v5470_v2  ;;  %v362_v4 = vld [vmem:[%s8623_s1 + $0x8] sm:$0xff]  ;;  %v363_v6 = vld [vmem:[%s8623_s1 + $0x10] sm:$0xff]  ;;  %p355_p10 = scmp.lt.s32.totalorder %s4684_s15, 7  ;;  %s351_s27 = sand.u32 1, %s5460_s18  }
  0x1a   : > { %736 = vperm.xlu1 %4797, %v702_v0   ;;  %395 = vperm.xlu0 %4796, %v361_v1   ;;  %v705_v7 = vld [vmem:[%s8624_s2 + $0x18] sm:$0xff]  ;;  %v704_v8 = vld [vmem:[%s8624_s2 + $0x10] sm:$0xff]  ;;  %v366_v9 = vld [vmem:[%s8623_s1 + $0x28] sm:$0xff]  ;;  %v5764_v62 = vshrl.u32 %v8633_v59, 7  ;;  %s4683_s28 = sshll.u32 %s351_s27, 2  ;;  %s4754_s29 = sshll.u32 %s5555_s8, 6 }
  0x1b   : > { %v365_v10 = vld [vmem:[%s8623_s1 + $0x20] sm:$0xff]  ;;  %v707_v11 = vld [vmem:[%s8624_s2 + $0x28] sm:$0xff]  ;;  %v368_v13 = vld [vmem:[%s8623_s1 + $0x38] sm:$0xff]  ;;  %s8748_s15 = smov (!%p355_p10, %s4684_s15), 7  ;;  %s8580_s13 = scalar_lea.hbm %s8632_s10, %s4754_s29 }
  0x1c   : > { %v706_v12 = vld [vmem:[%s8624_s2 + $0x20] sm:$0xff]  ;;  %v367_v14 = vld [vmem:[%s8623_s1 + $0x30] sm:$0xff]  ;;  %v709_v15 = vld [vmem:[%s8624_s2 + $0x38] sm:$0xff]  ;;  %8648 = vst [vmem:[#allocation7_spill] sm:$0xff] %v5764_v62  ;;  %s357_s22 = scalar_lea.vmem %s8622_s0, %s8748_s15  ;;  %v556_v1 = vsub.s32 0, %v5764_v62  ;;  %v564_v2 = vsub.s32 2, %v5764_v62 }
  0x1d   : > { %v708_v16 = vld [vmem:[%s8624_s2 + $0x30] sm:$0xff]  ;;  %v370_v17 = vld [vmem:[%s8623_s1 + $0x48] sm:$0xff]  ;;  %v369_v18 = vld [vmem:[%s8623_s1 + $0x40] sm:$0xff]  ;;  %s1022_s15 = sld [smem:[#allocation3]]  ;;  %s4609_s14 = scalar_lea.sflag [#allocation5], %s351_s27 }
  0x1e   : > { %741 = vperm.xlu1 %4797, %v703_v3   ;;  %400 = vperm.xlu0 %4796, %v362_v4   ;;  %v711_v19 = vld [vmem:[%s8624_s2 + $0x48] sm:$0xff]  ;;  %v710_v20 = vld [vmem:[%s8624_s2 + $0x40] sm:$0xff]  ;;  %v372_v21 = vld [vmem:[%s8623_s1 + $0x58] sm:$0xff]  ;;  %v560_v3 = vsub.s32 1, %v5764_v62  ;;  %s5472_s8 = smov [#allocation4]  }
  0x1f   : > { %v371_v22 = vld [vmem:[%s8623_s1 + $0x50] sm:$0xff]  ;;  %v713_v23 = vld [vmem:[%s8624_s2 + $0x58] sm:$0xff]  ;;  %v374_v25 = vld [vmem:[%s8623_s1 + $0x68] sm:$0xff]  ;;  %s5410_s9 = sshll.u32 %s5472_s8, 4  ;;  %s5411_s9 = int_to_ptr.vmem [resolvable:$false] %s5410_s9 }
  0x20   : > { %v712_v24 = vld [vmem:[%s8624_s2 + $0x50] sm:$0xff]  ;;  %v373_v26 = vld [vmem:[%s8623_s1 + $0x60] sm:$0xff]  ;;  %v715_v27 = vld [vmem:[%s8624_s2 + $0x68] sm:$0xff] }
  0x21   : > { %v714_v28 = vld [vmem:[%s8624_s2 + $0x60] sm:$0xff]  ;;  %v376_v29 = vld [vmem:[%s8623_s1 + $0x78] sm:$0xff]  ;;  %v375_v30 = vld [vmem:[%s8623_s1 + $0x70] sm:$0xff] }
  0x22   : > { %410 = vperm.xlu1 %4797, %v364_v5   ;;  %405 = vperm.xlu0 %4796, %v363_v6   ;;  %v717_v31 = vld [vmem:[%s8624_s2 + $0x78] sm:$0xff]  ;;  %v716_v32 = vld [vmem:[%s8624_s2 + $0x70] sm:$0xff]  ;;  %v378_v33 = vld [vmem:[%s8623_s1 + $0x88] sm:$0xff] }
  0x23   : > { %v377_v34 = vld [vmem:[%s8623_s1 + $0x80] sm:$0xff]  ;;  %v719_v35 = vld [vmem:[%s8624_s2 + $0x88] sm:$0xff]  ;;  %v380_v37 = vld [vmem:[%s8623_s1 + $0x98] sm:$0xff] }
  0x24   : > { %v718_v36 = vld [vmem:[%s8624_s2 + $0x80] sm:$0xff]  ;;  %v379_v38 = vld [vmem:[%s8623_s1 + $0x90] sm:$0xff]  ;;  %v721_v39 = vld [vmem:[%s8624_s2 + $0x98] sm:$0xff] }
  0x25   : > { %v720_v40 = vld [vmem:[%s8624_s2 + $0x90] sm:$0xff]  ;;  %v382_v41 = vld [vmem:[%s8623_s1 + $0xa8] sm:$0xff]  ;;  %v381_v42 = vld [vmem:[%s8623_s1 + $0xa0] sm:$0xff] }
  0x26   : > { %751 = vperm.xlu1 %4797, %v705_v7   ;;  %746 = vperm.xlu0 %4796, %v704_v8   ;;  %v723_v43 = vld [vmem:[%s8624_s2 + $0xa8] sm:$0xff]  ;;  %v722_v44 = vld [vmem:[%s8624_s2 + $0xa0] sm:$0xff]  ;;  %v384_v45 = vld [vmem:[%s8623_s1 + $0xb8] sm:$0xff]  ;;  %v568_v7 = vsub.s32 3, %v5764_v62 }
  0x27   : > { %v383_v46 = vld [vmem:[%s8623_s1 + $0xb0] sm:$0xff]  ;;  %v725_v47 = vld [vmem:[%s8624_s2 + $0xb8] sm:$0xff]  ;;  %v386_v49 = vld [vmem:[%s8623_s1 + $0xc8] sm:$0xff] }
  0x28   : > { %v724_v48 = vld [vmem:[%s8624_s2 + $0xb0] sm:$0xff]  ;;  %v385_v50 = vld [vmem:[%s8623_s1 + $0xc0] sm:$0xff]  ;;  %v727_v51 = vld [vmem:[%s8624_s2 + $0xc8] sm:$0xff] }
  0x29   : > { %v726_v52 = vld [vmem:[%s8624_s2 + $0xc0] sm:$0xff]  ;;  %v388_v53 = vld [vmem:[%s8623_s1 + $0xd8] sm:$0xff]  ;;  %v387_v54 = vld [vmem:[%s8623_s1 + $0xd0] sm:$0xff] }
  0x2a   : > { %420 = vperm.xlu1 %4797, %v366_v9   ;;  %415 = vperm.xlu0 %4796, %v365_v10   ;;  %v729_v55 = vld [vmem:[%s8624_s2 + $0xd8] sm:$0xff]  ;;  %v728_v56 = vld [vmem:[%s8624_s2 + $0xd0] sm:$0xff]  ;;  %v390_v57 = vld [vmem:[%s8623_s1 + $0xe8] sm:$0xff] }
  0x2b   : > { %v389_v58 = vld [vmem:[%s8623_s1 + $0xe0] sm:$0xff]  ;;  %v731_v60 = vld [vmem:[%s8624_s2 + $0xe8] sm:$0xff]  ;;  %v392_v63 = vld [vmem:[%s8623_s1 + $0xf8] sm:$0xff] }
  0x2c   : > { %v730_v61 = vld [vmem:[%s8624_s2 + $0xe0] sm:$0xff]  ;;  %v391_v0 = vld [vmem:[%s8623_s1 + $0xf0] sm:$0xff]  ;;  %v733_v4 = vld [vmem:[%s8624_s2 + $0xf8] sm:$0xff] }
  0x2d   : > { %v732_v5 = vld [vmem:[%s8624_s2 + $0xf0] sm:$0xff]  ;;  %v360_v6 = vld [vmem:[%s357_s22] sm:$0xf]  ;;  %s5412_s22 = scalar_lea.vmem %s5411_s9, 128 }
  0x2e   : > { %761 = vperm.xlu1 %4797, %v707_v11   ;;  %756 = vperm.xlu0 %4796, %v706_v12   ;;  %v5785_v8 = vrot.slane %v360_v6, %v556_v1  ;;  %v5787_v9 = vrot.slane %v360_v6, %v564_v2  ;;  %v5789_v10 = vrot.slane %v360_v6, %v560_v3  ;;  %v1505_v11 = vld [vmem:[%s8626_s4 + $0x8] sm:$0xff]  ;;  %v1504_v12 = vld [vmem:[%s8626_s4] sm:$0xff] }
  0x32   : > { %430 = vperm.xlu1 %4797, %v368_v13   ;;  %425 = vperm.xlu0 %4796, %v367_v14   ;;  %v5797_v13 = vrot.slane %v360_v6, %v568_v7 }
  0x36   : > { %771 = vperm.xlu1 %4797, %v709_v15   ;;  %766 = vperm.xlu0 %4796, %v708_v16  }
  0x3a   : > { %440 = vperm.xlu1 %4797, %v370_v17   ;;  %435 = vperm.xlu0 %4796, %v369_v18  }
  0x3e   : > { %781 = vperm.xlu1 %4797, %v711_v19   ;;  %776 = vperm.xlu0 %4796, %v710_v20   ;;  %v1507_v19 = vld [vmem:[%s8626_s4 + $0x18] sm:$0xff]  ;;  %v1506_v20 = vld [vmem:[%s8626_s4 + $0x10] sm:$0xff] }
  0x42   : > { %450 = vperm.xlu1 %4797, %v372_v21   ;;  %445 = vperm.xlu0 %4796, %v371_v22  }
  0x46   : > { %791 = vperm.xlu1 %4797, %v713_v23   ;;  %786 = vperm.xlu0 %4796, %v712_v24   ;;  %v5809_v23 = vstv %s1022_s15  ;;  %s353_s15 = scalar_lea.vmem [#allocation4], %s4683_s28 }
  0x47   : > { %s4623_s30 = sshll.u32 %s353_s15, 4  ;;  %s8582_s30 = int_to_ptr.vmem [resolvable:$true] %s4623_s30 }
  0x48   : > { %s5406_s16 = scalar_lea.vmem %s8582_s30, 64  ;;  %p5413_p0 = scmp.lt.s32.totalorder %s8582_s30, %s5411_s9 }
  0x49   : > { %p5407_p11 = scmp.ne.s32.totalorder %s8582_s30, %s5406_s16  ;;  %p5414_p1 = scmp.lt.s32.totalorder %s5412_s22, %s5406_s16 }
  0x4a   : > { %460 = vperm.xlu1 %4797, %v374_v25   ;;  %455 = vperm.xlu0 %4796, %v373_v26  }
  0x4b   : > { %p5408_p12 = pnand %p5407_p11, %p5572_p5  ;;  %p5415_p2 = por %p5414_p1, %p5413_p0 }
  0x4d   : > { %p5409_p13 = pneg %p5408_p12 }
  0x4e   : > { %801 = vperm.xlu1 %4797, %v715_v27   ;;  %796 = vperm.xlu0 %4796, %v714_v28  }
  0x4f   : > { %p5416_p3 = pnand %p5415_p2, %p5409_p13 }
  0x52   : > { %470 = vperm.xlu1 %4797, %v376_v29   ;;  %465 = vperm.xlu0 %4796, %v375_v30  }
  0x56   : > { %811 = vperm.xlu1 %4797, %v717_v31   ;;  %806 = vperm.xlu0 %4796, %v716_v32   ;;  %v1509_v32 = vld [vmem:[%s8626_s4 + $0x28] sm:$0xff] }
  0x5a   : > { %480 = vperm.xlu1 %4797, %v378_v33   ;;  %475 = vperm.xlu0 %4796, %v377_v34  }
  0x5e   : > { %821 = vperm.xlu1 %4797, %v719_v35   ;;  %816 = vperm.xlu0 %4796, %v718_v36   ;;  %v1508_v36 = vld [vmem:[%s8626_s4 + $0x20] sm:$0xff] }
  0x62   : > { %490 = vperm.xlu1 %4797, %v380_v37   ;;  %485 = vperm.xlu0 %4796, %v379_v38  }
  0x66   : > { %831 = vperm.xlu1 %4797, %v721_v39   ;;  %826 = vperm.xlu0 %4796, %v720_v40  }
  0x6a   : > { %500 = vperm.xlu1 %4797, %v382_v41   ;;  %495 = vperm.xlu0 %4796, %v381_v42  }
  0x6e   : > { %841 = vperm.xlu1 %4797, %v723_v43   ;;  %836 = vperm.xlu0 %4796, %v722_v44  }
  0x72   : > { %510 = vperm.xlu1 %4797, %v384_v45   ;;  %505 = vperm.xlu0 %4796, %v383_v46  }
  0x76   : > { %851 = vperm.xlu1 %4797, %v725_v47   ;;  %846 = vperm.xlu0 %4796, %v724_v48  }
  0x7a   : > { %520 = vperm.xlu1 %4797, %v386_v49   ;;  %515 = vperm.xlu0 %4796, %v385_v50  }
  0x7e   : > { %861 = vperm.xlu1 %4797, %v727_v51   ;;  %856 = vperm.xlu0 %4796, %v726_v52  }
  0x82   : > { %530 = vperm.xlu1 %4797, %v388_v53   ;;  %525 = vperm.xlu0 %4796, %v387_v54   ;;  %v1511_v54 = vld [vmem:[%s8626_s4 + $0x38] sm:$0xff] }
  0x86   : > { %871 = vperm.xlu1 %4797, %v729_v55   ;;  %866 = vperm.xlu0 %4796, %v728_v56   ;;  %v1510_v55 = vld [vmem:[%s8626_s4 + $0x30] sm:$0xff] }
  0x8a   : > { %540 = vperm.xlu1 %4797, %v390_v57   ;;  %535 = vperm.xlu0 %4796, %v389_v58  }
  0x8e   : > { %881 = vperm.xlu1 %4797, %v731_v60   ;;  %876 = vperm.xlu0 %4796, %v730_v61  }
  0x92   : > { %550 = vperm.xlu1 %4797, %v392_v63   ;;  %545 = vperm.xlu0 %4796, %v391_v0  }
  0x96   : > { %891 = vperm.xlu1 %4797, %v733_v4   ;;  %886 = vperm.xlu0 %4796, %v732_v5  }
  0x99   : > { %v737_v14 = vpop.permute.xlu1 %736  ;;  %v396_v15 = vpop.permute.xlu0 %395 }
  0x9a   : > { %v574_v16 = vmul.f32 %v5785_v8, %v396_v15  ;;  %v576_v17 = vmul.f32 %v5787_v9, %v396_v15  ;;  %1543 = vperm.xlu1 %4797, %v1505_v11   ;;  %1538 = vperm.xlu0 %4796, %v1504_v12   ;;  %v575_v18 = vmul.f32 %v5789_v10, %v396_v15  ;;  %v1513_v11 = vld [vmem:[%s8626_s4 + $0x48] sm:$0xff] }
  0x9b   : > { %v577_v21 = vmul.f32 %v5797_v13, %v396_v15 }
  0x9c   : > { %v895_v22 = vadd.f32 %v737_v14, %v575_v18  ;;  %v894_v24 = vadd.f32 %v737_v14, %v574_v16  ;;  %v5811_v28 = vadd.f32 %v737_v14, %v576_v17 }
  0x9d   : > { %v742_v25 = vpop.permute.xlu1 %741  ;;  %v401_v26 = vpop.permute.xlu0 %400  ;;  %v897_v27 = vadd.f32 %v737_v14, %v577_v21 }
  0x9e   : > { %v578_v29 = vmul.f32 %v5785_v8, %v401_v26  ;;  %v580_v30 = vmul.f32 %v5787_v9, %v401_v26  ;;  %1553 = vperm.xlu1 %4797, %v1507_v19   ;;  %1548 = vperm.xlu0 %4796, %v1506_v20   ;;  %v579_v31 = vmul.f32 %v5789_v10, %v401_v26  ;;  %vm1024_vm0 = vcmp.ge.f32.partialorder %v895_v22, 0.0 }
  0x9f   : > { %v1153_v33 = vmul.f32 %v5809_v23, %v895_v22  ;;  %v581_v34 = vmul.f32 %v5797_v13, %v401_v26  ;;  %vm1026_vm1 = vcmp.ge.f32.partialorder %v897_v27, 0.0  ;;  %v1155_v35 = vmul.f32 %v5809_v23, %v897_v27 }
  0xa0   : > { %v899_v37 = vadd.f32 %v742_v25, %v579_v31  ;;  %v898_v38 = vadd.f32 %v742_v25, %v578_v29  ;;  %vm1023_vm2 = vcmp.ge.f32.partialorder %v894_v24, 0.0  ;;  %v1152_v39 = vmul.f32 %v5809_v23, %v894_v24 }
  0xa1   : > { %v411_v40 = vpop.permute.xlu1 %410  ;;  %v406_v41 = vpop.permute.xlu0 %405  ;;  %v1281_v42 = vsel %vm1024_vm0, %v895_v22, %v1153_v33  ;;  %v901_v43 = vadd.f32 %v742_v25, %v581_v34  ;;  %v1283_v44 = vsel %vm1026_vm1, %v897_v27, %v1155_v35  ;;  %v900_v45 = vadd.f32 %v742_v25, %v580_v30  ;;  %v1512_v27 = vld [vmem:[%s8626_s4 + $0x40] sm:$0xff] }
  0xa2   : > { %v586_v46 = vmul.f32 %v5785_v8, %v411_v40  ;;  %v587_v47 = vmul.f32 %v5789_v10, %v411_v40  ;;  %v588_v48 = vmul.f32 %v5787_v9, %v411_v40  ;;  %v589_v49 = vmul.f32 %v5797_v13, %v411_v40  ;;  %1563 = vperm.xlu1 %4797, %v1509_v32   ;;  %v1515_v32 = vld [vmem:[%s8626_s4 + $0x58] sm:$0xff] }
  0xa3   : > { %v582_v50 = vmul.f32 %v5785_v8, %v406_v41  ;;  %v583_v51 = vmul.f32 %v5789_v10, %v406_v41  ;;  %v584_v52 = vmul.f32 %v5787_v9, %v406_v41  ;;  %v585_v53 = vmul.f32 %v5797_v13, %v406_v41  ;;  %1558 = vperm.xlu0 %4796, %v1508_v36  }
  0xa4   : > { %vm1028_vm3 = vcmp.ge.f32.partialorder %v899_v37, 0.0  ;;  %v1157_v56 = vmul.f32 %v5809_v23, %v899_v37  ;;  %vm1030_vm4 = vcmp.ge.f32.partialorder %v901_v43, 0.0  ;;  %v1159_v57 = vmul.f32 %v5809_v23, %v901_v43 }
  0xa5   : > { %v752_v58 = vpop.permute.xlu1 %751  ;;  %v747_v60 = vpop.permute.xlu0 %746  ;;  %vm1027_vm5 = vcmp.ge.f32.partialorder %v898_v38, 0.0  ;;  %v1156_v61 = vmul.f32 %v5809_v23, %v898_v38  ;;  %v1280_v63 = vsel %vm1023_vm2, %v894_v24, %v1152_v39  ;;  %vm1025_vm6 = vcmp.ge.f32.partialorder %v5811_v28, 0.0 }
  0xa6   : > { %v5845_v0 = vadd.f32 %v752_v58, %v586_v46  ;;  %v907_v1 = vadd.f32 %v752_v58, %v587_v47  ;;  %v5847_v2 = vadd.f32 %v752_v58, %v588_v48  ;;  %v5849_v3 = vadd.f32 %v752_v58, %v589_v49  ;;  %1573 = vperm.xlu1 %4797, %v1511_v54  }
  0xa7   : > { %v5851_v4 = vadd.f32 %v747_v60, %v582_v50  ;;  %v903_v5 = vadd.f32 %v747_v60, %v583_v51  ;;  %v5853_v6 = vadd.f32 %v747_v60, %v584_v52  ;;  %v5855_v7 = vadd.f32 %v747_v60, %v585_v53  ;;  %1568 = vperm.xlu0 %4796, %v1510_v55   ;;  %v1517_v50 = vld [vmem:[%s8626_s4 + $0x68] sm:$0xff] }
  0xa8   : > { %v1285_v12 = vsel %vm1028_vm3, %v899_v37, %v1157_v56  ;;  %v1287_v14 = vsel %vm1030_vm4, %v901_v43, %v1159_v57  ;;  %v1284_v15 = vsel %vm1027_vm5, %v898_v38, %v1156_v61  ;;  %vm1029_vm7 = vcmp.ge.f32.partialorder %v900_v45, 0.0  ;;  %v1516_v61 = vld [vmem:[%s8626_s4 + $0x60] sm:$0xff] }
  0xa9   : > { %v1409_v16 = vpack.c.bf16 %v1285_v12, %v1281_v42  ;;  %v1411_v17 = vpack.c.bf16 %v1287_v14, %v1283_v44  ;;  %v1408_v18 = vpack.c.bf16 %v1284_v15, %v1280_v63  ;;  %v1154_v19 = vmul.f32 %v5809_v23, %v5811_v28  ;;  %v421_v20 = vpop.permute.xlu1 %420  ;;  %v416_v21 = vpop.permute.xlu0 %415 }
  0xaa   : > { %v1158_v22 = vmul.f32 %v5809_v23, %v900_v45  ;;  %v594_v24 = vmul.f32 %v5785_v8, %v421_v20  ;;  %v595_v25 = vmul.f32 %v5789_v10, %v421_v20  ;;  %v596_v26 = vmul.f32 %v5787_v9, %v421_v20  ;;  %1583 = vperm.xlu1 %4797, %v1513_v11  }
  0xab   : > { %1856 = vmatprep.subr.bf16.mxu0 %v1409_v16  ;;  %2049 = vmatprep.subr.bf16.mxu1 %v1411_v17  ;;  %v1282_v29 = vsel %vm1025_vm6, %v5811_v28, %v1154_v19  ;;  %v597_v30 = vmul.f32 %v5797_v13, %v421_v20  ;;  %v590_v31 = vmul.f32 %v5785_v8, %v416_v21  ;;  %vm1032_vm8 = vcmp.ge.f32.partialorder %v903_v5, 0.0  ;;  %v1519_v20 = vld [vmem:[%s8626_s4 + $0x78] sm:$0xff] }
  0xac   : > { %1857 = vmatpush1.bf16.msra.mxu0 %v1408_v18  ;;  %v1286_v33 = vsel %vm1029_vm7, %v900_v45, %v1158_v22  ;;  %v591_v34 = vmul.f32 %v5789_v10, %v416_v21  ;;  %v592_v35 = vmul.f32 %v5787_v9, %v416_v21  ;;  %v593_v36 = vmul.f32 %v5797_v13, %v416_v21  ;;  %v1514_v45 = vld [vmem:[%s8626_s4 + $0x50] sm:$0xff] }
  0xad   : > { %v1410_v37 = vpack.c.bf16 %v1286_v33, %v1282_v29  ;;  %1578 = vperm.xlu0 %4796, %v1512_v27   ;;  %v762_v28 = vpop.permute.xlu1 %761  ;;  %v757_v38 = vpop.permute.xlu0 %756  ;;  %vm1036_vm9 = vcmp.ge.f32.partialorder %v907_v1, 0.0  ;;  %v1161_v39 = vmul.f32 %v5809_v23, %v903_v5  ;;  %v1165_v40 = vmul.f32 %v5809_v23, %v907_v1  ;;  %v1518_v27 = vld [vmem:[%s8626_s4 + $0x70] sm:$0xff] }
  0xae   : > { %v5886_v41 = vadd.f32 %v762_v28, %v594_v24  ;;  %v5888_v42 = vadd.f32 %v762_v28, %v595_v25  ;;  %v5890_v43 = vadd.f32 %v762_v28, %v596_v26  ;;  %v5892_v44 = vadd.f32 %v762_v28, %v597_v30  ;;  %1593 = vperm.xlu1 %4797, %v1515_v32   ;;  %v1521_v28 = vld [vmem:[%s8626_s4 + $0x88] sm:$0xff] }
  0xaf   : > { %2050 = vmatpush1.bf16.msra.mxu1 %v1410_v37  ;;  %v5897_v46 = vadd.f32 %v757_v38, %v590_v31  ;;  %v5899_v47 = vadd.f32 %v757_v38, %v591_v34  ;;  %v5901_v48 = vadd.f32 %v757_v38, %v592_v35  ;;  %v5903_v49 = vadd.f32 %v757_v38, %v593_v36 }
  0xb0   : > { %v1289_v51 = vsel %vm1032_vm8, %v903_v5, %v1161_v39  ;;  %v1293_v52 = vsel %vm1036_vm9, %v907_v1, %v1165_v40  ;;  %vm1034_vm10 = vcmp.ge.f32.partialorder %v5855_v7, 0.0  ;;  %vm1038_vm11 = vcmp.ge.f32.partialorder %v5849_v3, 0.0 }
  0xb1   : > { %v1413_v53 = vpack.c.bf16 %v1293_v52, %v1289_v51  ;;  %v1163_v54 = vmul.f32 %v5809_v23, %v5855_v7  ;;  %v1167_v55 = vmul.f32 %v5809_v23, %v5849_v3  ;;  %1588 = vperm.xlu0 %4796, %v1514_v45   ;;  %vm1031_vm12 = vcmp.ge.f32.partialorder %v5851_v4, 0.0  ;;  %v431_v56 = vpop.permute.xlu1 %430  ;;  %v426_v57 = vpop.permute.xlu0 %425 }
  0xb2   : > { %vm1035_vm13 = vcmp.ge.f32.partialorder %v5845_v0, 0.0  ;;  %v1160_v58 = vmul.f32 %v5809_v23, %v5851_v4  ;;  %v1164_v60 = vmul.f32 %v5809_v23, %v5845_v0  ;;  %vm1033_vm14 = vcmp.ge.f32.partialorder %v5853_v6, 0.0  ;;  %1603 = vperm.xlu1 %4797, %v1517_v50   ;;  %v1520_v50 = vld [vmem:[%s8626_s4 + $0x80] sm:$0xff] }
  0xb3   : > { %1858 = vmatprep.subr.bf16.mxu0 %v1413_v53  ;;  %v1291_v63 = vsel %vm1034_vm10, %v5855_v7, %v1163_v54  ;;  %v1295_v1 = vsel %vm1038_vm11, %v5849_v3, %v1167_v55  ;;  %vm1037_vm15 = vcmp.ge.f32.partialorder %v5847_v2, 0.0  ;;  %v1162_v5 = vmul.f32 %v5809_v23, %v5853_v6 }
  0xb4   : > { %v1415_v11 = vpack.c.bf16 %v1295_v1, %v1291_v63  ;;  %v1288_v12 = vsel %vm1031_vm12, %v5851_v4, %v1160_v58  ;;  %v1292_v14 = vsel %vm1035_vm13, %v5845_v0, %v1164_v60  ;;  %v1166_v15 = vmul.f32 %v5809_v23, %v5847_v2  ;;  %v1522_v1 = vld [vmem:[%s8626_s4 + $0x90] sm:$0xff] }
  0xb5   : > { %v1412_v16 = vpack.c.bf16 %v1292_v14, %v1288_v12  ;;  %v1290_v7 = vsel %vm1033_vm14, %v5853_v6, %v1162_v5  ;;  %v602_v17 = vmul.f32 %v5785_v8, %v431_v56  ;;  %v603_v3 = vmul.f32 %v5789_v10, %v431_v56  ;;  %1598 = vperm.xlu0 %4796, %v1516_v61   ;;  %v772_v18 = vpop.permute.xlu1 %771  ;;  %v767_v19 = vpop.permute.xlu0 %766 }
  0xb6   : > { %2051 = vmatprep.subr.bf16.mxu1 %v1415_v11  ;;  %v1294_v0 = vsel %vm1037_vm15, %v5847_v2, %v1166_v15  ;;  %v604_v4 = vmul.f32 %v5787_v9, %v431_v56  ;;  %v605_v21 = vmul.f32 %v5797_v13, %v431_v56  ;;  %v598_v6 = vmul.f32 %v5785_v8, %v426_v57 }
  0xb7   : > { %1859 = vmatpush1.bf16.msra.mxu0 %v1412_v16  ;;  %v1414_v22 = vpack.c.bf16 %v1294_v0, %v1290_v7  ;;  %v599_v24 = vmul.f32 %v5789_v10, %v426_v57  ;;  %v600_v25 = vmul.f32 %v5787_v9, %v426_v57  ;;  %v601_v26 = vmul.f32 %v5797_v13, %v426_v57 }
  0xb8   : > { %v5955_v29 = vadd.f32 %v772_v18, %v602_v17  ;;  %v5957_v2 = vadd.f32 %v772_v18, %v603_v3  ;;  %v5959_v30 = vadd.f32 %v772_v18, %v604_v4  ;;  %v5961_v31 = vadd.f32 %v772_v18, %v605_v21  ;;  %1613 = vperm.xlu1 %4797, %v1519_v20  }
  0xb9   : > { %2052 = vmatpush1.bf16.msra.mxu1 %v1414_v22  ;;  %v5963_v32 = vadd.f32 %v767_v19, %v598_v6  ;;  %v5965_v33 = vadd.f32 %v767_v19, %v599_v24  ;;  %v5967_v34 = vadd.f32 %v767_v19, %v600_v25  ;;  %v5969_v35 = vadd.f32 %v767_v19, %v601_v26  ;;  %v441_v36 = vpop.permute.xlu1 %440  ;;  %v436_v37 = vpop.permute.xlu0 %435  ;;  %v1524_v6 = vld [vmem:[%s8626_s4 + $0xa0] sm:$0xff] }
  0xba   : > { %vm1040_vm0 = vcmp.ge.f32.partialorder %v5899_v47, 0.0  ;;  %vm1044_vm1 = vcmp.ge.f32.partialorder %v5888_v42, 0.0  ;;  %v1169_v38 = vmul.f32 %v5809_v23, %v5899_v47  ;;  %v1173_v39 = vmul.f32 %v5809_v23, %v5888_v42  ;;  %1608 = vperm.xlu0 %4796, %v1518_v27  }
  0xbb   : > { %vm1042_vm2 = vcmp.ge.f32.partialorder %v5903_v49, 0.0  ;;  %vm1046_vm3 = vcmp.ge.f32.partialorder %v5892_v44, 0.0  ;;  %v1171_v40 = vmul.f32 %v5809_v23, %v5903_v49  ;;  %v1175_v45 = vmul.f32 %v5809_v23, %v5892_v44 }
  0xbc   : > { %v1297_v51 = vsel %vm1040_vm0, %v5899_v47, %v1169_v38  ;;  %v1301_v52 = vsel %vm1044_vm1, %v5888_v42, %v1173_v39  ;;  %vm1039_vm4 = vcmp.ge.f32.partialorder %v5897_v46, 0.0  ;;  %vm1043_vm5 = vcmp.ge.f32.partialorder %v5886_v41, 0.0  ;;  %1623 = vperm.xlu1 %4797, %v1521_v28   ;;  %v1523_v42 = vld [vmem:[%s8626_s4 + $0x98] sm:$0xff] }
  0xbd   : > { %v1417_v53 = vpack.c.bf16 %v1301_v52, %v1297_v51  ;;  %v1299_v54 = vsel %vm1042_vm2, %v5903_v49, %v1171_v40  ;;  %v1303_v55 = vsel %vm1046_vm3, %v5892_v44, %v1175_v45  ;;  %v1168_v56 = vmul.f32 %v5809_v23, %v5897_v46  ;;  %v782_v57 = vpop.permute.xlu1 %781  ;;  %v777_v58 = vpop.permute.xlu0 %776  ;;  %v1527_v40 = vld [vmem:[%s8626_s4 + $0xb8] sm:$0xff] }
  0xbe   : > { %v1419_v60 = vpack.c.bf16 %v1303_v55, %v1299_v54  ;;  %v1172_v47 = vmul.f32 %v5809_v23, %v5886_v41  ;;  %vm1041_vm6 = vcmp.ge.f32.partialorder %v5901_v48, 0.0  ;;  %vm1045_vm7 = vcmp.ge.f32.partialorder %v5890_v43, 0.0  ;;  %1618 = vperm.xlu0 %4796, %v1520_v50  }
  0xbf   : > { %1860 = vmatprep.subr.bf16.mxu0 %v1417_v53  ;;  %v1296_v44 = vsel %vm1039_vm4, %v5897_v46, %v1168_v56  ;;  %v1170_v49 = vmul.f32 %v5809_v23, %v5901_v48  ;;  %v1174_v61 = vmul.f32 %v5809_v23, %v5890_v43  ;;  %v610_v63 = vmul.f32 %v5785_v8, %v441_v36 }
  0xc0   : > { %2053 = vmatprep.subr.bf16.mxu1 %v1419_v60  ;;  %v1300_v5 = vsel %vm1043_vm5, %v5886_v41, %v1172_v47  ;;  %v611_v11 = vmul.f32 %v5789_v10, %v441_v36  ;;  %v612_v46 = vmul.f32 %v5787_v9, %v441_v36  ;;  %v613_v12 = vmul.f32 %v5797_v13, %v441_v36  ;;  %v1529_v47 = vld [vmem:[%s8626_s4 + $0xc8] sm:$0xff] }
  0xc1   : > { %v1416_v14 = vpack.c.bf16 %v1300_v5, %v1296_v44  ;;  %v1298_v15 = vsel %vm1041_vm6, %v5901_v48, %v1170_v49  ;;  %v1302_v16 = vsel %vm1045_vm7, %v5890_v43, %v1174_v61  ;;  %v606_v7 = vmul.f32 %v5785_v8, %v436_v37  ;;  %1633 = vperm.xlu1 %4797, %v1523_v42   ;;  %v451_v17 = vpop.permute.xlu1 %450  ;;  %v6028_v41 = vpop.permute.xlu0 %445  ;;  %v1525_v48 = vld [vmem:[%s8626_s4 + $0xa8] sm:$0xff] }
  0xc2   : > { %v1418_v3 = vpack.c.bf16 %v1302_v16, %v1298_v15  ;;  %v607_v18 = vmul.f32 %v5789_v10, %v436_v37  ;;  %v608_v19 = vmul.f32 %v5787_v9, %v436_v37  ;;  %v609_v20 = vmul.f32 %v5797_v13, %v436_v37  ;;  %1628 = vperm.xlu0 %4796, %v1522_v1  }
  0xc3   : > { %1861 = vmatpush1.bf16.msra.mxu0 %v1416_v14  ;;  %v6036_v43 = vadd.f32 %v782_v57, %v610_v63  ;;  %v6038_v0 = vadd.f32 %v782_v57, %v611_v11  ;;  %v6040_v4 = vadd.f32 %v782_v57, %v612_v46  ;;  %v6042_v21 = vadd.f32 %v782_v57, %v613_v12 }
  0xc4   : > { %2054 = vmatpush1.bf16.msra.mxu1 %v1418_v3  ;;  %v6047_v22 = vadd.f32 %v777_v58, %v606_v7  ;;  %v6049_v24 = vadd.f32 %v777_v58, %v607_v18  ;;  %v6051_v25 = vadd.f32 %v777_v58, %v608_v19  ;;  %v6053_v26 = vadd.f32 %v777_v58, %v609_v20 }
  0xc5   : > { %vm1048_vm8 = vcmp.ge.f32.partialorder %v5965_v33, 0.0  ;;  %vm1052_vm9 = vcmp.ge.f32.partialorder %v5957_v2, 0.0  ;;  %v1177_v27 = vmul.f32 %v5809_v23, %v5965_v33  ;;  %v1181_v36 = vmul.f32 %v5809_v23, %v5957_v2  ;;  %1643 = vperm.xlu1 %4797, %v1525_v48   ;;  %v792_v37 = vpop.permute.xlu1 %791  ;;  %v787_v28 = vpop.permute.xlu0 %786  ;;  %v4800_v48 = vld [vmem:[%s8625_s3 + $0x4] ss:$8 sps:$4 sm:$0xff]  }
  0xc6   : > { %vm1050_vm10 = vcmp.ge.f32.partialorder %v5969_v35, 0.0  ;;  %vm1054_vm11 = vcmp.ge.f32.partialorder %v5961_v31, 0.0  ;;  %v1179_v38 = vmul.f32 %v5809_v23, %v5969_v35  ;;  %v1183_v39 = vmul.f32 %v5809_v23, %v5961_v31  ;;  %1638 = vperm.xlu0 %4796, %v1524_v6   ;;  %1888 = vmatprep.mubr.bf16.mxu0 %v4800_v48 }
  0xc7   : > { %v1305_v45 = vsel %vm1048_vm8, %v5965_v33, %v1177_v27  ;;  %v1309_v50 = vsel %vm1052_vm9, %v5957_v2, %v1181_v36  ;;  %vm1047_vm12 = vcmp.ge.f32.partialorder %v5963_v32, 0.0  ;;  %vm1051_vm13 = vcmp.ge.f32.partialorder %v5955_v29, 0.0  ;;  %v1526_v2 = vld [vmem:[%s8626_s4 + $0xb0] sm:$0xff]  ;;  %2081 = vmatprep.mubr.bf16.mxu1 %v4800_v48 }
  0xc8   : > { %v1421_v51 = vpack.c.bf16 %v1309_v50, %v1305_v45  ;;  %v1307_v52 = vsel %vm1050_vm10, %v5969_v35, %v1179_v38  ;;  %v1311_v53 = vsel %vm1054_vm11, %v5961_v31, %v1183_v39  ;;  %v1176_v54 = vmul.f32 %v5809_v23, %v5963_v32 }
  0xc9   : > { %v1423_v55 = vpack.c.bf16 %v1311_v53, %v1307_v52  ;;  %v1180_v56 = vmul.f32 %v5809_v23, %v5955_v29  ;;  %vm1049_vm14 = vcmp.ge.f32.partialorder %v5967_v34, 0.0  ;;  %vm1053_vm15 = vcmp.ge.f32.partialorder %v5959_v30, 0.0  ;;  %1653 = vperm.xlu1 %4797, %v1527_v40   ;;  %v6085_v33 = vpop.permute.xlu1 %460  ;;  %v6087_v35 = vpop.permute.xlu0 %455 }
  0xca   : > { %1862 = vmatprep.subr.bf16.mxu0 %v1421_v51  ;;  %v1304_v31 = vsel %vm1047_vm12, %v5963_v32, %v1176_v54  ;;  %v1178_v57 = vmul.f32 %v5809_v23, %v5967_v34  ;;  %v1182_v58 = vmul.f32 %v5809_v23, %v5959_v30  ;;  %v618_v60 = vmul.f32 %v5785_v8, %v451_v17 }
  0xcb   : > { %2055 = vmatprep.subr.bf16.mxu1 %v1423_v55  ;;  %v1308_v42 = vsel %vm1051_vm13, %v5955_v29, %v1180_v56  ;;  %v619_v44 = vmul.f32 %v5789_v10, %v451_v17  ;;  %v620_v32 = vmul.f32 %v5787_v9, %v451_v17  ;;  %v621_v49 = vmul.f32 %v5797_v13, %v451_v17  ;;  %v1531_v17 = vld [vmem:[%s8626_s4 + $0xd8] sm:$0xff] }
  0xcc   : > { %v1420_v61 = vpack.c.bf16 %v1308_v42, %v1304_v31  ;;  %v1306_v63 = vsel %vm1049_vm14, %v5967_v34, %v1178_v57  ;;  %v1310_v1 = vsel %vm1053_vm15, %v5959_v30, %v1182_v58  ;;  %v614_v5 = vmul.f32 %v5785_v8, %v6028_v41  ;;  %1648 = vperm.xlu0 %4796, %v1526_v2   ;;  %v1528_v34 = vld [vmem:[%s8626_s4 + $0xc0] sm:$0xff] }
  0xcd   : > { %v1422_v29 = vpack.c.bf16 %v1310_v1, %v1306_v63  ;;  %v615_v11 = vmul.f32 %v5789_v10, %v6028_v41  ;;  %v616_v46 = vmul.f32 %v5787_v9, %v6028_v41  ;;  %v617_v12 = vmul.f32 %v5797_v13, %v6028_v41  ;;  %1663 = vperm.xlu1 %4797, %v1529_v47   ;;  %v6121_v30 = vpop.permute.xlu1 %801  ;;  %v6142_v20 = vpop.permute.xlu0 %796  ;;  %v1532_v2 = vld [vmem:[%s8626_s4 + $0xe0] sm:$0xff] }
  0xce   : > { %1863 = vmatpush1.bf16.msra.mxu0 %v1420_v61  ;;  %v6123_v14 = vadd.f32 %v792_v37, %v618_v60  ;;  %v6125_v15 = vadd.f32 %v792_v37, %v619_v44  ;;  %v6127_v16 = vadd.f32 %v792_v37, %v620_v32  ;;  %v6129_v7 = vadd.f32 %v792_v37, %v621_v49 }
  0xcf   : > { %2056 = vmatpush1.bf16.msra.mxu1 %v1422_v29  ;;  %v6134_v41 = vadd.f32 %v787_v28, %v614_v5  ;;  %v6136_v3 = vadd.f32 %v787_v28, %v615_v11  ;;  %v6138_v18 = vadd.f32 %v787_v28, %v616_v46  ;;  %v6140_v19 = vadd.f32 %v787_v28, %v617_v12  ;;  %v1530_v28 = vld [vmem:[%s8626_s4 + $0xd0] sm:$0xff] }
  0xd0   : > { %vm1056_vm0 = vcmp.ge.f32.partialorder %v6049_v24, 0.0  ;;  %vm1060_vm1 = vcmp.ge.f32.partialorder %v6038_v0, 0.0  ;;  %v1185_v6 = vmul.f32 %v5809_v23, %v6049_v24  ;;  %v1189_v27 = vmul.f32 %v5809_v23, %v6038_v0  ;;  %1658 = vperm.xlu0 %4796, %v1528_v34  }
  0xd1   : > { %vm1058_vm2 = vcmp.ge.f32.partialorder %v6053_v26, 0.0  ;;  %vm1062_vm3 = vcmp.ge.f32.partialorder %v6042_v21, 0.0  ;;  %v1187_v36 = vmul.f32 %v5809_v23, %v6053_v26  ;;  %v1191_v37 = vmul.f32 %v5809_v23, %v6042_v21  ;;  %1673 = vperm.xlu1 %4797, %v1531_v17   ;;  %v6162_v38 = vpop.permute.xlu1 %470  ;;  %v6186_v56 = vpop.permute.xlu0 %465 }
  0xd2   : > { %v1313_v39 = vsel %vm1056_vm0, %v6049_v24, %v1185_v6  ;;  %v1317_v40 = vsel %vm1060_vm1, %v6038_v0, %v1189_v27  ;;  %vm1055_vm4 = vcmp.ge.f32.partialorder %v6047_v22, 0.0  ;;  %vm1059_vm5 = vcmp.ge.f32.partialorder %v6036_v43, 0.0  ;;  %v1533_v0 = vld [vmem:[%s8626_s4 + $0xe8] sm:$0xff] }
  0xd3   : > { %v1425_v45 = vpack.c.bf16 %v1317_v40, %v1313_v39  ;;  %v1315_v50 = vsel %vm1058_vm2, %v6053_v26, %v1187_v36  ;;  %v1319_v51 = vsel %vm1062_vm3, %v6042_v21, %v1191_v37  ;;  %v1184_v52 = vmul.f32 %v5809_v23, %v6047_v22  ;;  %v2851_v6 = vld [vmem:[%s8628_s6 + $0x8] sm:$0xff] }
  0xd4   : > { %v1427_v53 = vpack.c.bf16 %v1319_v51, %v1315_v50  ;;  %v1188_v54 = vmul.f32 %v5809_v23, %v6036_v43  ;;  %vm1057_vm6 = vcmp.ge.f32.partialorder %v6051_v25, 0.0  ;;  %vm1061_vm7 = vcmp.ge.f32.partialorder %v6040_v4, 0.0  ;;  %1668 = vperm.xlu0 %4796, %v1530_v28  }
  0xd5   : > { %1864 = vmatprep.subr.bf16.mxu0 %v1425_v45  ;;  %v1312_v24 = vsel %vm1055_vm4, %v6047_v22, %v1184_v52  ;;  %v1186_v21 = vmul.f32 %v5809_v23, %v6051_v25  ;;  %v1190_v26 = vmul.f32 %v5809_v23, %v6040_v4  ;;  %v626_v55 = vmul.f32 %v5785_v8, %v6085_v33  ;;  %v6208_v44 = vpop.permute.xlu1 %811  ;;  %v807_v17 = vpop.permute.xlu0 %806 }
  0xd6   : > { %2057 = vmatprep.subr.bf16.mxu1 %v1427_v53  ;;  %v1316_v22 = vsel %vm1059_vm5, %v6036_v43, %v1188_v54  ;;  %v627_v31 = vmul.f32 %v5789_v10, %v6085_v33  ;;  %v628_v57 = vmul.f32 %v5787_v9, %v6085_v33  ;;  %v629_v58 = vmul.f32 %v5797_v13, %v6085_v33  ;;  %v2853_v53 = vld [vmem:[%s8628_s6 + $0x18] sm:$0xff] }
  0xd7   : > { %v1424_v60 = vpack.c.bf16 %v1316_v22, %v1312_v24  ;;  %v1314_v47 = vsel %vm1057_vm6, %v6051_v25, %v1186_v21  ;;  %v1318_v42 = vsel %vm1061_vm7, %v6040_v4, %v1190_v26  ;;  %v622_v43 = vmul.f32 %v5785_v8, %v6087_v35  ;;  %1683 = vperm.xlu1 %4797, %v1533_v0   ;;  %v1535_v4 = vld [vmem:[%s8626_s4 + $0xf8] sm:$0xff] }
  0xd8   : > { %v1426_v32 = vpack.c.bf16 %v1318_v42, %v1314_v47  ;;  %v623_v49 = vmul.f32 %v5789_v10, %v6087_v35  ;;  %v624_v33 = vmul.f32 %v5787_v9, %v6087_v35  ;;  %v625_v25 = vmul.f32 %v5797_v13, %v6087_v35  ;;  %1678 = vperm.xlu0 %4796, %v1532_v2   ;;  %v1534_v35 = vld [vmem:[%s8626_s4 + $0xf0] sm:$0xff] }
  0xd9   : > { %1865 = vmatpush1.bf16.msra.mxu0 %v1424_v60  ;;  %v6220_v61 = vadd.f32 %v6121_v30, %v626_v55  ;;  %v6223_v63 = vadd.f32 %v6121_v30, %v627_v31  ;;  %v6226_v1 = vadd.f32 %v6121_v30, %v628_v57  ;;  %v6229_v5 = vadd.f32 %v6121_v30, %v629_v58  ;;  %v6265_v37 = vpop.permute.xlu1 %480  ;;  %v6297_v21 = vpop.permute.xlu0 %475 }
  0xda   : > { %2058 = vmatpush1.bf16.msra.mxu1 %v1426_v32  ;;  %v6235_v29 = vadd.f32 %v6142_v20, %v622_v43  ;;  %v6238_v11 = vadd.f32 %v6142_v20, %v623_v49  ;;  %v6241_v46 = vadd.f32 %v6142_v20, %v624_v33  ;;  %v6244_v12 = vadd.f32 %v6142_v20, %v625_v25 }
  0xdb   : > { %vm1064_vm8 = vcmp.ge.f32.partialorder %v6136_v3, 0.0  ;;  %vm1068_vm9 = vcmp.ge.f32.partialorder %v6125_v15, 0.0  ;;  %v1193_v34 = vmul.f32 %v5809_v23, %v6136_v3  ;;  %v1197_v30 = vmul.f32 %v5809_v23, %v6125_v15  ;;  %1693 = vperm.xlu1 %4797, %v1535_v4  }
  0xdc   : > { %vm1066_vm10 = vcmp.ge.f32.partialorder %v6140_v19, 0.0  ;;  %vm1070_vm11 = vcmp.ge.f32.partialorder %v6129_v7, 0.0  ;;  %v1195_v20 = vmul.f32 %v5809_v23, %v6140_v19  ;;  %v1199_v48 = vmul.f32 %v5809_v23, %v6129_v7  ;;  %1688 = vperm.xlu0 %4796, %v1534_v35  }
  0xdd   : > { %v1321_v27 = vsel %vm1064_vm8, %v6136_v3, %v1193_v34  ;;  %v1325_v36 = vsel %vm1068_vm9, %v6125_v15, %v1197_v30  ;;  %vm1063_vm12 = vcmp.ge.f32.partialorder %v6134_v41, 0.0  ;;  %vm1067_vm13 = vcmp.ge.f32.partialorder %v6123_v14, 0.0  ;;  %v2850_v15 = vld [vmem:[%s8628_s6] sm:$0xff]  ;;  %v6313_v58 = vpop.permute.xlu1 %821  ;;  %v817_v34 = vpop.permute.xlu0 %816 }
  0xde   : > { %v1429_v28 = vpack.c.bf16 %v1325_v36, %v1321_v27  ;;  %v1323_v39 = vsel %vm1066_vm10, %v6140_v19, %v1195_v20  ;;  %v1327_v40 = vsel %vm1070_vm11, %v6129_v7, %v1199_v48  ;;  %v1192_v45 = vmul.f32 %v5809_v23, %v6134_v41  ;;  %v2854_v30 = vld [vmem:[%s8628_s6 + $0x20] sm:$0xff] }
  0xdf   : > { %v1431_v50 = vpack.c.bf16 %v1327_v40, %v1323_v39  ;;  %v1196_v3 = vmul.f32 %v5809_v23, %v6123_v14  ;;  %vm1065_vm14 = vcmp.ge.f32.partialorder %v6138_v18, 0.0  ;;  %vm1069_vm15 = vcmp.ge.f32.partialorder %v6127_v16, 0.0  ;;  %2889 = vperm.xlu1 %4797, %v2851_v6  }
  0xe0   : > { %1866 = vmatprep.subr.bf16.mxu0 %v1429_v28  ;;  %v1320_v19 = vsel %vm1063_vm12, %v6134_v41, %v1192_v45  ;;  %v1194_v7 = vmul.f32 %v5809_v23, %v6138_v18  ;;  %v1198_v51 = vmul.f32 %v5809_v23, %v6127_v16  ;;  %v634_v52 = vmul.f32 %v5785_v8, %v6162_v38 }
  0xe1   : > { %2059 = vmatprep.subr.bf16.mxu1 %v1431_v50  ;;  %v1324_v54 = vsel %vm1067_vm13, %v6123_v14, %v1196_v3  ;;  %v635_v41 = vmul.f32 %v5789_v10, %v6162_v38  ;;  %v636_v0 = vmul.f32 %v5787_v9, %v6162_v38  ;;  %v637_v24 = vmul.f32 %v5797_v13, %v6162_v38  ;;  %v6364_v28 = vpop.permute.xlu1 %490  ;;  %v2856_v50 = vld [vmem:[%s8628_s6 + $0x30] sm:$0xff] }
  0xe2   : > { %v1428_v26 = vpack.c.bf16 %v1324_v54, %v1320_v19  ;;  %v1322_v55 = vsel %vm1065_vm14, %v6138_v18, %v1194_v7  ;;  %v1326_v14 = vsel %vm1069_vm15, %v6127_v16, %v1198_v51  ;;  %v630_v2 = vmul.f32 %v5785_v8, %v6186_v56  ;;  %2884 = vperm.xlu0 %4796, %v2850_v15   ;;  %v2852_v16 = vld [vmem:[%s8628_s6 + $0x10] sm:$0xff] }
  0xe3   : > { %v1430_v22 = vpack.c.bf16 %v1326_v14, %v1322_v55  ;;  %v631_v31 = vmul.f32 %v5789_v10, %v6186_v56  ;;  %v632_v38 = vmul.f32 %v5787_v9, %v6186_v56  ;;  %v633_v57 = vmul.f32 %v5797_v13, %v6186_v56  ;;  %2899 = vperm.xlu1 %4797, %v2853_v53   ;;  %v2855_v56 = vld [vmem:[%s8628_s6 + $0x28] sm:$0xff]  ;;  %v6400_v53 = vpop.permute.xlu0 %485 }
  0xe4   : > { %1867 = vmatpush1.bf16.msra.mxu0 %v1428_v26  ;;  %v6319_v18 = vadd.f32 %v6208_v44, %v634_v52  ;;  %v6322_v60 = vadd.f32 %v6208_v44, %v635_v41  ;;  %v6325_v47 = vadd.f32 %v6208_v44, %v636_v0  ;;  %v6328_v42 = vadd.f32 %v6208_v44, %v637_v24 }
  0xe5   : > { %2060 = vmatpush1.bf16.msra.mxu1 %v1430_v22  ;;  %v6333_v43 = vadd.f32 %v807_v17, %v630_v2  ;;  %v6335_v32 = vadd.f32 %v807_v17, %v631_v31  ;;  %v6337_v49 = vadd.f32 %v807_v17, %v632_v38  ;;  %v6339_v33 = vadd.f32 %v807_v17, %v633_v57  ;;  %v832_v14 = vpop.permute.xlu1 %831 }
  0xe6   : > { %vm1072_vm0 = vcmp.ge.f32.partialorder %v6238_v11, 0.0  ;;  %vm1076_vm1 = vcmp.ge.f32.partialorder %v6223_v63, 0.0  ;;  %v1201_v44 = vmul.f32 %v5809_v23, %v6238_v11  ;;  %v1205_v25 = vmul.f32 %v5809_v23, %v6223_v63  ;;  %2894 = vperm.xlu0 %4796, %v2852_v16  }
  0xe7   : > { %vm1074_vm2 = vcmp.ge.f32.partialorder %v6244_v12, 0.0  ;;  %vm1078_vm3 = vcmp.ge.f32.partialorder %v6229_v5, 0.0  ;;  %v1203_v4 = vmul.f32 %v5809_v23, %v6244_v12  ;;  %v1207_v35 = vmul.f32 %v5809_v23, %v6229_v5  ;;  %2909 = vperm.xlu1 %4797, %v2855_v56  }
  0xe8   : > { %v1329_v17 = vsel %vm1072_vm0, %v6238_v11, %v1201_v44  ;;  %v1333_v20 = vsel %vm1076_vm1, %v6223_v63, %v1205_v25  ;;  %vm1071_vm4 = vcmp.ge.f32.partialorder %v6235_v29, 0.0  ;;  %vm1075_vm5 = vcmp.ge.f32.partialorder %v6220_v61, 0.0  ;;  %v2857_v63 = vld [vmem:[%s8628_s6 + $0x38] sm:$0xff] }
  0xe9   : > { %v1433_v48 = vpack.c.bf16 %v1333_v20, %v1329_v17  ;;  %v1331_v6 = vsel %vm1074_vm2, %v6244_v12, %v1203_v4  ;;  %v1335_v27 = vsel %vm1078_vm3, %v6229_v5, %v1207_v35  ;;  %v1200_v36 = vmul.f32 %v5809_v23, %v6235_v29  ;;  %v2861_v44 = vld [vmem:[%s8628_s6 + $0x58] sm:$0xff]  ;;  %v827_v35 = vpop.permute.xlu0 %826 }
  0xea   : > { %v1435_v39 = vpack.c.bf16 %v1335_v27, %v1331_v6  ;;  %v1204_v11 = vmul.f32 %v5809_v23, %v6220_v61  ;;  %vm1073_vm6 = vcmp.ge.f32.partialorder %v6241_v46, 0.0  ;;  %vm1077_vm7 = vcmp.ge.f32.partialorder %v6226_v1, 0.0  ;;  %2904 = vperm.xlu0 %4796, %v2854_v30  }
  0xeb   : > { %1868 = vmatprep.subr.bf16.mxu0 %v1433_v48  ;;  %v1328_v5 = vsel %vm1071_vm4, %v6235_v29, %v1200_v36  ;;  %v1202_v12 = vmul.f32 %v5809_v23, %v6241_v46  ;;  %v1206_v40 = vmul.f32 %v5809_v23, %v6226_v1  ;;  %v642_v45 = vmul.f32 %v5785_v8, %v6265_v37 }
  0xec   : > { %2061 = vmatprep.subr.bf16.mxu1 %v1435_v39  ;;  %v1332_v3 = vsel %vm1075_vm5, %v6220_v61, %v1204_v11  ;;  %v643_v29 = vmul.f32 %v5789_v10, %v6265_v37  ;;  %v644_v15 = vmul.f32 %v5787_v9, %v6265_v37  ;;  %v645_v19 = vmul.f32 %v5797_v13, %v6265_v37  ;;  %v2863_v39 = vld [vmem:[%s8628_s6 + $0x68] sm:$0xff] }
  0xed   : > { %v1432_v7 = vpack.c.bf16 %v1332_v3, %v1328_v5  ;;  %v1330_v51 = vsel %vm1073_vm6, %v6241_v46, %v1202_v12  ;;  %v1334_v52 = vsel %vm1077_vm7, %v6226_v1, %v1206_v40  ;;  %v638_v61 = vmul.f32 %v5785_v8, %v6297_v21  ;;  %2919 = vperm.xlu1 %4797, %v2857_v63   ;;  %v2859_v1 = vld [vmem:[%s8628_s6 + $0x48] sm:$0xff] }
  0xee   : > { %v1434_v54 = vpack.c.bf16 %v1334_v52, %v1330_v51  ;;  %v639_v41 = vmul.f32 %v5789_v10, %v6297_v21  ;;  %v640_v37 = vmul.f32 %v5787_v9, %v6297_v21  ;;  %v641_v46 = vmul.f32 %v5797_v13, %v6297_v21  ;;  %2914 = vperm.xlu0 %4796, %v2856_v50   ;;  %v2858_v21 = vld [vmem:[%s8628_s6 + $0x40] sm:$0xff]  ;;  %v2865_v52 = vld [vmem:[%s8628_s6 + $0x78] sm:$0xff] }
  0xef   : > { %1869 = vmatpush1.bf16.msra.mxu0 %v1432_v7  ;;  %v6412_v0 = vadd.f32 %v6313_v58, %v642_v45  ;;  %v6415_v24 = vadd.f32 %v6313_v58, %v643_v29  ;;  %v6418_v26 = vadd.f32 %v6313_v58, %v644_v15  ;;  %v6421_v55 = vadd.f32 %v6313_v58, %v645_v19  ;;  %v496_v15 = vpop.permute.xlu0 %495 }
  0xf0   : > { %2062 = vmatpush1.bf16.msra.mxu1 %v1434_v54  ;;  %v6426_v2 = vadd.f32 %v817_v34, %v638_v61  ;;  %v6428_v22 = vadd.f32 %v817_v34, %v639_v41  ;;  %v6430_v31 = vadd.f32 %v817_v34, %v640_v37  ;;  %v6432_v38 = vadd.f32 %v817_v34, %v641_v46 }
  0xf1   : > { %vm1080_vm8 = vcmp.ge.f32.partialorder %v6335_v32, 0.0  ;;  %vm1084_vm9 = vcmp.ge.f32.partialorder %v6322_v60, 0.0  ;;  %v1209_v57 = vmul.f32 %v5809_v23, %v6335_v32  ;;  %v1213_v58 = vmul.f32 %v5809_v23, %v6322_v60  ;;  %2929 = vperm.xlu1 %4797, %v2859_v1  }
  0xf2   : > { %vm1082_vm10 = vcmp.ge.f32.partialorder %v6339_v33, 0.0  ;;  %vm1086_vm11 = vcmp.ge.f32.partialorder %v6328_v42, 0.0  ;;  %v1211_v16 = vmul.f32 %v5809_v23, %v6339_v33  ;;  %v1215_v56 = vmul.f32 %v5809_v23, %v6328_v42  ;;  %2924 = vperm.xlu0 %4796, %v2858_v21  }
  0xf3   : > { %v1337_v25 = vsel %vm1080_vm8, %v6335_v32, %v1209_v57  ;;  %v1341_v4 = vsel %vm1084_vm9, %v6322_v60, %v1213_v58  ;;  %vm1079_vm12 = vcmp.ge.f32.partialorder %v6333_v43, 0.0  ;;  %vm1083_vm13 = vcmp.ge.f32.partialorder %v6319_v18, 0.0  ;;  %v6461_v60 = vpop.permute.xlu1 %500  ;;  %v2860_v32 = vld [vmem:[%s8628_s6 + $0x50] sm:$0xff] }
  0xf4   : > { %v1437_v34 = vpack.c.bf16 %v1341_v4, %v1337_v25  ;;  %v1339_v30 = vsel %vm1082_vm10, %v6339_v33, %v1211_v16  ;;  %v1343_v17 = vsel %vm1086_vm11, %v6328_v42, %v1215_v56  ;;  %v1208_v20 = vmul.f32 %v5809_v23, %v6333_v43  ;;  %v2864_v57 = vld [vmem:[%s8628_s6 + $0x70] sm:$0xff] }
  0xf5   : > { %v1439_v48 = vpack.c.bf16 %v1343_v17, %v1339_v30  ;;  %v1212_v6 = vmul.f32 %v5809_v23, %v6319_v18  ;;  %vm1081_vm14 = vcmp.ge.f32.partialorder %v6337_v49, 0.0  ;;  %vm1085_vm15 = vcmp.ge.f32.partialorder %v6325_v47, 0.0  ;;  %2939 = vperm.xlu1 %4797, %v2861_v44  }
  0xf6   : > { %1870 = vmatprep.subr.bf16.mxu0 %v1437_v34  ;;  %v1336_v42 = vsel %vm1079_vm12, %v6333_v43, %v1208_v20  ;;  %v1210_v33 = vmul.f32 %v5809_v23, %v6337_v49  ;;  %v1214_v27 = vmul.f32 %v5809_v23, %v6325_v47  ;;  %v650_v36 = vmul.f32 %v5785_v8, %v6364_v28 }
  0xf7   : > { %2063 = vmatprep.subr.bf16.mxu1 %v1439_v48  ;;  %v1340_v11 = vsel %vm1083_vm13, %v6319_v18, %v1212_v6  ;;  %v651_v43 = vmul.f32 %v5789_v10, %v6364_v28  ;;  %v652_v63 = vmul.f32 %v5787_v9, %v6364_v28  ;;  %v653_v5 = vmul.f32 %v5797_v13, %v6364_v28  ;;  %v842_v37 = vpop.permute.xlu1 %841  ;;  %v2866_v48 = vld [vmem:[%s8628_s6 + $0x80] sm:$0xff] }
  0xf8   : > { %v1436_v12 = vpack.c.bf16 %v1340_v11, %v1336_v42  ;;  %v1338_v40 = vsel %vm1081_vm14, %v6337_v49, %v1210_v33  ;;  %v1342_v45 = vsel %vm1085_vm15, %v6325_v47, %v1214_v27  ;;  %v646_v18 = vmul.f32 %v5785_v8, %v6400_v53  ;;  %2934 = vperm.xlu0 %4796, %v2860_v32   ;;  %v2862_v47 = vld [vmem:[%s8628_s6 + $0x60] sm:$0xff] }
  0xf9   : > { %v1438_v50 = vpack.c.bf16 %v1342_v45, %v1338_v40  ;;  %v647_v3 = vmul.f32 %v5789_v10, %v6400_v53  ;;  %v648_v28 = vmul.f32 %v5787_v9, %v6400_v53  ;;  %v649_v29 = vmul.f32 %v5797_v13, %v6400_v53  ;;  %2949 = vperm.xlu1 %4797, %v2863_v39   ;;  %v2868_v45 = vld [vmem:[%s8628_s6 + $0x90] sm:$0xff] }
  0xfa   : > { %1871 = vmatpush1.bf16.msra.mxu0 %v1436_v12  ;;  %v6502_v49 = vadd.f32 %v832_v14, %v650_v36  ;;  %v6504_v19 = vadd.f32 %v832_v14, %v651_v43  ;;  %v6506_v7 = vadd.f32 %v832_v14, %v652_v63  ;;  %v6508_v51 = vadd.f32 %v832_v14, %v653_v5 }
  0xfb   : > { %2064 = vmatpush1.bf16.msra.mxu1 %v1438_v50  ;;  %v6513_v61 = vadd.f32 %v827_v35, %v646_v18  ;;  %v6515_v53 = vadd.f32 %v827_v35, %v647_v3  ;;  %v6517_v54 = vadd.f32 %v827_v35, %v648_v28  ;;  %v6519_v41 = vadd.f32 %v827_v35, %v649_v29  ;;  %v837_v35 = vpop.permute.xlu0 %836  ;;  %v6558_v20 = vpop.permute.xlu1 %510 }
  0xfc   : > { %vm1088_vm0 = vcmp.ge.f32.partialorder %v6428_v22, 0.0  ;;  %vm1092_vm1 = vcmp.ge.f32.partialorder %v6415_v24, 0.0  ;;  %v1217_v46 = vmul.f32 %v5809_v23, %v6428_v22  ;;  %v1221_v1 = vmul.f32 %v5809_v23, %v6415_v24  ;;  %2944 = vperm.xlu0 %4796, %v2862_v47  }
  0xfd   : > { %vm1090_vm2 = vcmp.ge.f32.partialorder %v6432_v38, 0.0  ;;  %vm1094_vm3 = vcmp.ge.f32.partialorder %v6421_v55, 0.0  ;;  %v1219_v14 = vmul.f32 %v5809_v23, %v6432_v38  ;;  %v1223_v21 = vmul.f32 %v5809_v23, %v6421_v55  ;;  %2959 = vperm.xlu1 %4797, %v2865_v52  }
  0xfe   : > { %v1345_v58 = vsel %vm1088_vm0, %v6428_v22, %v1217_v46  ;;  %v1349_v16 = vsel %vm1092_vm1, %v6415_v24, %v1221_v1  ;;  %vm1087_vm4 = vcmp.ge.f32.partialorder %v6426_v2, 0.0  ;;  %vm1091_vm5 = vcmp.ge.f32.partialorder %v6412_v0, 0.0  ;;  %v2867_v24 = vld [vmem:[%s8628_s6 + $0x88] sm:$0xff] }
  0xff   : > { %v1441_v56 = vpack.c.bf16 %v1349_v16, %v1345_v58  ;;  %v1347_v44 = vsel %vm1090_vm2, %v6432_v38, %v1219_v14  ;;  %v1351_v25 = vsel %vm1094_vm3, %v6421_v55, %v1223_v21  ;;  %v1216_v4 = vmul.f32 %v5809_v23, %v6426_v2  ;;  %v506_v40 = vpop.permute.xlu0 %505  ;;  %v852_v47 = vpop.permute.xlu1 %851  ;;  %v2871_v46 = vld [vmem:[%s8628_s6 + $0xa8] sm:$0xff] }
 0x100   : > { %v1443_v34 = vpack.c.bf16 %v1351_v25, %v1347_v44  ;;  %v1220_v30 = vmul.f32 %v5809_v23, %v6412_v0  ;;  %vm1089_vm6 = vcmp.ge.f32.partialorder %v6430_v31, 0.0  ;;  %vm1093_vm7 = vcmp.ge.f32.partialorder %v6418_v26, 0.0  ;;  %2954 = vperm.xlu0 %4796, %v2864_v57  }
 0x101   : > { %1872 = vmatprep.subr.bf16.mxu0 %v1441_v56  ;;  %v1344_v55 = vsel %vm1087_vm4, %v6426_v2, %v1216_v4  ;;  %v1218_v22 = vmul.f32 %v5809_v23, %v6430_v31  ;;  %v1222_v38 = vmul.f32 %v5809_v23, %v6418_v26  ;;  %v658_v17 = vmul.f32 %v5785_v8, %v6461_v60 }
 0x102   : > { %2065 = vmatprep.subr.bf16.mxu1 %v1443_v34  ;;  %v1348_v2 = vsel %vm1091_vm5, %v6412_v0, %v1220_v30  ;;  %v659_v6 = vmul.f32 %v5789_v10, %v6461_v60  ;;  %v660_v32 = vmul.f32 %v5787_v9, %v6461_v60  ;;  %v661_v42 = vmul.f32 %v5797_v13, %v6461_v60  ;;  %v2869_v60 = vld [vmem:[%s8628_s6 + $0x98] sm:$0xff] }
 0x103   : > { %v1440_v33 = vpack.c.bf16 %v1348_v2, %v1344_v55  ;;  %v1346_v27 = vsel %vm1089_vm6, %v6430_v31, %v1218_v22  ;;  %v1350_v36 = vsel %vm1093_vm7, %v6418_v26, %v1222_v38  ;;  %v654_v0 = vmul.f32 %v5785_v8, %v496_v15  ;;  %2969 = vperm.xlu1 %4797, %v2867_v24   ;;  %v521_v55 = vpop.permute.xlu1 %520 }
 0x104   : > { %v1442_v39 = vpack.c.bf16 %v1350_v36, %v1346_v27  ;;  %v655_v11 = vmul.f32 %v5789_v10, %v496_v15  ;;  %v656_v43 = vmul.f32 %v5787_v9, %v496_v15  ;;  %v657_v63 = vmul.f32 %v5797_v13, %v496_v15  ;;  %2964 = vperm.xlu0 %4796, %v2866_v48   ;;  %v2875_v27 = vld [vmem:[%s8628_s6 + $0xc8] sm:$0xff] }
 0x105   : > { %1873 = vmatpush1.bf16.msra.mxu0 %v1440_v33  ;;  %v6585_v31 = vadd.f32 %v842_v37, %v658_v17  ;;  %v6587_v5 = vadd.f32 %v842_v37, %v659_v6  ;;  %v6589_v26 = vadd.f32 %v842_v37, %v660_v32  ;;  %v6591_v12 = vadd.f32 %v842_v37, %v661_v42  ;;  %v2872_v32 = vld [vmem:[%s8628_s6 + $0xb0] sm:$0xff] }
 0x106   : > { %2066 = vmatpush1.bf16.msra.mxu1 %v1442_v39  ;;  %v6596_v18 = vadd.f32 %v837_v35, %v654_v0  ;;  %v6598_v50 = vadd.f32 %v837_v35, %v655_v11  ;;  %v6600_v3 = vadd.f32 %v837_v35, %v656_v43  ;;  %v6602_v28 = vadd.f32 %v837_v35, %v657_v63  ;;  %v2873_v35 = vld [vmem:[%s8628_s6 + $0xb8] sm:$0xff] }
 0x107   : > { %vm1096_vm8 = vcmp.ge.f32.partialorder %v6515_v53, 0.0  ;;  %vm1100_vm9 = vcmp.ge.f32.partialorder %v6504_v19, 0.0  ;;  %v1225_v29 = vmul.f32 %v5809_v23, %v6515_v53  ;;  %v1229_v15 = vmul.f32 %v5809_v23, %v6504_v19  ;;  %2979 = vperm.xlu1 %4797, %v2869_v60  }
 0x108   : > { %vm1098_vm10 = vcmp.ge.f32.partialorder %v6519_v41, 0.0  ;;  %vm1102_vm11 = vcmp.ge.f32.partialorder %v6508_v51, 0.0  ;;  %v1227_v52 = vmul.f32 %v5809_v23, %v6519_v41  ;;  %v1231_v37 = vmul.f32 %v5809_v23, %v6508_v51  ;;  %2974 = vperm.xlu0 %4796, %v2868_v45  }
 0x109   : > { %v1353_v1 = vsel %vm1096_vm8, %v6515_v53, %v1225_v29  ;;  %v1357_v14 = vsel %vm1100_vm9, %v6504_v19, %v1229_v15  ;;  %vm1095_vm12 = vcmp.ge.f32.partialorder %v6513_v61, 0.0  ;;  %vm1099_vm13 = vcmp.ge.f32.partialorder %v6502_v49, 0.0  ;;  %v847_v19 = vpop.permute.xlu0 %846  ;;  %v2870_v53 = vld [vmem:[%s8628_s6 + $0xa0] sm:$0xff]  ;;  %v862_v29 = vpop.permute.xlu1 %861 }
 0x10a   : > { %v1445_v21 = vpack.c.bf16 %v1357_v14, %v1353_v1  ;;  %v1355_v57 = vsel %vm1098_vm10, %v6519_v41, %v1227_v52  ;;  %v1359_v58 = vsel %vm1102_vm11, %v6508_v51, %v1231_v37  ;;  %v1224_v16 = vmul.f32 %v5809_v23, %v6513_v61  ;;  %v2874_v15 = vld [vmem:[%s8628_s6 + $0xc0] sm:$0xff] }
 0x10b   : > { %v1447_v56 = vpack.c.bf16 %v1359_v58, %v1355_v57  ;;  %v1228_v44 = vmul.f32 %v5809_v23, %v6502_v49  ;;  %vm1097_vm14 = vcmp.ge.f32.partialorder %v6517_v54, 0.0  ;;  %vm1101_vm15 = vcmp.ge.f32.partialorder %v6506_v7, 0.0  ;;  %2989 = vperm.xlu1 %4797, %v2871_v46  }
 0x10c   : > { %1874 = vmatprep.subr.bf16.mxu0 %v1445_v21  ;;  %v1352_v51 = vsel %vm1095_vm12, %v6513_v61, %v1224_v16  ;;  %v1226_v41 = vmul.f32 %v5809_v23, %v6517_v54  ;;  %v1230_v25 = vmul.f32 %v5809_v23, %v6506_v7  ;;  %v666_v4 = vmul.f32 %v5785_v8, %v6558_v20 }
 0x10d   : > { %2067 = vmatprep.subr.bf16.mxu1 %v1447_v56  ;;  %v1356_v34 = vsel %vm1099_vm13, %v6502_v49, %v1228_v44  ;;  %v667_v61 = vmul.f32 %v5789_v10, %v6558_v20  ;;  %v668_v30 = vmul.f32 %v5787_v9, %v6558_v20  ;;  %v669_v24 = vmul.f32 %v5797_v13, %v6558_v20  ;;  %v516_v43 = vpop.permute.xlu0 %515  ;;  %v4100_v56 = vld [vmem:[%s8629_s7] sm:$0xff] }
 0x10e   : > { %v1444_v22 = vpack.c.bf16 %v1356_v34, %v1352_v51  ;;  %v1354_v38 = vsel %vm1097_vm14, %v6517_v54, %v1226_v41  ;;  %v1358_v17 = vsel %vm1101_vm15, %v6506_v7, %v1230_v25  ;;  %v662_v49 = vmul.f32 %v5785_v8, %v506_v40  ;;  %2984 = vperm.xlu0 %4796, %v2870_v53  }
 0x10f   : > { %v1446_v48 = vpack.c.bf16 %v1358_v17, %v1354_v38  ;;  %v663_v2 = vmul.f32 %v5789_v10, %v506_v40  ;;  %v664_v6 = vmul.f32 %v5787_v9, %v506_v40  ;;  %v665_v20 = vmul.f32 %v5797_v13, %v506_v40  ;;  %2999 = vperm.xlu1 %4797, %v2873_v35   ;;  %v531_v35 = vpop.permute.xlu1 %530  ;;  %v4102_v38 = vld [vmem:[%s8629_s7 + $0x10] sm:$0xff] }
 0x110   : > { %1875 = vmatpush1.bf16.msra.mxu0 %v1444_v22  ;;  %v6666_v54 = vadd.f32 %v852_v47, %v666_v4  ;;  %v6668_v42 = vadd.f32 %v852_v47, %v667_v61  ;;  %v6670_v7 = vadd.f32 %v852_v47, %v668_v30  ;;  %v6672_v33 = vadd.f32 %v852_v47, %v669_v24 }
 0x111   : > { %2068 = vmatpush1.bf16.msra.mxu1 %v1446_v48  ;;  %v6677_v36 = vadd.f32 %v847_v19, %v662_v49  ;;  %v6679_v0 = vadd.f32 %v847_v19, %v663_v2  ;;  %v6681_v39 = vadd.f32 %v847_v19, %v664_v6  ;;  %v6683_v11 = vadd.f32 %v847_v19, %v665_v20  ;;  %v857_v16 = vpop.permute.xlu0 %856 }
 0x112   : > { %vm1104_vm0 = vcmp.ge.f32.partialorder %v6598_v50, 0.0  ;;  %vm1108_vm1 = vcmp.ge.f32.partialorder %v6587_v5, 0.0  ;;  %v1233_v63 = vmul.f32 %v5809_v23, %v6598_v50  ;;  %v1237_v60 = vmul.f32 %v5809_v23, %v6587_v5  ;;  %2994 = vperm.xlu0 %4796, %v2872_v32  }
 0x113   : > { %vm1106_vm2 = vcmp.ge.f32.partialorder %v6602_v28, 0.0  ;;  %vm1110_vm3 = vcmp.ge.f32.partialorder %v6591_v12, 0.0  ;;  %v1235_v40 = vmul.f32 %v5809_v23, %v6602_v28  ;;  %v1239_v45 = vmul.f32 %v5809_v23, %v6591_v12  ;;  %3009 = vperm.xlu1 %4797, %v2875_v27  }
 0x114   : > { %v1361_v47 = vsel %vm1104_vm0, %v6598_v50, %v1233_v63  ;;  %v1365_v52 = vsel %vm1108_vm1, %v6587_v5, %v1237_v60  ;;  %vm1103_vm4 = vcmp.ge.f32.partialorder %v6596_v18, 0.0  ;;  %vm1107_vm5 = vcmp.ge.f32.partialorder %v6585_v31, 0.0  ;;  %v4101_v5 = vld [vmem:[%s8629_s7 + $0x8] sm:$0xff] }
 0x115   : > { %v1449_v37 = vpack.c.bf16 %v1365_v52, %v1361_v47  ;;  %v1363_v46 = vsel %vm1106_vm2, %v6602_v28, %v1235_v40  ;;  %v1367_v1 = vsel %vm1110_vm3, %v6591_v12, %v1239_v45  ;;  %v1232_v14 = vmul.f32 %v5809_v23, %v6596_v18  ;;  %v526_v32 = vpop.permute.xlu0 %525  ;;  %v4105_v63 = vld [vmem:[%s8629_s7 + $0x28] sm:$0xff]  ;;  %v872_v45 = vpop.permute.xlu1 %871 }
 0x116   : > { %v1451_v21 = vpack.c.bf16 %v1367_v1, %v1363_v46  ;;  %v1236_v57 = vmul.f32 %v5809_v23, %v6585_v31  ;;  %vm1105_vm6 = vcmp.ge.f32.partialorder %v6600_v3, 0.0  ;;  %vm1109_vm7 = vcmp.ge.f32.partialorder %v6589_v26, 0.0  ;;  %3004 = vperm.xlu0 %4796, %v2874_v15  }
 0x117   : > { %1876 = vmatprep.subr.bf16.mxu0 %v1449_v37  ;;  %v1360_v50 = vsel %vm1103_vm4, %v6596_v18, %v1232_v14  ;;  %v1234_v12 = vmul.f32 %v5809_v23, %v6600_v3  ;;  %v1238_v28 = vmul.f32 %v5809_v23, %v6589_v26  ;;  %v674_v58 = vmul.f32 %v5785_v8, %v521_v55  ;;  %v4107_v14 = vld [vmem:[%s8629_s7 + $0x38] sm:$0xff] }
 0x118   : > { %2069 = vmatprep.subr.bf16.mxu1 %v1451_v21  ;;  %v1364_v44 = vsel %vm1107_vm5, %v6585_v31, %v1236_v57  ;;  %v675_v18 = vmul.f32 %v5789_v10, %v521_v55  ;;  %v676_v19 = vmul.f32 %v5787_v9, %v521_v55  ;;  %v677_v53 = vmul.f32 %v5797_v13, %v521_v55 }
 0x119   : > { %v1448_v51 = vpack.c.bf16 %v1364_v44, %v1360_v50  ;;  %v1362_v41 = vsel %vm1105_vm6, %v6600_v3, %v1234_v12  ;;  %v1366_v25 = vsel %vm1109_vm7, %v6589_v26, %v1238_v28  ;;  %v670_v4 = vmul.f32 %v5785_v8, %v516_v43  ;;  %4139 = vperm.xlu1 %4797, %v4101_v5   ;;  %v4103_v3 = vld [vmem:[%s8629_s7 + $0x18] sm:$0xff]  ;;  %v867_v50 = vpop.permute.xlu0 %866 }
 0x11a   : > { %v1450_v31 = vpack.c.bf16 %v1366_v25, %v1362_v41  ;;  %v671_v34 = vmul.f32 %v5789_v10, %v516_v43  ;;  %v672_v61 = vmul.f32 %v5787_v9, %v516_v43  ;;  %v673_v30 = vmul.f32 %v5797_v13, %v516_v43  ;;  %4134 = vperm.xlu0 %4796, %v4100_v56   ;;  %v4109_v25 = vld [vmem:[%s8629_s7 + $0x48] sm:$0xff] }
 0x11b   : > { %1877 = vmatpush1.bf16.msra.mxu0 %v1448_v51  ;;  %v6743_v24 = vadd.f32 %v862_v29, %v674_v58  ;;  %v6745_v26 = vadd.f32 %v862_v29, %v675_v18  ;;  %v6747_v55 = vadd.f32 %v862_v29, %v676_v19  ;;  %v6749_v22 = vadd.f32 %v862_v29, %v677_v53  ;;  %v541_v19 = vpop.permute.xlu1 %540 }
 0x11c   : > { %2070 = vmatpush1.bf16.msra.mxu1 %v1450_v31  ;;  %v6754_v17 = vadd.f32 %v857_v16, %v670_v4  ;;  %v6756_v49 = vadd.f32 %v857_v16, %v671_v34  ;;  %v6758_v48 = vadd.f32 %v857_v16, %v672_v61  ;;  %v6760_v2 = vadd.f32 %v857_v16, %v673_v30 }
 0x11d   : > { %vm1112_vm8 = vcmp.ge.f32.partialorder %v6679_v0, 0.0  ;;  %vm1116_vm9 = vcmp.ge.f32.partialorder %v6668_v42, 0.0  ;;  %v1241_v6 = vmul.f32 %v5809_v23, %v6679_v0  ;;  %v1245_v20 = vmul.f32 %v5809_v23, %v6668_v42  ;;  %4149 = vperm.xlu1 %4797, %v4103_v3  }
 0x11e   : > { %vm1114_vm10 = vcmp.ge.f32.partialorder %v6683_v11, 0.0  ;;  %vm1118_vm11 = vcmp.ge.f32.partialorder %v6672_v33, 0.0  ;;  %v1243_v27 = vmul.f32 %v5809_v23, %v6683_v11  ;;  %v1247_v43 = vmul.f32 %v5809_v23, %v6672_v33  ;;  %4144 = vperm.xlu0 %4796, %v4102_v38  }
 0x11f   : > { %v1369_v60 = vsel %vm1112_vm8, %v6679_v0, %v1241_v6  ;;  %v1373_v40 = vsel %vm1116_vm9, %v6668_v42, %v1245_v20  ;;  %vm1111_vm12 = vcmp.ge.f32.partialorder %v6677_v36, 0.0  ;;  %vm1115_vm13 = vcmp.ge.f32.partialorder %v6666_v54, 0.0  ;;  %v4104_v42 = vld [vmem:[%s8629_s7 + $0x20] sm:$0xff]  ;;  %v536_v6 = vpop.permute.xlu0 %535 }
 0x120   : > { %v1453_v29 = vpack.c.bf16 %v1373_v40, %v1369_v60  ;;  %v1371_v15 = vsel %vm1114_vm10, %v6683_v11, %v1243_v27  ;;  %v1375_v47 = vsel %vm1118_vm11, %v6672_v33, %v1247_v43  ;;  %v1240_v52 = vmul.f32 %v5809_v23, %v6677_v36  ;;  %v4108_v20 = vld [vmem:[%s8629_s7 + $0x40] sm:$0xff] }
 0x121   : > { %v1455_v37 = vpack.c.bf16 %v1375_v47, %v1371_v15  ;;  %v1244_v46 = vmul.f32 %v5809_v23, %v6666_v54  ;;  %vm1113_vm14 = vcmp.ge.f32.partialorder %v6681_v39, 0.0  ;;  %vm1117_vm15 = vcmp.ge.f32.partialorder %v6670_v7, 0.0  ;;  %4159 = vperm.xlu1 %4797, %v4105_v63  }
 0x122   : > { %1878 = vmatprep.subr.bf16.mxu0 %v1453_v29  ;;  %v1368_v0 = vsel %vm1111_vm12, %v6677_v36, %v1240_v52  ;;  %v1242_v33 = vmul.f32 %v5809_v23, %v6681_v39  ;;  %v1246_v11 = vmul.f32 %v5809_v23, %v6670_v7  ;;  %v682_v1 = vmul.f32 %v5785_v8, %v531_v35  ;;  %v4110_v52 = vld [vmem:[%s8629_s7 + $0x50] sm:$0xff] }
 0x123   : > { %2071 = vmatprep.subr.bf16.mxu1 %v1455_v37  ;;  %v1372_v21 = vsel %vm1115_vm13, %v6666_v54, %v1244_v46  ;;  %v683_v57 = vmul.f32 %v5789_v10, %v531_v35  ;;  %v684_v36 = vmul.f32 %v5787_v9, %v531_v35  ;;  %v685_v5 = vmul.f32 %v5797_v13, %v531_v35 }
 0x124   : > { %v1452_v12 = vpack.c.bf16 %v1372_v21, %v1368_v0  ;;  %v1370_v28 = vsel %vm1113_vm14, %v6681_v39, %v1242_v33  ;;  %v1374_v58 = vsel %vm1117_vm15, %v6670_v7, %v1246_v11  ;;  %v678_v16 = vmul.f32 %v5785_v8, %v526_v32  ;;  %4154 = vperm.xlu0 %4796, %v4104_v42   ;;  %v4106_v39 = vld [vmem:[%s8629_s7 + $0x30] sm:$0xff] }
 0x125   : > { %v1454_v54 = vpack.c.bf16 %v1374_v58, %v1370_v28  ;;  %v679_v56 = vmul.f32 %v5789_v10, %v526_v32  ;;  %v680_v44 = vmul.f32 %v5787_v9, %v526_v32  ;;  %v681_v18 = vmul.f32 %v5797_v13, %v526_v32  ;;  %4169 = vperm.xlu1 %4797, %v4107_v14   ;;  %v877_v14 = vpop.permute.xlu0 %876  ;;  %v4112_v58 = vld [vmem:[%s8629_s7 + $0x60] sm:$0xff] }
 0x126   : > { %1879 = vmatpush1.bf16.msra.mxu0 %v1452_v12  ;;  %v6820_v53 = vadd.f32 %v872_v45, %v682_v1  ;;  %v6822_v7 = vadd.f32 %v872_v45, %v683_v57  ;;  %v6824_v51 = vadd.f32 %v872_v45, %v684_v36  ;;  %v6826_v41 = vadd.f32 %v872_v45, %v685_v5  ;;  %v882_v45 = vpop.permute.xlu1 %881 }
 0x127   : > { %2072 = vmatpush1.bf16.msra.mxu1 %v1454_v54  ;;  %v6831_v4 = vadd.f32 %v867_v50, %v678_v16  ;;  %v6833_v35 = vadd.f32 %v867_v50, %v679_v56  ;;  %v6835_v31 = vadd.f32 %v867_v50, %v680_v44  ;;  %v6837_v34 = vadd.f32 %v867_v50, %v681_v18 }
 0x128   : > { %vm1120_vm0 = vcmp.ge.f32.partialorder %v6756_v49, 0.0  ;;  %vm1124_vm1 = vcmp.ge.f32.partialorder %v6745_v26, 0.0  ;;  %v1249_v61 = vmul.f32 %v5809_v23, %v6756_v49  ;;  %v1253_v30 = vmul.f32 %v5809_v23, %v6745_v26  ;;  %4164 = vperm.xlu0 %4796, %v4106_v39  }
 0x129   : > { %vm1122_vm2 = vcmp.ge.f32.partialorder %v6760_v2, 0.0  ;;  %vm1126_vm3 = vcmp.ge.f32.partialorder %v6749_v22, 0.0  ;;  %v1251_v3 = vmul.f32 %v5809_v23, %v6760_v2  ;;  %v1255_v38 = vmul.f32 %v5809_v23, %v6749_v22  ;;  %4179 = vperm.xlu1 %4797, %v4109_v25  }
 0x12a   : > { %v1377_v32 = vsel %vm1120_vm0, %v6756_v49, %v1249_v61  ;;  %v1381_v27 = vsel %vm1124_vm1, %v6745_v26, %v1253_v30  ;;  %vm1119_vm4 = vcmp.ge.f32.partialorder %v6754_v17, 0.0  ;;  %vm1123_vm5 = vcmp.ge.f32.partialorder %v6743_v24, 0.0  ;;  %v4111_v26 = vld [vmem:[%s8629_s7 + $0x58] sm:$0xff]  ;;  %v551_v28 = vpop.permute.xlu1 %550 }
 0x12b   : > { %v1457_v43 = vpack.c.bf16 %v1381_v27, %v1377_v32  ;;  %v1379_v63 = vsel %vm1122_vm2, %v6760_v2, %v1251_v3  ;;  %v1383_v60 = vsel %vm1126_vm3, %v6749_v22, %v1255_v38  ;;  %v1248_v40 = vmul.f32 %v5809_v23, %v6754_v17  ;;  %v4115_v61 = vld [vmem:[%s8629_s7 + $0x78] sm:$0xff]  ;;  %v546_v38 = vpop.permute.xlu0 %545 }
 0x12c   : > { %v1459_v29 = vpack.c.bf16 %v1383_v60, %v1379_v63  ;;  %v1252_v15 = vmul.f32 %v5809_v23, %v6743_v24  ;;  %vm1121_vm6 = vcmp.ge.f32.partialorder %v6758_v48, 0.0  ;;  %vm1125_vm7 = vcmp.ge.f32.partialorder %v6747_v55, 0.0  ;;  %4174 = vperm.xlu0 %4796, %v4108_v20  }
 0x12d   : > { %1880 = vmatprep.subr.bf16.mxu0 %v1457_v43  ;;  %v1376_v22 = vsel %vm1119_vm4, %v6754_v17, %v1248_v40  ;;  %v1250_v49 = vmul.f32 %v5809_v23, %v6758_v48  ;;  %v1254_v2 = vmul.f32 %v5809_v23, %v6747_v55  ;;  %v690_v47 = vmul.f32 %v5785_v8, %v541_v19 }
 0x12e   : > { %2073 = vmatprep.subr.bf16.mxu1 %v1459_v29  ;;  %v1380_v37 = vsel %vm1123_vm5, %v6743_v24, %v1252_v15  ;;  %v691_v46 = vmul.f32 %v5789_v10, %v541_v19  ;;  %v692_v17 = vmul.f32 %v5787_v9, %v541_v19  ;;  %v693_v42 = vmul.f32 %v5797_v13, %v541_v19 }
 0x12f   : > { %v1456_v0 = vpack.c.bf16 %v1380_v37, %v1376_v22  ;;  %v1378_v33 = vsel %vm1121_vm6, %v6758_v48, %v1250_v49  ;;  %v1382_v11 = vsel %vm1125_vm7, %v6747_v55, %v1254_v2  ;;  %v686_v1 = vmul.f32 %v5785_v8, %v536_v6  ;;  %4189 = vperm.xlu1 %4797, %v4111_v26   ;;  %v4113_v48 = vld [vmem:[%s8629_s7 + $0x68] sm:$0xff] }
 0x130   : > { %v1458_v24 = vpack.c.bf16 %v1382_v11, %v1378_v33  ;;  %v687_v21 = vmul.f32 %v5789_v10, %v536_v6  ;;  %v688_v57 = vmul.f32 %v5787_v9, %v536_v6  ;;  %v689_v36 = vmul.f32 %v5797_v13, %v536_v6  ;;  %4184 = vperm.xlu0 %4796, %v4110_v52   ;;  %v2877_v11 = vld [vmem:[%s8628_s6 + $0xd8] sm:$0xff] }
 0x131   : > { %1881 = vmatpush1.bf16.msra.mxu0 %v1456_v0  ;;  %v6897_v5 = vadd.f32 %v882_v45, %v690_v47  ;;  %v6899_v55 = vadd.f32 %v882_v45, %v691_v46  ;;  %v6901_v50 = vadd.f32 %v882_v45, %v692_v17  ;;  %v6903_v12 = vadd.f32 %v882_v45, %v693_v42  ;;  %v2876_v45 = vld [vmem:[%s8628_s6 + $0xd0] sm:$0xff]  ;;  %v887_v17 = vpop.permute.xlu0 %886 }
 0x132   : > { %2074 = vmatpush1.bf16.msra.mxu1 %v1458_v24  ;;  %v6908_v16 = vadd.f32 %v877_v14, %v686_v1  ;;  %v6910_v54 = vadd.f32 %v877_v14, %v687_v21  ;;  %v6912_v56 = vadd.f32 %v877_v14, %v688_v57  ;;  %v6914_v44 = vadd.f32 %v877_v14, %v689_v36  ;;  %v4117_v57 = vld [vmem:[%s8629_s7 + $0x88] sm:$0xff] }
 0x133   : > { %vm1128_vm8 = vcmp.ge.f32.partialorder %v6833_v35, 0.0  ;;  %vm1132_vm9 = vcmp.ge.f32.partialorder %v6822_v7, 0.0  ;;  %v1257_v18 = vmul.f32 %v5809_v23, %v6833_v35  ;;  %v1261_v19 = vmul.f32 %v5809_v23, %v6822_v7  ;;  %4199 = vperm.xlu1 %4797, %v4113_v48  }
 0x134   : > { %vm1130_vm10 = vcmp.ge.f32.partialorder %v6837_v34, 0.0  ;;  %vm1134_vm11 = vcmp.ge.f32.partialorder %v6826_v41, 0.0  ;;  %v1259_v39 = vmul.f32 %v5809_v23, %v6837_v34  ;;  %v1263_v25 = vmul.f32 %v5809_v23, %v6826_v41  ;;  %4194 = vperm.xlu0 %4796, %v4112_v58  }
 0x135   : > { %v1385_v30 = vsel %vm1128_vm8, %v6833_v35, %v1257_v18  ;;  %v1389_v3 = vsel %vm1132_vm9, %v6822_v7, %v1261_v19  ;;  %vm1127_vm12 = vcmp.ge.f32.partialorder %v6831_v4, 0.0  ;;  %vm1131_vm13 = vcmp.ge.f32.partialorder %v6820_v53, 0.0  ;;  %v892_v7 = vpop.permute.xlu1 %891  ;;  %v4114_v35 = vld [vmem:[%s8629_s7 + $0x70] sm:$0xff] }
 0x136   : > { %v1461_v6 = vpack.c.bf16 %v1389_v3, %v1385_v30  ;;  %v1387_v20 = vsel %vm1130_vm10, %v6837_v34, %v1259_v39  ;;  %v1391_v32 = vsel %vm1134_vm11, %v6826_v41, %v1263_v25  ;;  %v1256_v27 = vmul.f32 %v5809_v23, %v6831_v4 }
 0x137   : > { %v1463_v43 = vpack.c.bf16 %v1391_v32, %v1387_v20  ;;  %v1260_v63 = vmul.f32 %v5809_v23, %v6820_v53  ;;  %vm1129_vm14 = vcmp.ge.f32.partialorder %v6835_v31, 0.0  ;;  %vm1133_vm15 = vcmp.ge.f32.partialorder %v6824_v51, 0.0  ;;  %4209 = vperm.xlu1 %4797, %v4115_v61  }
 0x138   : > { %1882 = vmatprep.subr.bf16.mxu0 %v1461_v6  ;;  %v1384_v41 = vsel %vm1127_vm12, %v6831_v4, %v1256_v27  ;;  %v1258_v34 = vmul.f32 %v5809_v23, %v6835_v31  ;;  %v1262_v60 = vmul.f32 %v5809_v23, %v6824_v51  ;;  %v698_v40 = vmul.f32 %v5785_v8, %v551_v28 }
 0x139   : > { %2075 = vmatprep.subr.bf16.mxu1 %v1463_v43  ;;  %v1388_v29 = vsel %vm1131_vm13, %v6820_v53, %v1260_v63  ;;  %v699_v15 = vmul.f32 %v5789_v10, %v551_v28  ;;  %v700_v4 = vmul.f32 %v5787_v9, %v551_v28  ;;  %v701_v26 = vmul.f32 %v5797_v13, %v551_v28 }
 0x13a   : > { %v1460_v22 = vpack.c.bf16 %v1388_v29, %v1384_v41  ;;  %v1386_v49 = vsel %vm1129_vm14, %v6835_v31, %v1258_v34  ;;  %v1390_v2 = vsel %vm1133_vm15, %v6824_v51, %v1262_v60  ;;  %v6967_v47 = vadd.f32 %v892_v7, %v698_v40  ;;  %4204 = vperm.xlu0 %4796, %v4114_v35   ;;  %v4116_v31 = vld [vmem:[%s8629_s7 + $0x80] sm:$0xff]  ;;  %v2880_v60 = vld [vmem:[%s8628_s6 + $0xf0] sm:$0xff] }
 0x13b   : > { %v1462_v52 = vpack.c.bf16 %v1390_v2, %v1386_v49  ;;  %v6969_v53 = vadd.f32 %v892_v7, %v699_v15  ;;  %v6971_v37 = vadd.f32 %v892_v7, %v700_v4  ;;  %v6973_v46 = vadd.f32 %v892_v7, %v701_v26  ;;  %3014 = vperm.xlu1 %4797, %v2876_v45  }
 0x13c   : > { %1883 = vmatpush1.bf16.msra.mxu0 %v1460_v22  ;;  %v694_v42 = vmul.f32 %v5785_v8, %v546_v38  ;;  %v695_v51 = vmul.f32 %v5789_v10, %v546_v38  ;;  %v696_v0 = vmul.f32 %v5787_v9, %v546_v38  ;;  %v697_v33 = vmul.f32 %v5797_v13, %v546_v38  ;;  %v4120_v22 = vld [vmem:[%s8629_s7 + $0xa0] sm:$0xff] }
 0x13d   : > { %2076 = vmatpush1.bf16.msra.mxu1 %v1462_v52  ;;  %vm1136_vm0 = vcmp.ge.f32.partialorder %v6910_v54, 0.0  ;;  %vm1140_vm1 = vcmp.ge.f32.partialorder %v6899_v55, 0.0  ;;  %v1265_v1 = vmul.f32 %v5809_v23, %v6910_v54  ;;  %v1269_v8 = vmul.f32 %v5809_v23, %v6899_v55 }
 0x13e   : > { %v6991_v10 = vadd.f32 %v887_v17, %v694_v42  ;;  %v1015_v9 = vadd.f32 %v887_v17, %v695_v51  ;;  %v6993_v14 = vadd.f32 %v887_v17, %v696_v0  ;;  %v1017_v13 = vadd.f32 %v887_v17, %v697_v33  ;;  %4214 = vperm.xlu0 %4796, %v4116_v31   ;;  %v4123_v17 = vld [vmem:[%s8629_s7 + $0xb8] sm:$0xff]  ;;  %v4122_v31 = vld [vmem:[%s8629_s7 + $0xb0] sm:$0xff]  ;;  %v4125_v51 = vld [vmem:[%s8629_s7 + $0xc8] sm:$0xff] }
 0x13f   : > { %v1393_v24 = vsel %vm1136_vm0, %v6910_v54, %v1265_v1  ;;  %v1397_v21 = vsel %vm1140_vm1, %v6899_v55, %v1269_v8  ;;  %vm1138_vm2 = vcmp.ge.f32.partialorder %v6914_v44, 0.0  ;;  %vm1142_vm3 = vcmp.ge.f32.partialorder %v6903_v12, 0.0  ;;  %3019 = vperm.xlu1 %4797, %v2877_v11   ;;  %v2878_v55 = vld [vmem:[%s8628_s6 + $0xe0] sm:$0xff]  ;;  %v4803_v42 = vld [vmem:[%s8625_s3 + $0x10] ss:$8 sps:$4 sm:$0xff]  }
 0x140   : > { %v1465_v36 = vpack.c.bf16 %v1397_v21, %v1393_v24  ;;  %v1267_v48 = vmul.f32 %v5809_v23, %v6914_v44  ;;  %v1271_v28 = vmul.f32 %v5809_v23, %v6903_v12  ;;  %vm1135_vm4 = vcmp.ge.f32.partialorder %v6908_v16, 0.0  ;;  %v4804_v0 = vld [vmem:[%s8625_s3 + $0x24] ss:$8 sps:$4 sm:$0xff]   ;;  %v4127_v11 = vld [vmem:[%s8629_s7 + $0xd8] sm:$0xff]  ;;  %v4126_v1 = vld [vmem:[%s8629_s7 + $0xd0] sm:$0xff] }
 0x141   : > { %vm1139_vm5 = vcmp.ge.f32.partialorder %v6897_v5, 0.0  ;;  %v1264_v58 = vmul.f32 %v5809_v23, %v6908_v16  ;;  %v1268_v54 = vmul.f32 %v5809_v23, %v6897_v5  ;;  %vm1137_vm6 = vcmp.ge.f32.partialorder %v6912_v56, 0.0  ;;  %v4124_v33 = vld [vmem:[%s8629_s7 + $0xc0] sm:$0xff]  ;;  %v4130_v24 = vld [vmem:[%s8629_s7 + $0xf0] sm:$0xff] }
 0x142   : > { %1884 = vmatprep.subr.bf16.mxu0 %v1465_v36  ;;  %v1395_v18 = vsel %vm1138_vm2, %v6914_v44, %v1267_v48  ;;  %v1399_v19 = vsel %vm1142_vm3, %v6903_v12, %v1271_v28  ;;  %vm1141_vm7 = vcmp.ge.f32.partialorder %v6901_v50, 0.0  ;;  %v1266_v39 = vmul.f32 %v5809_v23, %v6912_v56  ;;  %4219 = vperm.xlu0 %4796, %v4117_v57   ;;  %v4118_v44 = vld [vmem:[%s8629_s7 + $0x90] sm:$0xff]  ;;  %v4806_v8 = vld [vmem:[%s8625_s3 + $0x20] ss:$8 sps:$4 sm:$0xff]   ;;  %v4810_v57 = vld [vmem:[%s8625_s3 + $0x44] ss:$8 sps:$4 sm:$0xff]  }
 0x143   : > { %v1467_v25 = vpack.c.bf16 %v1399_v19, %v1395_v18  ;;  %v1392_v61 = vsel %vm1135_vm4, %v6908_v16, %v1264_v58  ;;  %v1396_v30 = vsel %vm1139_vm5, %v6897_v5, %v1268_v54  ;;  %v1270_v3 = vmul.f32 %v5809_v23, %v6901_v50  ;;  %3024 = vperm.xlu1 %4797, %v2878_v55   ;;  %v2879_v16 = vld [vmem:[%s8628_s6 + $0xe8] sm:$0xff]  ;;  %v4809_v21 = vld [vmem:[%s8625_s3 + $0x30] ss:$8 sps:$4 sm:$0xff]   ;;  %v4813_v48 = vld [vmem:[%s8625_s3 + $0x54] ss:$8 sps:$4 sm:$0xff]  }
 0x144   : > { %v1464_v12 = vpack.c.bf16 %v1396_v30, %v1392_v61  ;;  %v1394_v38 = vsel %vm1137_vm6, %v6912_v56, %v1266_v39  ;;  %vm1144_vm8 = vcmp.ge.f32.partialorder %v1015_v9, 0.0  ;;  %vm1148_vm9 = vcmp.ge.f32.partialorder %v6969_v53, 0.0  ;;  %v4812_v36 = vld [vmem:[%s8625_s3 + $0x40] ss:$8 sps:$4 sm:$0xff]   ;;  %v4815_v28 = vld [vmem:[%s8625_s3 + $0x50] ss:$8 sps:$4 sm:$0xff]  }
 0x145   : > { %2077 = vmatprep.subr.bf16.mxu1 %v1467_v25  ;;  %v1398_v5 = vsel %vm1141_vm7, %v6901_v50, %v1270_v3  ;;  %v1273_v6 = vmul.f32 %v5809_v23, %v1015_v9  ;;  %v1277_v20 = vmul.f32 %v5809_v23, %v6969_v53  ;;  %vm1146_vm10 = vcmp.ge.f32.partialorder %v1017_v13, 0.0  ;;  %v4119_v50 = vld [vmem:[%s8629_s7 + $0x98] sm:$0xff]  ;;  %v4816_v55 = vld [vmem:[%s8625_s3 + $0x64] ss:$8 sps:$4 sm:$0xff]   ;;  %v4818_v58 = vld [vmem:[%s8625_s3 + $0x60] ss:$8 sps:$4 sm:$0xff]  }
 0x146   : > { %1885 = vmatpush1.bf16.msra.mxu0 %v1464_v12  ;;  %v1466_v32 = vpack.c.bf16 %v1398_v5, %v1394_v38  ;;  %vm1150_vm11 = vcmp.ge.f32.partialorder %v6973_v46, 0.0  ;;  %v1275_v56 = vmul.f32 %v5809_v23, %v1017_v13  ;;  %v1279_v27 = vmul.f32 %v5809_v23, %v6973_v46  ;;  %4224 = vperm.xlu0 %4796, %v4118_v44   ;;  %v4819_v54 = vld [vmem:[%s8625_s3 + $0x74] ss:$8 sps:$4 sm:$0xff]   ;;  %v4821_v18 = vld [vmem:[%s8625_s3 + $0x70] ss:$8 sps:$4 sm:$0xff]  }
 0x147   : > { %v1401_v43 = vsel %vm1144_vm8, %v1015_v9, %v1273_v6  ;;  %v1405_v63 = vsel %vm1148_vm9, %v6969_v53, %v1277_v20  ;;  %vm1143_vm12 = vcmp.ge.f32.partialorder %v6991_v10, 0.0  ;;  %vm1147_vm13 = vcmp.ge.f32.partialorder %v6967_v47, 0.0  ;;  %3029 = vperm.xlu1 %4797, %v2879_v16   ;;  %v4807_v9 = vld [vmem:[%s8625_s3 + $0x34] ss:$8 sps:$4 sm:$0xff]   ;;  %v4822_v19 = vld [vmem:[%s8625_s3 + $0x84] ss:$8 sps:$4 sm:$0xff]  }
 0x148   : > { %2078 = vmatpush1.bf16.msra.mxu1 %v1466_v32  ;;  %v1469_v7 = vpack.c.bf16 %v1405_v63, %v1401_v43  ;;  %v1403_v35 = vsel %vm1146_vm10, %v1017_v13, %v1275_v56  ;;  %v1407_v41 = vsel %vm1150_vm11, %v6973_v46, %v1279_v27  ;;  %v1272_v34 = vmul.f32 %v5809_v23, %v6991_v10  ;;  %v4798_v46 = vld [vmem:[%s8625_s3] ss:$8 sps:$4 sm:$0xff]   ;;  %v4131_v13 = vld [vmem:[%s8629_s7 + $0xf8] sm:$0xff]  ;;  %v4828_v30 = vld [vmem:[%s8625_s3 + $0xa4] ss:$8 sps:$4 sm:$0xff]   ;;  %v1544_v43 = vpop.permute.xlu1 %1543  ;;  %v1539_v63 = vpop.permute.xlu0 %1538 }
 0x149   : > { %v1471_v40 = vpack.c.bf16 %v1407_v41, %v1403_v35  ;;  %v1276_v45 = vmul.f32 %v5809_v23, %v6967_v47  ;;  %vm1145_vm14 = vcmp.ge.f32.partialorder %v6993_v14, 0.0  ;;  %vm1149_vm15 = vcmp.ge.f32.partialorder %v6971_v37, 0.0  ;;  %v4824_v39 = vld [vmem:[%s8625_s3 + $0x80] ss:$8 sps:$4 sm:$0xff]   ;;  %v4825_v25 = vld [vmem:[%s8625_s3 + $0x94] ss:$8 sps:$4 sm:$0xff]  }
 0x14a   : > { %1886 = vmatprep.subr.bf16.mxu0 %v1469_v7  ;;  %v1400_v29 = vsel %vm1143_vm12, %v6991_v10, %v1272_v34  ;;  %v1274_v15 = vmul.f32 %v5809_v23, %v6993_v14  ;;  %v1278_v4 = vmul.f32 %v5809_v23, %v6971_v37  ;;  %4229 = vperm.xlu0 %4796, %v4119_v50   ;;  %v2881_v23 = vld [vmem:[%s8628_s6 + $0xf8] sm:$0xff]  ;;  %v4129_v10 = vld [vmem:[%s8629_s7 + $0xe8] sm:$0xff] }
 0x14b   : > { %2079 = vmatprep.subr.bf16.mxu1 %v1471_v40  ;;  %v1404_v26 = vsel %vm1147_vm13, %v6967_v47, %v1276_v45  ;;  %3034 = vperm.xlu1 %4797, %v2880_v60   ;;  %v4801_v47 = vld [vmem:[%s8625_s3 + $0x14] ss:$8 sps:$4 sm:$0xff]   ;;  %v4827_v61 = vld [vmem:[%s8625_s3 + $0x90] ss:$8 sps:$4 sm:$0xff]   ;;  %v4830_v3 = vld [vmem:[%s8625_s3 + $0xa0] ss:$8 sps:$4 sm:$0xff]  }
 0x14c   : > { %v1468_v49 = vpack.c.bf16 %v1404_v26, %v1400_v29  ;;  %v1402_v2 = vsel %vm1145_vm14, %v6993_v14, %v1274_v15  ;;  %v1406_v52 = vsel %vm1149_vm15, %v6971_v37, %v1278_v4  ;;  %v4121_v37 = vld [vmem:[%s8629_s7 + $0xa8] sm:$0xff]  ;;  %v4128_v14 = vld [vmem:[%s8629_s7 + $0xe0] sm:$0xff]  ;;  %v4831_v44 = vld [vmem:[%s8625_s3 + $0xb4] ss:$8 sps:$4 sm:$0xff]  }
 0x14d   : > { %v1470_v53 = vpack.c.bf16 %v1406_v52, %v1402_v2  ;;  %v4833_v12 = vld [vmem:[%s8625_s3 + $0xb0] ss:$8 sps:$4 sm:$0xff]   ;;  %v4834_v38 = vld [vmem:[%s8625_s3 + $0xc4] ss:$8 sps:$4 sm:$0xff]   ;;  %v4836_v16 = vld [vmem:[%s8625_s3 + $0xc0] ss:$8 sps:$4 sm:$0xff]  }
 0x14e   : > { %1887 = vmatpush1.bf16.msra.mxu0 %v1468_v49  ;;  %4234 = vperm.xlu0 %4796, %v4120_v22   ;;  %v4837_v5 = vld [vmem:[%s8625_s3 + $0xd4] ss:$8 sps:$4 sm:$0xff]   ;;  %v4839_v6 = vld [vmem:[%s8625_s3 + $0xd0] ss:$8 sps:$4 sm:$0xff]   ;;  %v4840_v20 = vld [vmem:[%s8625_s3 + $0xe4] ss:$8 sps:$4 sm:$0xff]  }
 0x14f   : > { %2080 = vmatpush1.bf16.msra.mxu1 %v1470_v53  ;;  %3039 = vperm.xlu1 %4797, %v2881_v23   ;;  %v4842_v32 = vld [vmem:[%s8625_s3 + $0xe0] ss:$8 sps:$4 sm:$0xff]   ;;  %v4843_v56 = vld [vmem:[%s8625_s3 + $0xf4] ss:$8 sps:$4 sm:$0xff]   ;;  %v4845_v27 = vld [vmem:[%s8625_s3 + $0xf0] ss:$8 sps:$4 sm:$0xff]  }
 0x151   : > { %1889 = vmatmul.mubr.bf16.vlgmr.msra.gmra.mrb[0].mxu0 %v4798_v46 }
 0x152   : > { %2082 = vmatmul.mubr.bf16.vlgmr.msra.gmra.mrb[0].mxu1 %v4798_v46  ;;  %1898 = vmatprep.mubr.bf16.mxu0 %v4801_v47 }
 0x153   : > { %2091 = vmatprep.mubr.bf16.mxu1 %v4801_v47  ;;  %4239 = vperm.xlu0 %4796, %v4121_v37  }
 0x154   : > { %4249 = vperm.xlu1 %4797, %v4123_v17  }
 0x157   : > { %4244 = vperm.xlu0 %4796, %v4122_v31   ;;  %v1554_v31 = vpop.permute.xlu1 %1553 }
 0x158   : > { %4259 = vperm.xlu1 %4797, %v4125_v51   ;;  %v1549_v51 = vpop.permute.xlu0 %1548 }
 0x159   : > { %1899 = vmatmul.mubr.bf16.gmra.mrb[4].mxu0 %v4803_v42 }
 0x15a   : > { %2092 = vmatmul.mubr.bf16.gmra.mrb[4].mxu1 %v4803_v42  ;;  %1908 = vmatprep.mubr.bf16.mxu0 %v4804_v0 }
 0x15b   : > { %2101 = vmatprep.mubr.bf16.mxu1 %v4804_v0  ;;  %4254 = vperm.xlu0 %4796, %v4124_v33  }
 0x15c   : > { %4269 = vperm.xlu1 %4797, %v4127_v11  }
 0x15f   : > { %4264 = vperm.xlu0 %4796, %v4126_v1  }
 0x160   : > { %4279 = vperm.xlu1 %4797, %v4129_v10  }
 0x161   : > { %1909 = vmatmul.mubr.bf16.gmra.mrb[8].mxu0 %v4806_v8 }
 0x162   : > { %2102 = vmatmul.mubr.bf16.gmra.mrb[8].mxu1 %v4806_v8  ;;  %1918 = vmatprep.mubr.bf16.mxu0 %v4807_v9 }
 0x163   : > { %2111 = vmatprep.mubr.bf16.mxu1 %v4807_v9  ;;  %4274 = vperm.xlu0 %4796, %v4128_v14  }
 0x164   : > { %4289 = vperm.xlu1 %4797, %v4131_v13  }
 0x167   : > { %4284 = vperm.xlu0 %4796, %v4130_v24  }
 0x169   : > { %1919 = vmatmul.mubr.bf16.gmra.mrb[12].mxu0 %v4809_v21 }
 0x16a   : > { %2112 = vmatmul.mubr.bf16.gmra.mrb[12].mxu1 %v4809_v21  ;;  %1928 = vmatprep.mubr.bf16.mxu0 %v4810_v57 }
 0x16b   : > { %2121 = vmatprep.mubr.bf16.mxu1 %v4810_v57 }
 0x171   : > { %1929 = vmatmul.mubr.bf16.gmra.mrb[16].mxu0 %v4812_v36 }
 0x172   : > { %2122 = vmatmul.mubr.bf16.gmra.mrb[16].mxu1 %v4812_v36  ;;  %1938 = vmatprep.mubr.bf16.mxu0 %v4813_v48 }
 0x173   : > { %2131 = vmatprep.mubr.bf16.mxu1 %v4813_v48 }
 0x179   : > { %1939 = vmatmul.mubr.bf16.gmra.mrb[20].mxu0 %v4815_v28 }
 0x17a   : > { %2132 = vmatmul.mubr.bf16.gmra.mrb[20].mxu1 %v4815_v28  ;;  %1948 = vmatprep.mubr.bf16.mxu0 %v4816_v55 }
 0x17b   : > { %2141 = vmatprep.mubr.bf16.mxu1 %v4816_v55 }
 0x181   : > { %1949 = vmatmul.mubr.bf16.gmra.mrb[24].mxu0 %v4818_v58 }
 0x182   : > { %2142 = vmatmul.mubr.bf16.gmra.mrb[24].mxu1 %v4818_v58  ;;  %1958 = vmatprep.mubr.bf16.mxu0 %v4819_v54 }
 0x183   : > { %2151 = vmatprep.mubr.bf16.mxu1 %v4819_v54 }
 0x189   : > { %1959 = vmatmul.mubr.bf16.gmra.mrb[28].mxu0 %v4821_v18 }
 0x18a   : > { %2152 = vmatmul.mubr.bf16.gmra.mrb[28].mxu1 %v4821_v18  ;;  %1968 = vmatprep.mubr.bf16.mxu0 %v4822_v19 }
 0x18b   : > { %2161 = vmatprep.mubr.bf16.mxu1 %v4822_v19 }
 0x191   : > { %1969 = vmatmul.mubr.bf16.gmra.mrb[32].mxu0 %v4824_v39 }
 0x192   : > { %2162 = vmatmul.mubr.bf16.gmra.mrb[32].mxu1 %v4824_v39  ;;  %1978 = vmatprep.mubr.bf16.mxu0 %v4825_v25 }
 0x193   : > { %2171 = vmatprep.mubr.bf16.mxu1 %v4825_v25 }
 0x199   : > { %1979 = vmatmul.mubr.bf16.gmra.mrb[36].mxu0 %v4827_v61 }
 0x19a   : > { %2172 = vmatmul.mubr.bf16.gmra.mrb[36].mxu1 %v4827_v61  ;;  %1988 = vmatprep.mubr.bf16.mxu0 %v4828_v30 }
 0x19b   : > { %2181 = vmatprep.mubr.bf16.mxu1 %v4828_v30 }
 0x1a1   : > { %1989 = vmatmul.mubr.bf16.gmra.mrb[40].mxu0 %v4830_v3 }
 0x1a2   : > { %2182 = vmatmul.mubr.bf16.gmra.mrb[40].mxu1 %v4830_v3  ;;  %1998 = vmatprep.mubr.bf16.mxu0 %v4831_v44 }
 0x1a3   : > { %2191 = vmatprep.mubr.bf16.mxu1 %v4831_v44 }
 0x1a9   : > { %1999 = vmatmul.mubr.bf16.gmra.mrb[44].mxu0 %v4833_v12 }
 0x1aa   : > { %2192 = vmatmul.mubr.bf16.gmra.mrb[44].mxu1 %v4833_v12  ;;  %2008 = vmatprep.mubr.bf16.mxu0 %v4834_v38  ;;  %v1559_v12 = vpop.permute.xlu0 %1558 }
 0x1ab   : > { %2201 = vmatprep.mubr.bf16.mxu1 %v4834_v38 }
 0x1b1   : > { %2009 = vmatmul.mubr.bf16.gmra.mrb[48].mxu0 %v4836_v16 }
 0x1b2   : > { %2202 = vmatmul.mubr.bf16.gmra.mrb[48].mxu1 %v4836_v16  ;;  %2018 = vmatprep.mubr.bf16.mxu0 %v4837_v5 }
 0x1b3   : > { %2211 = vmatprep.mubr.bf16.mxu1 %v4837_v5 }
 0x1b9   : > { %2019 = vmatmul.mubr.bf16.gmra.mrb[52].mxu0 %v4839_v6 }
 0x1ba   : > { %2212 = vmatmul.mubr.bf16.gmra.mrb[52].mxu1 %v4839_v6  ;;  %2028 = vmatprep.mubr.bf16.mxu0 %v4840_v20 }
 0x1bb   : > { %2221 = vmatprep.mubr.bf16.mxu1 %v4840_v20 }
 0x1c1   : > { %2029 = vmatmul.mubr.bf16.gmra.mrb[56].mxu0 %v4842_v32 }
 0x1c2   : > { %2222 = vmatmul.mubr.bf16.gmra.mrb[56].mxu1 %v4842_v32  ;;  %2038 = vmatprep.mubr.bf16.mxu0 %v4843_v56 }
 0x1c3   : > { %2231 = vmatprep.mubr.bf16.mxu1 %v4843_v56 }
 0x1c9   : > { %2039 = vmatmul.mubr.bf16.gmra.mrb[60].mxu0 %v4845_v27 }
 0x1ca   : > { %2232 = vmatmul.mubr.bf16.gmra.mrb[60].mxu1 %v4845_v27 }
 0x224   : > { %v1890_v50 = vpop.f32.mrb[0].mxu0 }
 0x225   : > { %v1891_v7 = vadd.f32 %v1890_v50, %v1539_v63  ;;  %v2083_v35 = vpop.f32.mrb[0].mxu1  ;;  %v1892_v41 = vpop.f32.mrb[1].mxu0 }
 0x226   : > { %v2084_v34 = vadd.f32 %v2083_v35, %v1539_v63  ;;  %v1893_v60 = vadd.f32 %v1892_v41, %v1539_v63  ;;  %v2085_v40 = vpop.f32.mrb[1].mxu1  ;;  %v1894_v45 = vpop.f32.mrb[2].mxu0 }
 0x227   : > { %v2242_v29 = vmul.f32 0.5, %v1891_v7  ;;  %v2086_v15 = vadd.f32 %v2085_v40, %v1539_v63  ;;  %v1895_v4 = vadd.f32 %v1894_v45, %v1544_v43  ;;  %v2087_v26 = vpop.f32.mrb[2].mxu1  ;;  %v1896_v22 = vpop.f32.mrb[3].mxu0 }
 0x228   : > { %v2244_v49 = vmul.f32 0.5, %v2084_v34  ;;  %v2243_v2 = vmul.f32 0.5, %v1893_v60  ;;  %v2088_v52 = vadd.f32 %v2087_v26, %v1544_v43  ;;  %v1897_v23 = vadd.f32 %v1896_v22, %v1544_v43  ;;  %v2089_v53 = vpop.f32.mrb[3].mxu1 }
 0x229   : > { %4894 = vtanh.f32 %v2242_v29  ;;  %v2245_v46 = vmul.f32 0.5, %v2086_v15  ;;  %v2246_v47 = vmul.f32 0.5, %v1895_v4  ;;  %v2090_v37 = vadd.f32 %v2089_v53, %v1544_v43 }
 0x22a   : > { %4896 = vtanh.f32 %v2244_v49  ;;  %v2248_v17 = vmul.f32 0.5, %v2088_v52  ;;  %v2247_v42 = vmul.f32 0.5, %v1897_v23 }
 0x22b   : > { %4898 = vtanh.f32 %v2243_v2  ;;  %v2249_v0 = vmul.f32 0.5, %v2090_v37 }
 0x22c   : > { %4900 = vtanh.f32 %v2245_v46  ;;  %v1900_v33 = vpop.f32.mrb[4].mxu0  ;;  %v1564_v46 = vpop.permute.xlu1 %1563 }
 0x22d   : > { %4902 = vtanh.f32 %v2246_v47  ;;  %v1901_v11 = vadd.f32 %v1900_v33, %v1549_v51  ;;  %v2093_v1 = vpop.f32.mrb[4].mxu1  ;;  %v1902_v8 = vpop.f32.mrb[5].mxu0 }
 0x22e   : > { %4904 = vtanh.f32 %v2248_v17  ;;  %v2094_v10 = vadd.f32 %v2093_v1, %v1549_v51  ;;  %v1903_v9 = vadd.f32 %v1902_v8, %v1549_v51  ;;  %v2095_v14 = vpop.f32.mrb[5].mxu1  ;;  %v1904_v13 = vpop.f32.mrb[6].mxu0 }
 0x22f   : > { %4906 = vtanh.f32 %v2247_v42  ;;  %v2250_v24 = vmul.f32 0.5, %v1901_v11  ;;  %v2096_v21 = vadd.f32 %v2095_v14, %v1549_v51  ;;  %v1905_v57 = vadd.f32 %v1904_v13, %v1554_v31  ;;  %v2097_v36 = vpop.f32.mrb[6].mxu1  ;;  %v1906_v48 = vpop.f32.mrb[7].mxu0 }
 0x230   : > { %4908 = vtanh.f32 %v2249_v0  ;;  %v2252_v28 = vmul.f32 0.5, %v2094_v10  ;;  %v2251_v55 = vmul.f32 0.5, %v1903_v9  ;;  %v2098_v58 = vadd.f32 %v2097_v36, %v1554_v31  ;;  %v2099_v54 = vpop.f32.mrb[7].mxu1 }
 0x231   : > { %4910 = vtanh.f32 %v2250_v24  ;;  %v2253_v18 = vmul.f32 0.5, %v2096_v21  ;;  %v2254_v19 = vmul.f32 0.5, %v1905_v57  ;;  %v1907_v39 = vadd.f32 %v1906_v48, %v1554_v31 }
 0x232   : > { %4912 = vtanh.f32 %v2252_v28  ;;  %v2256_v25 = vmul.f32 0.5, %v2098_v58  ;;  %v2100_v61 = vadd.f32 %v2099_v54, %v1554_v31 }
 0x233   : > { %v4895_v30 = vpop.eup %4894  ;;  %4914 = vtanh.f32 %v2251_v55  ;;  %v2255_v3 = vmul.f32 0.5, %v1907_v39 }
 0x234   : > { %v4897_v44 = vpop.eup %4896  ;;  %v2498_v38 = vmul.f32 0.5, %v4895_v30  ;;  %4916 = vtanh.f32 %v2253_v18  ;;  %v2257_v16 = vmul.f32 0.5, %v2100_v61  ;;  %v1910_v5 = vpop.f32.mrb[8].mxu0 }
 0x235   : > { %v4899_v6 = vpop.eup %4898  ;;  %v2500_v20 = vmul.f32 0.5, %v4897_v44  ;;  %4918 = vtanh.f32 %v2254_v19  ;;  %v1911_v32 = vadd.f32 %v1910_v5, %v1559_v12  ;;  %v2103_v56 = vpop.f32.mrb[8].mxu1 }
 0x236   : > { %v1912_v27 = vpop.f32.mrb[9].mxu0  ;;  %v4901_v43 = vpop.eup %4900  ;;  %4920 = vtanh.f32 %v2256_v25  ;;  %v2104_v63 = vadd.f32 %v2103_v56, %v1559_v12  ;;  %v7199_v41 = vadd.f32 0.5, %v2498_v38  ;;  %v2499_v34 = vmul.f32 0.5, %v4899_v6 }
 0x237   : > { %v2105_v50 = vpop.f32.mrb[9].mxu1  ;;  %v1914_v7 = vpop.f32.mrb[10].mxu0  ;;  %4922 = vtanh.f32 %v2255_v3  ;;  %v2258_v60 = vmul.f32 0.5, %v1911_v32  ;;  %v7201_v15 = vadd.f32 0.5, %v2500_v20  ;;  %v2501_v2 = vmul.f32 0.5, %v4901_v43 }
 0x238   : > { %v4903_v35 = vpop.eup %4902  ;;  %v2107_v40 = vpop.f32.mrb[10].mxu1  ;;  %4924 = vtanh.f32 %v2257_v16  ;;  %v2260_v26 = vmul.f32 0.5, %v2104_v63  ;;  %v1913_v23 = vadd.f32 %v1912_v27, %v1559_v12  ;;  %v2106_v17 = vadd.f32 %v2105_v50, %v1559_v12 }
 0x239   : > { %v1916_v45 = vpop.f32.mrb[11].mxu0  ;;  %v4905_v29 = vpop.eup %4904  ;;  %v2502_v4 = vmul.f32 0.5, %v4903_v35  ;;  %4926 = vtanh.f32 %v2258_v60  ;;  %v1915_v33 = vadd.f32 %v1914_v7, %v1564_v46  ;;  %v7209_v13 = vadd.f32 0.5, %v2499_v34 }
 0x23a   : > { %v2109_v22 = vpop.f32.mrb[11].mxu1  ;;  %v4907_v49 = vpop.eup %4906  ;;  %v2504_v52 = vmul.f32 0.5, %v4905_v29  ;;  %4928 = vtanh.f32 %v2260_v26  ;;  %v2259_v0 = vmul.f32 0.5, %v1913_v23  ;;  %v2261_v10 = vmul.f32 0.5, %v2106_v17 }
 0x23b   : > { %v4909_v53 = vpop.eup %4908  ;;  %v7203_v47 = vadd.f32 0.5, %v2502_v4  ;;  %v2503_v37 = vmul.f32 0.5, %v4907_v49  ;;  %v7211_v24 = vadd.f32 0.5, %v2501_v2  ;;  %v2262_v54 = vmul.f32 0.5, %v1915_v33  ;;  %v1569_v32 = vpop.permute.xlu0 %1568 }
 0x23c   : > { %v4911_v31 = vpop.eup %4910  ;;  %v7205_v42 = vadd.f32 0.5, %v2504_v52  ;;  %v2505_v51 = vmul.f32 0.5, %v4909_v53  ;;  %v1920_v9 = vpop.f32.mrb[12].mxu0  ;;  %4930 = vtanh.f32 %v2259_v0  ;;  %v2108_v61 = vadd.f32 %v2107_v40, %v1564_v46 }
 0x23d   : > { %v4913_v11 = vpop.eup %4912  ;;  %v2754_v1 = vpack.c.bf16 %v7203_v47, %v7199_v41  ;;  %v2506_v8 = vmul.f32 0.5, %v4911_v31  ;;  %v7215_v57 = vadd.f32 0.5, %v2503_v37  ;;  %v2113_v36 = vpop.f32.mrb[12].mxu1  ;;  %4932 = vtanh.f32 %v2261_v10 }
 0x23e   : > { %v4915_v14 = vpop.eup %4914  ;;  %v2756_v21 = vpack.c.bf16 %v7205_v42, %v7201_v15  ;;  %v1922_v48 = vpop.f32.mrb[13].mxu0  ;;  %v7217_v55 = vadd.f32 0.5, %v2505_v51  ;;  %v2508_v58 = vmul.f32 0.5, %v4913_v11  ;;  %v1917_v30 = vadd.f32 %v1916_v45, %v1564_v46 }
 0x23f   : > { %v4917_v28 = vpop.eup %4916  ;;  %v2115_v18 = vpop.f32.mrb[13].mxu1  ;;  %v7219_v25 = vadd.f32 0.5, %v2506_v8  ;;  %v2507_v38 = vmul.f32 0.5, %v4915_v14  ;;  %4934 = vtanh.f32 %v2262_v54  ;;  %v2110_v5 = vadd.f32 %v2109_v22, %v1564_v46 }
 0x240   : > { %v1924_v19 = vpop.f32.mrb[14].mxu0  ;;  %v4919_v39 = vpop.eup %4918  ;;  %v2509_v56 = vmul.f32 0.5, %v4917_v28  ;;  %v2264_v43 = vmul.f32 0.5, %v2108_v61  ;;  %v2263_v63 = vmul.f32 0.5, %v1917_v30  ;;  %v7225_v7 = vadd.f32 0.5, %v2508_v58 }
 0x241   : > { %v2117_v3 = vpop.f32.mrb[14].mxu1  ;;  %v7221_v44 = vpop.f32.mrb[15].mxu0  ;;  %v2510_v16 = vmul.f32 0.5, %v4919_v39  ;;  %v2265_v34 = vmul.f32 0.5, %v2110_v5  ;;  %v1921_v60 = vadd.f32 %v1920_v9, %v1569_v32  ;;  %v2114_v4 = vadd.f32 %v2113_v36, %v1569_v32 }
 0x242   : > { %v4921_v12 = vpop.eup %4920  ;;  %v7223_v6 = vpop.f32.mrb[15].mxu1  ;;  %4936 = vtanh.f32 %v2264_v43  ;;  %v7231_v49 = vadd.f32 0.5, %v2507_v38  ;;  %v7235_v53 = vadd.f32 0.5, %v2509_v56  ;;  %v1923_v11 = vadd.f32 %v1922_v48, %v1569_v32 }
 0x243   : > { %v4923_v20 = vpop.eup %4922  ;;  %v2512_v27 = vmul.f32 0.5, %v4921_v12  ;;  %v7227_v35 = vadd.f32 0.5, %v2510_v16  ;;  %v1574_v22 = vpop.permute.xlu1 %1573  ;;  %4938 = vtanh.f32 %v2263_v63  ;;  %v2266_v0 = vmul.f32 0.5, %v1921_v60 }
 0x244   : > { %v4925_v50 = vpop.eup %4924  ;;  %v2511_v29 = vmul.f32 0.5, %v4923_v20  ;;  %v1930_v23 = vpop.f32.mrb[16].mxu0  ;;  %4940 = vtanh.f32 %v2265_v34  ;;  %v2268_v33 = vmul.f32 0.5, %v2114_v4  ;;  %v2116_v14 = vadd.f32 %v2115_v18, %v1569_v32 }
 0x245   : > { %v4927_v40 = vpop.eup %4926  ;;  %v7229_v45 = vadd.f32 0.5, %v2512_v27  ;;  %v2758_v2 = vpack.c.bf16 %v7227_v35, %v7219_v25  ;;  %v2513_v52 = vmul.f32 0.5, %v4925_v50  ;;  %v2123_v17 = vpop.f32.mrb[16].mxu1  ;;  %v2755_v36 = vpack.c.bf16 %v7215_v57, %v7209_v13 }
 0x246   : > { %v4929_v26 = vpop.eup %4928  ;;  %v2514_v37 = vmul.f32 0.5, %v4927_v40  ;;  %v1932_v31 = vpop.f32.mrb[17].mxu0  ;;  %v7241_v9 = vadd.f32 0.5, %v2511_v29  ;;  %v2757_v28 = vpack.c.bf16 %v7217_v55, %v7211_v24  ;;  %4942 = vtanh.f32 %v2266_v0 }
 0x247   : > { %v2760_v46 = vpack.c.bf16 %v7229_v45, %v7225_v7  ;;  %v2516_v51 = vmul.f32 0.5, %v4929_v26  ;;  %v2125_v8 = vpop.f32.mrb[17].mxu1  ;;  %v7239_v10 = vpop.f32.mrb[18].mxu0  ;;  %v7251_v61 = vadd.f32 0.5, %v2513_v52  ;;  %v2267_v48 = vmul.f32 0.5, %v1923_v11  ;;  %3202 = vmatprep.subr.bf16.mxu0 %v2755_v36 }
 0x248   : > { %v7247_v58 = vpop.f32.mrb[18].mxu1  ;;  %v7249_v54 = vpop.f32.mrb[19].mxu0  ;;  %v1925_v30 = vadd.f32 %v1924_v19, %v1574_v22  ;;  %v7255_v18 = vadd.f32 0.5, %v2514_v37  ;;  %4944 = vtanh.f32 %v2268_v33  ;;  %v2269_v13 = vmul.f32 0.5, %v2116_v14  ;;  %3395 = vmatprep.subr.bf16.mxu1 %v2757_v28  ;;  %3203 = vmatpush1.bf16.msra.mxu0 %v2754_v1 }
 0x249   : > { %v4931_v39 = vpop.eup %4930  ;;  %v7253_v12 = vpop.f32.mrb[19].mxu1  ;;  %v2118_v24 = vadd.f32 %v2117_v3, %v1574_v22  ;;  %v7257_v55 = vadd.f32 0.5, %v2516_v51  ;;  %4946 = vtanh.f32 %v2267_v48  ;;  %3396 = vmatpush1.bf16.msra.mxu1 %v2756_v21  ;;  %v1927_v19 = vadd.f32 %v7221_v44, %v1574_v22 }
 0x24a   : > { %v4933_v38 = vpop.eup %4932  ;;  %v2270_v16 = vmul.f32 0.5, %v1925_v30  ;;  %v1579_v5 = vpop.permute.xlu0 %1578  ;;  %v2515_v20 = vmul.f32 0.5, %v4931_v39  ;;  %4948 = vtanh.f32 %v2269_v13  ;;  %v2120_v27 = vadd.f32 %v7223_v6, %v1574_v22 }
 0x24b   : > { %v4935_v57 = vpop.eup %4934  ;;  %v2272_v3 = vmul.f32 0.5, %v2118_v24  ;;  %v2271_v56 = vmul.f32 0.5, %v1927_v19  ;;  %v1931_v43 = vadd.f32 %v1930_v23, %v1579_v5  ;;  %v2124_v15 = vadd.f32 %v2123_v17, %v1579_v5  ;;  %v1584_v28 = vpop.permute.xlu1 %1583 }
 0x24c   : > { %v2518_v32 = vmul.f32 0.5, %v4935_v57  ;;  %4950 = vtanh.f32 %v2270_v16  ;;  %v7267_v63 = vpop.f32.mrb[20].mxu0  ;;  %v4937_v41 = vpop.eup %4936  ;;  %v1933_v42 = vadd.f32 %v1932_v31, %v1579_v5  ;;  %v2273_v34 = vmul.f32 0.5, %v2120_v27 }
 0x24d   : > { %4952 = vtanh.f32 %v2272_v3  ;;  %v7271_v1 = vpop.f32.mrb[20].mxu1  ;;  %v7273_v21 = vpop.f32.mrb[21].mxu0  ;;  %v2520_v50 = vmul.f32 0.5, %v4937_v41  ;;  %v2274_v60 = vmul.f32 0.5, %v1931_v43  ;;  %v7279_v4 = vmul.f32 0.5, %v4933_v38 }
 0x24e   : > { %v7269_v47 = vadd.f32 0.5, %v2518_v32  ;;  %v4939_v44 = vpop.eup %4938  ;;  %4954 = vtanh.f32 %v2271_v56  ;;  %v7275_v40 = vpop.f32.mrb[21].mxu1  ;;  %v2276_v22 = vmul.f32 0.5, %v2124_v15  ;;  %v2275_v52 = vmul.f32 0.5, %v1933_v42 }
 0x24f   : > { %v7277_v6 = vpop.f32.mrb[22].mxu0  ;;  %v4941_v29 = vpop.eup %4940  ;;  %v7287_v17 = vadd.f32 0.5, %v2520_v50  ;;  %v2519_v31 = vmul.f32 0.5, %v4939_v44  ;;  %4956 = vtanh.f32 %v2273_v34  ;;  %v2126_v51 = vadd.f32 %v2125_v8, %v1579_v5 }
 0x250   : > { %v2762_v26 = vpack.c.bf16 %v7269_v47, %v7255_v18  ;;  %v7283_v23 = vpop.f32.mrb[22].mxu1  ;;  %v7285_v37 = vpop.f32.mrb[23].mxu0  ;;  %v2521_v33 = vmul.f32 0.5, %v4941_v29  ;;  %4958 = vtanh.f32 %v2274_v60  ;;  %v2759_v11 = vpack.c.bf16 %v7241_v9, %v7231_v49 }
 0x251   : > { %v7289_v0 = vpop.f32.mrb[23].mxu1  ;;  %v2761_v14 = vpack.c.bf16 %v7251_v61, %v7235_v53  ;;  %v4943_v36 = vpop.eup %4942  ;;  %v7295_v39 = vadd.f32 0.5, %v2515_v20  ;;  %v2764_v48 = vpack.c.bf16 %v7287_v17, %v7257_v55  ;;  %4960 = vtanh.f32 %v2276_v22 }
 0x252   : > { %v2277_v30 = vmul.f32 0.5, %v2126_v51  ;;  %v4945_v8 = vpop.eup %4944  ;;  %v2522_v38 = vmul.f32 0.5, %v4943_v36  ;;  %4962 = vtanh.f32 %v2275_v52  ;;  %3204 = vmatprep.subr.bf16.mxu0 %v2759_v11  ;;  %v1935_v13 = vadd.f32 %v7239_v10, %v1584_v28  ;;  %v1589_v53 = vpop.permute.xlu0 %1588 }
 0x253   : > { %3397 = vmatprep.subr.bf16.mxu1 %v2761_v14  ;;  %v2128_v49 = vadd.f32 %v7247_v58, %v1584_v28  ;;  %v4947_v9 = vpop.eup %4946  ;;  %v7301_v61 = vadd.f32 0.5, %v2519_v31  ;;  %v2524_v24 = vmul.f32 0.5, %v4945_v8  ;;  %3205 = vmatpush1.bf16.msra.mxu0 %v2758_v2  ;;  %v1937_v57 = vadd.f32 %v7249_v54, %v1584_v28 }
 0x254   : > { %3398 = vmatpush1.bf16.msra.mxu1 %v2760_v46  ;;  %v2130_v16 = vadd.f32 %v7253_v12, %v1584_v28  ;;  %v7311_v10 = vpop.f32.mrb[24].mxu0  ;;  %v4949_v58 = vpop.eup %4948  ;;  %v7313_v19 = vadd.f32 0.5, %v2521_v33  ;;  %4964 = vtanh.f32 %v2277_v30  ;;  %v2278_v5 = vmul.f32 0.5, %v1935_v13 }
 0x255   : > { %v2280_v20 = vmul.f32 0.5, %v2128_v49  ;;  %v7315_v32 = vpop.f32.mrb[24].mxu1  ;;  %v7317_v25 = vpop.f32.mrb[25].mxu0  ;;  %v7319_v2 = vadd.f32 0.5, %v2522_v38  ;;  %v2523_v7 = vmul.f32 0.5, %v4947_v9  ;;  %v2279_v45 = vmul.f32 0.5, %v1937_v57 }
 0x256   : > { %v4951_v35 = vpop.eup %4950  ;;  %v2281_v46 = vmul.f32 0.5, %v2130_v16  ;;  %v7321_v54 = vpop.f32.mrb[25].mxu1  ;;  %v7325_v56 = vadd.f32 0.5, %v2524_v24  ;;  %4966 = vtanh.f32 %v2278_v5  ;;  %v1941_v43 = vadd.f32 %v7267_v63, %v1589_v53 }
 0x257   : > { %v7323_v12 = vpop.f32.mrb[26].mxu0  ;;  %v4953_v3 = vpop.eup %4952  ;;  %v2526_v27 = vmul.f32 0.5, %v4951_v35  ;;  %v2525_v44 = vmul.f32 0.5, %v4949_v58  ;;  %4968 = vtanh.f32 %v2280_v20  ;;  %v2134_v34 = vadd.f32 %v7271_v1, %v1589_v53 }
 0x258   : > { %v7328_v41 = vpop.f32.mrb[26].mxu1  ;;  %v7330_v15 = vpop.f32.mrb[27].mxu0  ;;  %v2528_v50 = vmul.f32 0.5, %v4953_v3  ;;  %4970 = vtanh.f32 %v2279_v45  ;;  %v2282_v52 = vmul.f32 0.5, %v1941_v43  ;;  %v1943_v33 = vadd.f32 %v7273_v21, %v1589_v53 }
 0x259   : > { %v4955_v42 = vpop.eup %4954  ;;  %v7333_v60 = vpop.f32.mrb[27].mxu1  ;;  %v7335_v29 = vadd.f32 0.5, %v2526_v27  ;;  %4972 = vtanh.f32 %v2281_v46  ;;  %v2284_v63 = vmul.f32 0.5, %v2134_v34  ;;  %v2645_v14 = vadd.f32 0.5, %v7279_v4 }
 0x25a   : > { %v2527_v22 = vmul.f32 0.5, %v4955_v42  ;;  %v4957_v31 = vpop.eup %4956  ;;  %v7337_v51 = vadd.f32 0.5, %v2528_v50  ;;  %4974 = vtanh.f32 %v2282_v52  ;;  %v1594_v30 = vpop.permute.xlu1 %1593  ;;  %v2283_v13 = vmul.f32 0.5, %v1943_v33 }
 0x25b   : > { %v4959_v11 = vpop.eup %4958  ;;  %v2766_v1 = vpack.c.bf16 %v7335_v29, %v7319_v2  ;;  %v2529_v36 = vmul.f32 0.5, %v4957_v31  ;;  %4976 = vtanh.f32 %v2284_v63  ;;  %v7347_v21 = vadd.f32 0.5, %v2523_v7  ;;  %v1599_v43 = vpop.permute.xlu0 %1598 }
 0x25c   : > { %v4961_v28 = vpop.eup %4960  ;;  %v2768_v8 = vpack.c.bf16 %v7337_v51, %v7325_v56  ;;  %v2530_v38 = vmul.f32 0.5, %v4959_v11  ;;  %v7345_v49 = vpop.f32.mrb[28].mxu0  ;;  %v2136_v4 = vadd.f32 %v7275_v40, %v1589_v53  ;;  %v2763_v57 = vpack.c.bf16 %v7301_v61, %v7295_v39 }
 0x25d   : > { %v4963_v9 = vpop.eup %4962  ;;  %v2532_v24 = vmul.f32 0.5, %v4961_v28  ;;  %v7352_v16 = vpop.f32.mrb[28].mxu1  ;;  %v7356_v5 = vadd.f32 0.5, %v2525_v44  ;;  %v7358_v20 = vadd.f32 0.5, %v2527_v22  ;;  %v7360_v35 = vadd.f32 0.5, %v2529_v36 }
 0x25e   : > { %v7354_v58 = vpop.f32.mrb[29].mxu0  ;;  %v2765_v45 = vpack.c.bf16 %v7313_v19, %v2645_v14  ;;  %v7363_v7 = vpop.f32.mrb[29].mxu1  ;;  %v7367_v53 = vadd.f32 0.5, %v2530_v38  ;;  %4978 = vtanh.f32 %v2283_v13  ;;  %v2285_v39 = vmul.f32 0.5, %v2136_v4  ;;  %3206 = vmatprep.subr.bf16.mxu0 %v2763_v57 }
 0x25f   : > { %v7365_v46 = vpop.f32.mrb[30].mxu0  ;;  %v4965_v40 = vpop.eup %4964  ;;  %v1945_v61 = vadd.f32 %v7277_v6, %v1594_v30  ;;  %v2531_v42 = vmul.f32 0.5, %v4963_v9  ;;  %v2138_v19 = vadd.f32 %v7283_v23, %v1594_v30  ;;  %3207 = vmatpush1.bf16.msra.mxu0 %v2762_v26  ;;  %v1947_v44 = vadd.f32 %v7285_v37, %v1594_v30 }
 0x260   : > { %v7370_v3 = vpop.f32.mrb[30].mxu1  ;;  %v7372_v27 = vpop.f32.mrb[31].mxu0  ;;  %3399 = vmatprep.subr.bf16.mxu1 %v2765_v45  ;;  %v2140_v50 = vadd.f32 %v7289_v0, %v1594_v30  ;;  %v7382_v22 = vadd.f32 0.5, %v2532_v24  ;;  %4980 = vtanh.f32 %v2285_v39  ;;  %v1951_v23 = vadd.f32 %v7311_v10, %v1599_v43 }
 0x261   : > { %v7380_v34 = vpop.f32.mrb[31].mxu1  ;;  %v4967_v6 = vpop.eup %4966  ;;  %v2286_v52 = vmul.f32 0.5, %v1945_v61  ;;  %3400 = vmatpush1.bf16.msra.mxu1 %v2764_v48  ;;  %v2288_v47 = vmul.f32 0.5, %v2138_v19  ;;  %v2287_v26 = vmul.f32 0.5, %v1947_v44  ;;  %v2144_v11 = vadd.f32 %v7315_v32, %v1599_v43 }
 0x262   : > { %v4969_v31 = vpop.eup %4968  ;;  %v2534_v18 = vmul.f32 0.5, %v4967_v6  ;;  %v2289_v37 = vmul.f32 0.5, %v2140_v50  ;;  %v2290_v33 = vmul.f32 0.5, %v1951_v23  ;;  %v1953_v55 = vadd.f32 %v7317_v25, %v1599_v43  ;;  %v4848_v50 = vld [vmem:[%s8627_s5 + $0x4] ss:$8 sps:$4 sm:$0xff]  }
 0x263   : > { %v4971_v63 = vpop.eup %4970  ;;  %v2536_v0 = vmul.f32 0.5, %v4969_v31  ;;  %4982 = vtanh.f32 %v2286_v52  ;;  %v2292_v38 = vmul.f32 0.5, %v2144_v11  ;;  %v7400_v24 = vmul.f32 0.5, %v4965_v40  ;;  %3234 = vmatprep.mubr.bf16.mxu0 %v4848_v50  ;;  %3427 = vmatprep.mubr.bf16.mxu1 %v4848_v50 }
 0x264   : > { %v4973_v14 = vpop.eup %4972  ;;  %v7389_v36 = vadd.f32 0.5, %v2534_v18  ;;  %v2535_v28 = vmul.f32 0.5, %v4971_v63  ;;  %4984 = vtanh.f32 %v2288_v47  ;;  %v7392_v17 = vpop.f32.mrb[32].mxu0  ;;  %v7408_v39 = vadd.f32 0.5, %v2531_v42 }
 0x265   : > { %v4975_v48 = vpop.eup %4974  ;;  %v7394_v10 = vadd.f32 0.5, %v2536_v0  ;;  %v2537_v30 = vmul.f32 0.5, %v4973_v14  ;;  %4986 = vtanh.f32 %v2287_v26  ;;  %v7396_v13 = vpop.f32.mrb[32].mxu1  ;;  %v2291_v52 = vmul.f32 0.5, %v1953_v55 }
 0x266   : > { %v7398_v9 = vpop.f32.mrb[33].mxu0  ;;  %v4977_v32 = vpop.eup %4976  ;;  %v2770_v4 = vpack.c.bf16 %v7389_v36, %v7367_v53  ;;  %v2538_v57 = vmul.f32 0.5, %v4975_v48  ;;  %4988 = vtanh.f32 %v2289_v37  ;;  %v7419_v6 = vadd.f32 0.5, %v2535_v28 }
 0x267   : > { %v7404_v25 = vpop.f32.mrb[33].mxu1  ;;  %v7406_v45 = vpop.f32.mrb[34].mxu0  ;;  %v2772_v61 = vpack.c.bf16 %v7394_v10, %v7382_v22  ;;  %v2540_v19 = vmul.f32 0.5, %v4977_v32  ;;  %4990 = vtanh.f32 %v2290_v33  ;;  %v2146_v42 = vadd.f32 %v7321_v54, %v1599_v43 }
 0x268   : > { %v7412_v44 = vpop.f32.mrb[34].mxu1  ;;  %v7414_v40 = vpop.f32.mrb[35].mxu0  ;;  %4992 = vtanh.f32 %v2292_v38  ;;  %v7424_v47 = vadd.f32 0.5, %v2537_v30  ;;  %v7426_v26 = vadd.f32 0.5, %v2538_v57  ;;  %v2767_v37 = vpack.c.bf16 %v7358_v20, %v7347_v21 }
 0x269   : > { %v7422_v23 = vpop.f32.mrb[35].mxu1  ;;  %v4979_v31 = vpop.eup %4978  ;;  %v2769_v63 = vpack.c.bf16 %v7360_v35, %v7356_v5  ;;  %4994 = vtanh.f32 %v2291_v52  ;;  %v2293_v33 = vmul.f32 0.5, %v2146_v42  ;;  %v7434_v14 = vadd.f32 0.5, %v2540_v19 }
 0x26a   : > { %v1604_v18 = vpop.permute.xlu1 %1603  ;;  %v1609_v0 = vpop.permute.xlu0 %1608  ;;  %3208 = vmatprep.subr.bf16.mxu0 %v2767_v37  ;;  %v2539_v20 = vmul.f32 0.5, %v4979_v31 }
 0x26b   : > { %v1955_v54 = vadd.f32 %v7323_v12, %v1604_v18  ;;  %v2148_v43 = vadd.f32 %v7328_v41, %v1604_v18  ;;  %v4981_v11 = vpop.eup %4980  ;;  %3401 = vmatprep.subr.bf16.mxu1 %v2769_v63  ;;  %v1957_v28 = vadd.f32 %v7330_v15, %v1604_v18  ;;  %v2150_v21 = vadd.f32 %v7333_v60, %v1604_v18 }
 0x26c   : > { %v1961_v5 = vadd.f32 %v7345_v49, %v1609_v0  ;;  %4996 = vtanh.f32 %v2293_v33  ;;  %3209 = vmatpush1.bf16.msra.mxu0 %v2766_v1  ;;  %3402 = vmatpush1.bf16.msra.mxu1 %v2768_v8  ;;  %v7445_v12 = vpop.f32.mrb[36].mxu0  ;;  %v2541_v15 = vmul.f32 0.5, %v4981_v11  ;;  %v2154_v49 = vadd.f32 %v7352_v16, %v1609_v0 }
 0x26d   : > { %v2294_v35 = vmul.f32 0.5, %v1955_v54  ;;  %v2296_v55 = vmul.f32 0.5, %v2148_v43  ;;  %v4983_v41 = vpop.eup %4982  ;;  %v2295_v48 = vmul.f32 0.5, %v1957_v28  ;;  %v2297_v60 = vmul.f32 0.5, %v2150_v21  ;;  %v7448_v30 = vpop.f32.mrb[36].mxu1 }
 0x26e   : > { %v7450_v38 = vpop.f32.mrb[37].mxu0  ;;  %v4985_v32 = vpop.eup %4984  ;;  %v2542_v57 = vmul.f32 0.5, %v4983_v41  ;;  %v2298_v2 = vmul.f32 0.5, %v1961_v5  ;;  %v1963_v29 = vadd.f32 %v7354_v58, %v1609_v0  ;;  %v2300_v19 = vmul.f32 0.5, %v2154_v49 }
 0x26f   : > { %4998 = vtanh.f32 %v2294_v35  ;;  %v7453_v56 = vpop.f32.mrb[37].mxu1  ;;  %v7455_v51 = vpop.f32.mrb[38].mxu0  ;;  %v2544_v8 = vmul.f32 0.5, %v4985_v32  ;;  %v2156_v16 = vadd.f32 %v7363_v7, %v1609_v0  ;;  %v2661_v7 = vadd.f32 0.5, %v7400_v24 }
 0x270   : > { %v4987_v1 = vpop.eup %4986  ;;  %5000 = vtanh.f32 %v2296_v55  ;;  %v7458_v50 = vpop.f32.mrb[38].mxu1  ;;  %v7462_v31 = vadd.f32 0.5, %v2542_v57  ;;  %v2299_v58 = vmul.f32 0.5, %v1963_v29  ;;  %v7471_v5 = vadd.f32 0.5, %v2539_v20 }
 0x271   : > { %v7460_v52 = vpop.f32.mrb[39].mxu0  ;;  %v4989_v42 = vpop.eup %4988  ;;  %v2543_v18 = vmul.f32 0.5, %v4987_v1  ;;  %5002 = vtanh.f32 %v2295_v48  ;;  %v7466_v33 = vadd.f32 0.5, %v2544_v8  ;;  %v2301_v43 = vmul.f32 0.5, %v2156_v16 }
 0x272   : > { %v7464_v37 = vpop.f32.mrb[39].mxu1  ;;  %v4991_v63 = vpop.eup %4990  ;;  %v2545_v54 = vmul.f32 0.5, %v4989_v42  ;;  %5004 = vtanh.f32 %v2297_v60  ;;  %v2774_v0 = vpack.c.bf16 %v7462_v31, %v7426_v26  ;;  %v7475_v60 = vadd.f32 0.5, %v2541_v15 }
 0x273   : > { %v4993_v11 = vpop.eup %4992  ;;  %v2546_v28 = vmul.f32 0.5, %v4991_v63  ;;  %5006 = vtanh.f32 %v2298_v2  ;;  %v1614_v21 = vpop.permute.xlu1 %1613  ;;  %v2776_v35 = vpack.c.bf16 %v7466_v33, %v7434_v14  ;;  %v2771_v24 = vpack.c.bf16 %v7419_v6, %v7408_v39 }
 0x274   : > { %v2548_v55 = vmul.f32 0.5, %v4993_v11  ;;  %5008 = vtanh.f32 %v2300_v19  ;;  %v4995_v41 = vpop.eup %4994  ;;  %v1619_v48 = vpop.permute.xlu0 %1618  ;;  %v2773_v49 = vpack.c.bf16 %v7424_v47, %v2661_v7  ;;  %v7482_v57 = vadd.f32 0.5, %v2543_v18 }
 0x275   : > { %5010 = vtanh.f32 %v2299_v58  ;;  %v7480_v32 = vpop.f32.mrb[40].mxu0  ;;  %v7484_v20 = vadd.f32 0.5, %v2545_v54  ;;  %v1965_v2 = vadd.f32 %v7365_v46, %v1614_v21  ;;  %v7487_v29 = vpop.f32.mrb[40].mxu1  ;;  %v7491_v8 = vadd.f32 0.5, %v2546_v28  ;;  %3210 = vmatprep.subr.bf16.mxu0 %v2771_v24 }
 0x276   : > { %5012 = vtanh.f32 %v2301_v43  ;;  %v7489_v1 = vpop.f32.mrb[41].mxu0  ;;  %v4997_v15 = vpop.eup %4996  ;;  %3403 = vmatprep.subr.bf16.mxu1 %v2773_v49  ;;  %v2158_v39 = vadd.f32 %v7370_v3, %v1614_v21  ;;  %v1967_v6 = vadd.f32 %v7372_v27, %v1614_v21  ;;  %v2160_v47 = vadd.f32 %v7380_v34, %v1614_v21  ;;  %3211 = vmatpush1.bf16.msra.mxu0 %v2770_v4 }
 0x277   : > { %v7496_v19 = vpop.f32.mrb[41].mxu1  ;;  %v7498_v16 = vpop.f32.mrb[42].mxu0  ;;  %v7500_v46 = vadd.f32 0.5, %v2548_v55  ;;  %v2547_v42 = vmul.f32 0.5, %v4995_v41  ;;  %v2302_v18 = vmul.f32 0.5, %v1965_v2  ;;  %3404 = vmatpush1.bf16.msra.mxu1 %v2772_v61  ;;  %v1971_v3 = vadd.f32 %v7392_v17, %v1619_v48 }
 0x278   : > { %v7509_v27 = vpop.f32.mrb[42].mxu1  ;;  %v7511_v34 = vpop.f32.mrb[43].mxu0  ;;  %v2304_v63 = vmul.f32 0.5, %v2158_v39  ;;  %v2303_v54 = vmul.f32 0.5, %v1967_v6  ;;  %v2305_v43 = vmul.f32 0.5, %v2160_v47  ;;  %v2164_v11 = vadd.f32 %v7396_v13, %v1619_v48 }
 0x279   : > { %v4999_v58 = vpop.eup %4998  ;;  %v7514_v7 = vpop.f32.mrb[43].mxu1  ;;  %v2549_v36 = vmul.f32 0.5, %v4997_v15  ;;  %5014 = vtanh.f32 %v2302_v18  ;;  %v2306_v22 = vmul.f32 0.5, %v1971_v3  ;;  %v1973_v28 = vadd.f32 %v7398_v9, %v1619_v48 }
 0x27a   : > { %v5001_v53 = vpop.eup %5000  ;;  %v2550_v4 = vmul.f32 0.5, %v4999_v58  ;;  %5016 = vtanh.f32 %v2304_v63  ;;  %v2308_v17 = vmul.f32 0.5, %v2164_v11  ;;  %v2166_v13 = vadd.f32 %v7404_v25, %v1619_v48 }
 0x27b   : > { %v5003_v10 = vpop.eup %5002  ;;  %v2552_v61 = vmul.f32 0.5, %v5001_v53  ;;  %5018 = vtanh.f32 %v2303_v54  ;;  %v2307_v15 = vmul.f32 0.5, %v1973_v28  ;;  %v7524_v47 = vadd.f32 0.5, %v2547_v42 }
 0x27c   : > { %v5005_v21 = vpop.eup %5004  ;;  %v7517_v55 = vadd.f32 0.5, %v2550_v4  ;;  %v2551_v41 = vmul.f32 0.5, %v5003_v10  ;;  %5020 = vtanh.f32 %v2305_v43  ;;  %v7522_v39 = vpop.f32.mrb[44].mxu0  ;;  %v7532_v48 = vadd.f32 0.5, %v2549_v36 }
 0x27d   : > { %v5007_v24 = vpop.eup %5006  ;;  %v7520_v49 = vadd.f32 0.5, %v2552_v61  ;;  %v2553_v2 = vmul.f32 0.5, %v5005_v21  ;;  %5022 = vtanh.f32 %v2306_v22  ;;  %v7528_v3 = vpop.f32.mrb[44].mxu1  ;;  %v2309_v22 = vmul.f32 0.5, %v2166_v13 }
 0x27e   : > { %v5009_v6 = vpop.eup %5008  ;;  %v2778_v9 = vpack.c.bf16 %v7517_v55, %v7491_v8  ;;  %v2554_v18 = vmul.f32 0.5, %v5007_v24  ;;  %v7530_v58 = vpop.f32.mrb[45].mxu0  ;;  %5024 = vtanh.f32 %v2308_v17  ;;  %v7540_v53 = vadd.f32 0.5, %v2551_v41 }
 0x27f   : > { %v5011_v25 = vpop.eup %5010  ;;  %v2780_v63 = vpack.c.bf16 %v7520_v49, %v7500_v46  ;;  %v2556_v54 = vmul.f32 0.5, %v5009_v6  ;;  %v7536_v43 = vpop.f32.mrb[45].mxu1  ;;  %v7542_v4 = vadd.f32 0.5, %v2553_v2  ;;  %5026 = vtanh.f32 %v2307_v15 }
 0x280   : > { %v7538_v42 = vpop.f32.mrb[46].mxu0  ;;  %v5013_v11 = vpop.eup %5012  ;;  %v7548_v28 = vadd.f32 0.5, %v2554_v18  ;;  %v2555_v21 = vmul.f32 0.5, %v5011_v25  ;;  %v2775_v17 = vpack.c.bf16 %v7482_v57, %v7471_v5  ;;  %v2777_v24 = vpack.c.bf16 %v7484_v20, %v7475_v60 }
 0x281   : > { %v7544_v10 = vpop.f32.mrb[46].mxu1  ;;  %v7546_v36 = vpop.f32.mrb[47].mxu0  ;;  %v7556_v6 = vadd.f32 0.5, %v2556_v54  ;;  %5028 = vtanh.f32 %v2309_v22  ;;  %v2557_v59 = vmul.f32 0.5, %v5013_v11 }
 0x282   : > { %v1624_v61 = vpop.permute.xlu1 %1623  ;;  %v7554_v41 = vpop.f32.mrb[47].mxu1  ;;  %3212 = vmatprep.subr.bf16.mxu0 %v2775_v17  ;;  %3405 = vmatprep.subr.bf16.mxu1 %v2777_v24 }
 0x283   : > { %v1629_v2 = vpop.permute.xlu0 %1628  ;;  %v1975_v13 = vadd.f32 %v7406_v45, %v1624_v61  ;;  %v2168_v15 = vadd.f32 %v7412_v44, %v1624_v61  ;;  %v1977_v18 = vadd.f32 %v7414_v40, %v1624_v61  ;;  %v2170_v5 = vadd.f32 %v7422_v23, %v1624_v61  ;;  %v5015_v60 = vpop.eup %5014  ;;  %3213 = vmatpush1.bf16.msra.mxu0 %v2774_v0 }
 0x284   : > { %v1981_v57 = vadd.f32 %v7445_v12, %v1629_v2  ;;  %3406 = vmatpush1.bf16.msra.mxu1 %v2776_v35  ;;  %v2174_v45 = vadd.f32 %v7448_v30, %v1629_v2  ;;  %v1983_v44 = vadd.f32 %v7450_v38, %v1629_v2  ;;  %v5017_v40 = vpop.eup %5016  ;;  %v2558_v54 = vmul.f32 0.5, %v5015_v60  ;;  %v7571_v22 = vpop.f32.mrb[48].mxu0 }
 0x285   : > { %v2310_v20 = vmul.f32 0.5, %v1975_v13  ;;  %v2312_v25 = vmul.f32 0.5, %v2168_v15  ;;  %v2311_v23 = vmul.f32 0.5, %v1977_v18  ;;  %v2313_v11 = vmul.f32 0.5, %v2170_v5  ;;  %v5019_v61 = vpop.eup %5018  ;;  %v7573_v0 = vpop.f32.mrb[48].mxu1 }
 0x286   : > { %v2314_v12 = vmul.f32 0.5, %v1981_v57  ;;  %v2560_v17 = vmul.f32 0.5, %v5017_v40  ;;  %v2316_v26 = vmul.f32 0.5, %v2174_v45  ;;  %v2315_v31 = vmul.f32 0.5, %v1983_v44  ;;  %v7575_v14 = vpop.f32.mrb[49].mxu0  ;;  %v5021_v33 = vpop.eup %5020 }
 0x287   : > { %5030 = vtanh.f32 %v2310_v20  ;;  %v7577_v30 = vadd.f32 0.5, %v2558_v54  ;;  %v2559_v38 = vmul.f32 0.5, %v5019_v61  ;;  %v2176_v35 = vadd.f32 %v7453_v56, %v1629_v2  ;;  %v7580_v24 = vpop.f32.mrb[49].mxu1  ;;  %v7582_v13 = vpop.f32.mrb[50].mxu0 }
 0x288   : > { %5032 = vtanh.f32 %v2312_v25  ;;  %v5023_v15 = vpop.eup %5022  ;;  %v7584_v18 = vadd.f32 0.5, %v2560_v17  ;;  %v2561_v5 = vmul.f32 0.5, %v5021_v33  ;;  %v2779_v57 = vpack.c.bf16 %v7540_v53, %v7524_v47  ;;  %v7588_v60 = vpop.f32.mrb[50].mxu1 }
 0x289   : > { %5034 = vtanh.f32 %v2311_v23  ;;  %v7590_v20 = vpop.f32.mrb[51].mxu0  ;;  %v5025_v45 = vpop.eup %5024  ;;  %v7592_v25 = vadd.f32 0.5, %v2555_v21  ;;  %v2782_v56 = vpack.c.bf16 %v7577_v30, %v7548_v28  ;;  %v2562_v2 = vmul.f32 0.5, %v5023_v15 }
 0x28a   : > { %5036 = vtanh.f32 %v2313_v11  ;;  %v7596_v44 = vpop.f32.mrb[51].mxu1  ;;  %v5027_v40 = vpop.eup %5026  ;;  %v7598_v54 = vadd.f32 0.5, %v2557_v59  ;;  %v2784_v47 = vpack.c.bf16 %v7584_v18, %v7556_v6  ;;  %v2564_v53 = vmul.f32 0.5, %v5025_v45  ;;  %3214 = vmatprep.subr.bf16.mxu0 %v2779_v57 }
 0x28b   : > { %5038 = vtanh.f32 %v2314_v12  ;;  %v1634_v23 = vpop.permute.xlu1 %1633  ;;  %v2687_v61 = vadd.f32 0.5, %v2559_v38  ;;  %v7602_v21 = vadd.f32 0.5, %v2561_v5  ;;  %v2317_v17 = vmul.f32 0.5, %v2176_v35  ;;  %3215 = vmatpush1.bf16.msra.mxu0 %v2778_v9  ;;  %v5029_v11 = vpop.eup %5028 }
 0x28c   : > { %5040 = vtanh.f32 %v2316_v26  ;;  %v7607_v33 = vadd.f32 0.5, %v2562_v2  ;;  %v2781_v59 = vpack.c.bf16 %v7542_v4, %v7532_v48  ;;  %v1985_v12 = vadd.f32 %v7455_v51, %v1634_v23  ;;  %v1639_v15 = vpop.permute.xlu0 %1638  ;;  %v7615_v35 = vpop.f32.mrb[52].mxu0 }
 0x28d   : > { %5042 = vtanh.f32 %v2315_v31  ;;  %v7612_v57 = vadd.f32 0.5, %v2564_v53  ;;  %v2563_v38 = vmul.f32 0.5, %v5027_v40  ;;  %v2565_v5 = vmul.f32 0.5, %v5029_v11  ;;  %v7620_v48 = vpop.f32.mrb[52].mxu1  ;;  %v7622_v51 = vpop.f32.mrb[53].mxu0 }
 0x28e   : > { %v2178_v26 = vadd.f32 %v7458_v50, %v1634_v23  ;;  %3407 = vmatprep.subr.bf16.mxu1 %v2781_v59  ;;  %v2318_v8 = vmul.f32 0.5, %v1985_v12  ;;  %v1987_v55 = vadd.f32 %v7460_v52, %v1634_v23  ;;  %v2180_v9 = vadd.f32 %v7464_v37, %v1634_v23  ;;  %v7629_v2 = vpop.f32.mrb[53].mxu1  ;;  %v7631_v52 = vpop.f32.mrb[54].mxu0 }
 0x28f   : > { %v1991_v31 = vadd.f32 %v7480_v32, %v1639_v15  ;;  %5044 = vtanh.f32 %v2317_v17  ;;  %3408 = vmatpush1.bf16.msra.mxu1 %v2780_v63  ;;  %v2184_v50 = vadd.f32 %v7487_v29, %v1639_v15  ;;  %v1993_v45 = vadd.f32 %v7489_v1, %v1639_v15  ;;  %v7633_v23 = vpop.f32.mrb[54].mxu1  ;;  %v7635_v17 = vpop.f32.mrb[55].mxu0 }
 0x290   : > { %v2320_v4 = vmul.f32 0.5, %v2178_v26  ;;  %5046 = vtanh.f32 %v2318_v8  ;;  %v2319_v32 = vmul.f32 0.5, %v1987_v55  ;;  %v2321_v40 = vmul.f32 0.5, %v2180_v9  ;;  %v7637_v63 = vpop.f32.mrb[55].mxu1 }
 0x291   : > { %v5031_v37 = vpop.eup %5030  ;;  %v2322_v53 = vmul.f32 0.5, %v1991_v31  ;;  %v2324_v49 = vmul.f32 0.5, %v2184_v50  ;;  %v2323_v29 = vmul.f32 0.5, %v1993_v45  ;;  %v2186_v12 = vadd.f32 %v7496_v19, %v1639_v15  ;;  %v1644_v50 = vpop.permute.xlu1 %1643 }
 0x292   : > { %v5033_v11 = vpop.eup %5032  ;;  %v2566_v46 = vmul.f32 0.5, %v5031_v37  ;;  %5048 = vtanh.f32 %v2320_v4  ;;  %v2783_v26 = vpack.c.bf16 %v2687_v61, %v7592_v25  ;;  %v2785_v31 = vpack.c.bf16 %v7602_v21, %v7598_v54  ;;  %v1649_v19 = vpop.permute.xlu0 %1648 }
 0x293   : > { %v5035_v1 = vpop.eup %5034  ;;  %v2568_v59 = vmul.f32 0.5, %v5033_v11  ;;  %5050 = vtanh.f32 %v2319_v32  ;;  %v2325_v11 = vmul.f32 0.5, %v2186_v12  ;;  %v7654_v15 = vadd.f32 0.5, %v2563_v38 }
 0x294   : > { %v5037_v8 = vpop.eup %5036  ;;  %v7641_v55 = vadd.f32 0.5, %v2566_v46  ;;  %v2567_v9 = vmul.f32 0.5, %v5035_v1  ;;  %5052 = vtanh.f32 %v2321_v40  ;;  %3216 = vmatprep.subr.bf16.mxu0 %v2783_v26  ;;  %3409 = vmatprep.subr.bf16.mxu1 %v2785_v31  ;;  %v7652_v54 = vpop.f32.mrb[56].mxu0  ;;  %v7665_v28 = vadd.f32 0.5, %v2565_v5 }
 0x295   : > { %v5039_v4 = vpop.eup %5038  ;;  %v7645_v45 = vadd.f32 0.5, %v2568_v59  ;;  %v2569_v37 = vmul.f32 0.5, %v5037_v8  ;;  %5054 = vtanh.f32 %v2322_v53  ;;  %3217 = vmatpush1.bf16.msra.mxu0 %v2782_v56  ;;  %3410 = vmatpush1.bf16.msra.mxu1 %v2784_v47  ;;  %v7661_v46 = vpop.f32.mrb[56].mxu1  ;;  %v1995_v56 = vadd.f32 %v7498_v16, %v1644_v50 }
 0x296   : > { %v5041_v32 = vpop.eup %5040  ;;  %v2570_v61 = vmul.f32 0.5, %v5039_v4  ;;  %5056 = vtanh.f32 %v2324_v49  ;;  %v7663_v49 = vpop.f32.mrb[57].mxu0  ;;  %v7667_v30 = vadd.f32 0.5, %v2567_v9  ;;  %v2188_v6 = vadd.f32 %v7509_v27, %v1644_v50 }
 0x297   : > { %v5043_v21 = vpop.eup %5042  ;;  %v2572_v53 = vmul.f32 0.5, %v5041_v32  ;;  %5058 = vtanh.f32 %v2323_v29  ;;  %v7670_v38 = vpop.f32.mrb[57].mxu1  ;;  %v7674_v29 = vadd.f32 0.5, %v2569_v37  ;;  %v1997_v18 = vadd.f32 %v7511_v34, %v1644_v50 }
 0x298   : > { %5060 = vtanh.f32 %v2325_v11  ;;  %v7672_v1 = vpop.f32.mrb[58].mxu0  ;;  %v7676_v59 = vadd.f32 0.5, %v2570_v61  ;;  %v7680_v47 = vpop.f32.mrb[58].mxu1  ;;  %v2571_v26 = vmul.f32 0.5, %v5043_v21  ;;  %v2326_v8 = vmul.f32 0.5, %v1995_v56 }
 0x299   : > { %v7682_v5 = vpop.f32.mrb[59].mxu0  ;;  %v5045_v12 = vpop.eup %5044  ;;  %v2190_v16 = vadd.f32 %v7514_v7, %v1644_v50  ;;  %v2001_v9 = vadd.f32 %v7522_v39, %v1649_v19  ;;  %v7688_v37 = vadd.f32 0.5, %v2572_v53  ;;  %v2328_v11 = vmul.f32 0.5, %v2188_v6 }
 0x29a   : > { %v7686_v31 = vpop.f32.mrb[59].mxu1  ;;  %v5047_v4 = vpop.eup %5046  ;;  %v2327_v27 = vmul.f32 0.5, %v1997_v18  ;;  %v2194_v34 = vadd.f32 %v7528_v3, %v1649_v19  ;;  %5062 = vtanh.f32 %v2326_v8  ;;  %v2003_v39 = vadd.f32 %v7530_v58, %v1649_v19 }
 0x29b   : > { %v2574_v61 = vmul.f32 0.5, %v5047_v4  ;;  %v2329_v40 = vmul.f32 0.5, %v2190_v16  ;;  %v2330_v25 = vmul.f32 0.5, %v2001_v9  ;;  %5064 = vtanh.f32 %v2328_v11 }
 0x29c   : > { %v5049_v32 = vpop.eup %5048  ;;  %v2332_v7 = vmul.f32 0.5, %v2194_v34  ;;  %5066 = vtanh.f32 %v2327_v27  ;;  %v2196_v6 = vadd.f32 %v7536_v43, %v1649_v19  ;;  %v7695_v18 = vpop.f32.mrb[60].mxu0  ;;  %v2331_v16 = vmul.f32 0.5, %v2003_v39 }
 0x29d   : > { %v5051_v21 = vpop.eup %5050  ;;  %v2576_v56 = vmul.f32 0.5, %v5049_v32  ;;  %v7692_v62 = vadd.f32 0.5, %v2574_v61  ;;  %5068 = vtanh.f32 %v2329_v40  ;;  %v7699_v9 = vpop.f32.mrb[60].mxu1  ;;  %v7703_v34 = vmul.f32 0.5, %v5045_v12 }
 0x29e   : > { %v5053_v50 = vpop.eup %5052  ;;  %v2575_v53 = vmul.f32 0.5, %v5051_v21  ;;  %v7701_v11 = vpop.f32.mrb[61].mxu0  ;;  %5070 = vtanh.f32 %v2330_v25  ;;  %v7711_v21 = vadd.f32 0.5, %v2571_v26  ;;  %v2333_v25 = vmul.f32 0.5, %v2196_v6 }
 0x29f   : > { %v5055_v3 = vpop.eup %5054  ;;  %v7697_v4 = vadd.f32 0.5, %v2576_v56  ;;  %v2577_v8 = vmul.f32 0.5, %v5053_v50  ;;  %8649 = vst [vmem:[#allocation8_spill] sm:$0xff] %v7701_v11  ;;  %v7707_v43 = vpop.f32.mrb[61].mxu1  ;;  %5072 = vtanh.f32 %v2332_v7  ;;  %v2789_v7 = vpack.c.bf16 %v7674_v29, %v7665_v28 }
 0x2a0   : > { %v5057_v58 = vpop.eup %5056  ;;  %v2578_v32 = vmul.f32 0.5, %v5055_v3  ;;  %8650 = vst [vmem:[#allocation9_spill] sm:$0xff] %v7707_v43  ;;  %v7709_v19 = vpop.f32.mrb[62].mxu0  ;;  %v2703_v27 = vadd.f32 0.5, %v2575_v53  ;;  %5074 = vtanh.f32 %v2331_v16  ;;  %v8653_v29 = vpack.c.bf16 %v7641_v55, %v7607_v33 }
 0x2a1   : > { %8651 = vst [vmem:[#allocation10_spill] sm:$0xff] %v7709_v19  ;;  %v5059_v61 = vpop.eup %5058  ;;  %v2580_v56 = vmul.f32 0.5, %v5057_v58  ;;  %v7715_v39 = vpop.f32.mrb[62].mxu1  ;;  %v7719_v3 = vadd.f32 0.5, %v2577_v8  ;;  %v2787_v58 = vpack.c.bf16 %v7667_v30, %v7654_v15  ;;  %5076 = vtanh.f32 %v2333_v25  ;;  %3411 = vmatprep.subr.bf16.mxu1 %v2789_v7 }
 0x2a2   : > { %v7717_v12 = vpop.f32.mrb[63].mxu0  ;;  %v5061_v50 = vpop.eup %5060  ;;  %v7723_v26 = vadd.f32 0.5, %v2578_v32  ;;  %v2579_v11 = vmul.f32 0.5, %v5059_v61 }
 0x2a3   : > { %8652 = vst [vmem:[#allocation11_spill] sm:$0xff] %v7717_v12  ;;  %v7721_v43 = vpop.f32.mrb[63].mxu1  ;;  %v1654_v19 = vpop.permute.xlu1 %1653  ;;  %v7729_v12 = vadd.f32 0.5, %v2580_v56  ;;  %v2581_v53 = vmul.f32 0.5, %v5061_v50  ;;  %3218 = vmatprep.subr.bf16.mxu0 %v2787_v58 }
 0x2a4   : > { %v1659_v40 = vpop.permute.xlu0 %1658  ;;  %v2005_v8 = vadd.f32 %v7538_v42, %v1654_v19  ;;  %v2198_v6 = vadd.f32 %v7544_v10, %v1654_v19  ;;  %v2007_v16 = vadd.f32 %v7546_v36, %v1654_v19  ;;  %v2200_v32 = vadd.f32 %v7554_v41, %v1654_v19  ;;  %v5063_v30 = vpop.eup %5062  ;;  %3219 = vmatpush1.bf16.msra.mxu0 %v8653_v29 }
 0x2a5   : > { %v2011_v15 = vadd.f32 %v7571_v22, %v1659_v40  ;;  %v8654_v42 = vpack.c.bf16 %v7645_v45, %v7612_v57  ;;  %v2204_v10 = vadd.f32 %v7573_v0, %v1659_v40  ;;  %v2013_v56 = vadd.f32 %v7575_v14, %v1659_v40  ;;  %v5065_v36 = vpop.eup %5064 }
 0x2a6   : > { %v2334_v61 = vmul.f32 0.5, %v2005_v8  ;;  %v2336_v28 = vmul.f32 0.5, %v2198_v6  ;;  %v2582_v50 = vmul.f32 0.5, %v5063_v30  ;;  %v2335_v41 = vmul.f32 0.5, %v2007_v16  ;;  %v5067_v25 = vpop.eup %5066 }
 0x2a7   : > { %3412 = vmatpush1.bf16.msra.mxu1 %v8654_v42  ;;  %v2337_v19 = vmul.f32 0.5, %v2200_v32  ;;  %v2338_v22 = vmul.f32 0.5, %v2011_v15  ;;  %v2584_v58 = vmul.f32 0.5, %v5065_v36  ;;  %v2340_v7 = vmul.f32 0.5, %v2204_v10  ;;  %v5069_v33 = vpop.eup %5068 }
 0x2a8   : > { %5078 = vtanh.f32 %v2334_v61  ;;  %v2339_v8 = vmul.f32 0.5, %v2013_v56  ;;  %v7744_v55 = vadd.f32 0.5, %v2582_v50  ;;  %v2583_v6 = vmul.f32 0.5, %v5067_v25  ;;  %v5071_v0 = vpop.eup %5070  ;;  %v1669_v50 = vpop.permute.xlu0 %1668 }
 0x2a9   : > { %5080 = vtanh.f32 %v2336_v28  ;;  %v2206_v57 = vadd.f32 %v7580_v24, %v1659_v40  ;;  %v7747_v45 = vadd.f32 0.5, %v2584_v58  ;;  %v2585_v14 = vmul.f32 0.5, %v5069_v33  ;;  %v5073_v32 = vpop.eup %5072  ;;  %v1664_v40 = vpop.permute.xlu1 %1663 }
 0x2aa   : > { %5082 = vtanh.f32 %v2335_v41  ;;  %v2791_v16 = vpack.c.bf16 %v2703_v27, %v7711_v21  ;;  %v2794_v15 = vpack.c.bf16 %v7744_v55, %v7723_v26  ;;  %v2586_v30 = vmul.f32 0.5, %v5071_v0  ;;  %v5075_v61 = vpop.eup %5074 }
 0x2ab   : > { %5084 = vtanh.f32 %v2337_v19  ;;  %v2701_v29 = vadd.f32 0.5, %v7703_v34  ;;  %v2707_v42 = vadd.f32 0.5, %v2579_v11  ;;  %v2796_v24 = vpack.c.bf16 %v7747_v45, %v7729_v12  ;;  %v5077_v34 = vpop.eup %5076 }
 0x2ac   : > { %5086 = vtanh.f32 %v2338_v22  ;;  %3220 = vmatprep.subr.bf16.mxu0 %v2791_v16  ;;  %v2709_v28 = vadd.f32 0.5, %v2581_v53  ;;  %v2711_v10 = vadd.f32 0.5, %v2583_v6  ;;  %v2341_v27 = vmul.f32 0.5, %v2206_v57  ;;  %v1679_v55 = vpop.permute.xlu0 %1678 }
 0x2ad   : > { %5088 = vtanh.f32 %v2340_v7  ;;  %v8655_v21 = vpack.c.bf16 %v7692_v62, %v7676_v59  ;;  %v2713_v56 = vadd.f32 0.5, %v2585_v14  ;;  %v2793_v36 = vpack.c.bf16 %v7719_v3, %v2701_v29 }
 0x2ae   : > { %5090 = vtanh.f32 %v2339_v8  ;;  %v2015_v11 = vadd.f32 %v7582_v13, %v1664_v40  ;;  %v7760_v41 = vadd.f32 0.5, %v2586_v30  ;;  %v2588_v19 = vmul.f32 0.5, %v5073_v32 }
 0x2af   : > { %3221 = vmatpush1.bf16.msra.mxu0 %v8655_v21  ;;  %v2587_v22 = vmul.f32 0.5, %v5075_v61  ;;  %v2208_v53 = vadd.f32 %v7588_v60, %v1664_v40  ;;  %3413 = vmatprep.subr.bf16.mxu1 %v2793_v36  ;;  %v2017_v58 = vadd.f32 %v7590_v20, %v1664_v40  ;;  %v2210_v62 = vadd.f32 %v7596_v44, %v1664_v40 }
 0x2b0   : > { %v2342_v25 = vmul.f32 0.5, %v2015_v11  ;;  %v2021_v59 = vadd.f32 %v7615_v35, %v1669_v50  ;;  %5092 = vtanh.f32 %v2341_v27  ;;  %v8656_v13 = vpack.c.bf16 %v7697_v4, %v7688_v37 }
 0x2b1   : > { %v2344_v3 = vmul.f32 0.5, %v2208_v53  ;;  %v2214_v7 = vadd.f32 %v7620_v48, %v1669_v50  ;;  %v2023_v8 = vadd.f32 %v7622_v51, %v1669_v50  ;;  %v2343_v60 = vmul.f32 0.5, %v2017_v58 }
 0x2b2   : > { %3414 = vmatpush1.bf16.msra.mxu1 %v8656_v13  ;;  %v5079_v33 = vpop.eup %5078  ;;  %5094 = vtanh.f32 %v2342_v25  ;;  %v2345_v6 = vmul.f32 0.5, %v2210_v62  ;;  %v2346_v57 = vmul.f32 0.5, %v2021_v59  ;;  %v2216_v37 = vadd.f32 %v7629_v2, %v1669_v50 }
 0x2b3   : > { %v5081_v20 = vpop.eup %5080  ;;  %v2590_v0 = vmul.f32 0.5, %v5079_v33  ;;  %5096 = vtanh.f32 %v2344_v3  ;;  %v2348_v44 = vmul.f32 0.5, %v2214_v7  ;;  %v2347_v35 = vmul.f32 0.5, %v2023_v8 }
 0x2b4   : > { %v5083_v14 = vpop.eup %5082  ;;  %v2592_v16 = vmul.f32 0.5, %v5081_v20  ;;  %5098 = vtanh.f32 %v2343_v60  ;;  %v2795_v4 = vpack.c.bf16 %v2711_v10, %v2707_v42  ;;  %v2797_v30 = vpack.c.bf16 %v2713_v56, %v2709_v28  ;;  %v1674_v28 = vpop.permute.xlu1 %1673 }
 0x2b5   : > { %v5085_v32 = vpop.eup %5084  ;;  %v7772_v48 = vadd.f32 0.5, %v2590_v0  ;;  %v2591_v51 = vmul.f32 0.5, %v5083_v14  ;;  %5100 = vtanh.f32 %v2345_v6  ;;  %v7774_v29 = vadd.f32 0.5, %v2588_v19 }
 0x2b6   : > { %v5087_v61 = vpop.eup %5086  ;;  %v7776_v40 = vadd.f32 0.5, %v2592_v16  ;;  %v2593_v27 = vmul.f32 0.5, %v5085_v32  ;;  %5102 = vtanh.f32 %v2346_v57  ;;  %3222 = vmatprep.subr.bf16.mxu0 %v2795_v4  ;;  %3415 = vmatprep.subr.bf16.mxu1 %v2797_v30  ;;  %v7783_v10 = vadd.f32 0.5, %v2587_v22 }
 0x2b7   : > { %v5089_v21 = vpop.eup %5088  ;;  %v2798_v36 = vpack.c.bf16 %v7772_v48, %v7760_v41  ;;  %v2594_v2 = vmul.f32 0.5, %v5087_v61  ;;  %5104 = vtanh.f32 %v2348_v44  ;;  %3223 = vmatpush1.bf16.msra.mxu0 %v2794_v15  ;;  %v2349_v11 = vmul.f32 0.5, %v2216_v37  ;;  %3416 = vmatpush1.bf16.msra.mxu1 %v2796_v24 }
 0x2b8   : > { %v5091_v42 = vpop.eup %5090  ;;  %v2800_v56 = vpack.c.bf16 %v7776_v40, %v7774_v29  ;;  %5106 = vtanh.f32 %v2347_v35  ;;  %v2589_v50 = vmul.f32 0.5, %v5077_v34  ;;  %v7790_v19 = vadd.f32 0.5, %v2591_v51 }
 0x2b9   : > { %v2596_v53 = vmul.f32 0.5, %v5089_v21  ;;  %v2025_v26 = vadd.f32 %v7631_v52, %v1674_v28  ;;  %v2721_v15 = vadd.f32 0.5, %v2593_v27  ;;  %v7793_v25 = vadd.f32 0.5, %v2594_v2 }
 0x2ba   : > { %v2218_v22 = vadd.f32 %v7633_v23, %v1674_v28  ;;  %v2027_v58 = vadd.f32 %v7635_v17, %v1674_v28  ;;  %v5093_v62 = vpop.eup %5092  ;;  %v2595_v59 = vmul.f32 0.5, %v5091_v42  ;;  %v2220_v12 = vadd.f32 %v7637_v63, %v1674_v28  ;;  %v1684_v28 = vpop.permute.xlu1 %1683 }
 0x2bb   : > { %v2350_v3 = vmul.f32 0.5, %v2025_v26  ;;  %v2031_v45 = vadd.f32 %v7652_v54, %v1679_v55  ;;  %5108 = vtanh.f32 %v2349_v11  ;;  %v2224_v52 = vadd.f32 %v7661_v46, %v1679_v55  ;;  %v1689_v26 = vpop.permute.xlu0 %1688 }
 0x2bc   : > { %v5095_v24 = vpop.eup %5094  ;;  %v2352_v34 = vmul.f32 0.5, %v2218_v22  ;;  %v2351_v13 = vmul.f32 0.5, %v2027_v58  ;;  %v7800_v8 = vadd.f32 0.5, %v2596_v53  ;;  %v2353_v23 = vmul.f32 0.5, %v2220_v12 }
 0x2bd   : > { %v5097_v7 = vpop.eup %5096  ;;  %v2598_v33 = vmul.f32 0.5, %v5095_v24  ;;  %5110 = vtanh.f32 %v2350_v3  ;;  %v2354_v6 = vmul.f32 0.5, %v2031_v45  ;;  %v2033_v63 = vadd.f32 %v7663_v49, %v1679_v55 }
 0x2be   : > { %v5099_v17 = vpop.eup %5098  ;;  %v2600_v60 = vmul.f32 0.5, %v5097_v7  ;;  %5112 = vtanh.f32 %v2352_v34  ;;  %v2226_v0 = vadd.f32 %v7670_v38, %v1679_v55  ;;  %v2356_v14 = vmul.f32 0.5, %v2224_v52  ;;  %v8657_v34 = vld [vmem:[#allocation8_spill] sm:$0xff] }
 0x2bf   : > { %v5101_v57 = vpop.eup %5100  ;;  %v7803_v54 = vadd.f32 0.5, %v2598_v33  ;;  %v2599_v20 = vmul.f32 0.5, %v5099_v17  ;;  %5114 = vtanh.f32 %v2351_v13  ;;  %v2717_v37 = vadd.f32 0.5, %v2589_v50 }
 0x2c0   : > { %v5103_v46 = vpop.eup %5102  ;;  %v7806_v44 = vadd.f32 0.5, %v2600_v60  ;;  %v2601_v35 = vmul.f32 0.5, %v5101_v57  ;;  %5116 = vtanh.f32 %v2353_v23  ;;  %v2355_v49 = vmul.f32 0.5, %v2033_v63 }
 0x2c1   : > { %v5105_v16 = vpop.eup %5104  ;;  %v2802_v4 = vpack.c.bf16 %v7803_v54, %v7793_v25  ;;  %v2602_v32 = vmul.f32 0.5, %v5103_v46  ;;  %v2723_v30 = vadd.f32 0.5, %v2595_v59  ;;  %v2597_v61 = vmul.f32 0.5, %v5093_v62 }
 0x2c2   : > { %v5107_v51 = vpop.eup %5106  ;;  %v2804_v27 = vpack.c.bf16 %v7806_v44, %v7800_v8  ;;  %v2604_v38 = vmul.f32 0.5, %v5105_v16  ;;  %v2727_v21 = vadd.f32 0.5, %v2599_v20  ;;  %v7812_v2 = vadd.f32 0.5, %v2601_v35  ;;  %v1694_v35 = vpop.permute.xlu1 %1693 }
 0x2c3   : > { %5118 = vtanh.f32 %v2354_v6  ;;  %v2357_v42 = vmul.f32 0.5, %v2226_v0  ;;  %v7814_v11 = vadd.f32 0.5, %v2602_v32  ;;  %v2799_v50 = vpack.c.bf16 %v7790_v19, %v7783_v10 }
 0x2c4   : > { %5120 = vtanh.f32 %v2356_v14  ;;  %v2801_v53 = vpack.c.bf16 %v2721_v15, %v2717_v37  ;;  %v2603_v55 = vmul.f32 0.5, %v5107_v51  ;;  %v2035_v22 = vadd.f32 %v7672_v1, %v1684_v28  ;;  %v8659_v51 = vld [vmem:[#allocation10_spill] sm:$0xff] }
 0x2c5   : > { %5122 = vtanh.f32 %v2355_v49  ;;  %v2228_v58 = vadd.f32 %v7680_v47, %v1684_v28  ;;  %v5109_v62 = vpop.eup %5108  ;;  %v7820_v59 = vadd.f32 0.5, %v2604_v38  ;;  %3224 = vmatprep.subr.bf16.mxu0 %v2799_v50  ;;  %v2037_v3 = vadd.f32 %v7682_v5, %v1684_v28 }
 0x2c6   : > { %3417 = vmatprep.subr.bf16.mxu1 %v2801_v53  ;;  %v2230_v12 = vadd.f32 %v7686_v31, %v1684_v28  ;;  %v2041_v45 = vadd.f32 %v7695_v18, %v1689_v26  ;;  %5124 = vtanh.f32 %v2357_v42  ;;  %v2358_v19 = vmul.f32 0.5, %v2035_v22  ;;  %3225 = vmatpush1.bf16.msra.mxu0 %v2798_v36  ;;  %v8658_v36 = vld [vmem:[#allocation9_spill] sm:$0xff]  ;;  %v8660_v28 = vld [vmem:[#allocation11_spill] sm:$0xff] }
 0x2c7   : > { %v5111_v10 = vpop.eup %5110  ;;  %v2360_v15 = vmul.f32 0.5, %v2228_v58  ;;  %3418 = vmatpush1.bf16.msra.mxu1 %v2800_v56  ;;  %v2234_v1 = vadd.f32 %v7699_v9, %v1689_v26  ;;  %v2359_v24 = vmul.f32 0.5, %v2037_v3  ;;  %v2043_v18 = vadd.f32 %v8657_v34, %v1689_v26 }
 0x2c8   : > { %v5113_v47 = vpop.eup %5112  ;;  %v2606_v5 = vmul.f32 0.5, %v5111_v10  ;;  %v2361_v31 = vmul.f32 0.5, %v2230_v12  ;;  %5126 = vtanh.f32 %v2358_v19  ;;  %v2362_v7 = vmul.f32 0.5, %v2041_v45 }
 0x2c9   : > { %v5115_v13 = vpop.eup %5114  ;;  %v2608_v52 = vmul.f32 0.5, %v5113_v47  ;;  %v2364_v33 = vmul.f32 0.5, %v2234_v1  ;;  %5128 = vtanh.f32 %v2360_v15  ;;  %v2236_v29 = vadd.f32 %v8658_v36, %v1689_v26 }
 0x2ca   : > { %v5117_v23 = vpop.eup %5116  ;;  %v2734_v41 = vadd.f32 0.5, %v2606_v5  ;;  %v2607_v48 = vmul.f32 0.5, %v5115_v13  ;;  %5130 = vtanh.f32 %v2359_v24  ;;  %v2803_v9 = vpack.c.bf16 %v2727_v21, %v2723_v30 }
 0x2cb   : > { %v2736_v40 = vadd.f32 0.5, %v2608_v52  ;;  %v2609_v56 = vmul.f32 0.5, %v5117_v23  ;;  %v2605_v17 = vmul.f32 0.5, %v5109_v62  ;;  %5132 = vtanh.f32 %v2361_v31 }
 0x2cc   : > { %v2806_v60 = vpack.c.bf16 %v2734_v41, %v7814_v11  ;;  %v2363_v6 = vmul.f32 0.5, %v2043_v18  ;;  %v2725_v57 = vadd.f32 0.5, %v2597_v61  ;;  %v2735_v0 = vadd.f32 0.5, %v2607_v48  ;;  %3226 = vmatprep.subr.bf16.mxu0 %v2803_v9 }
 0x2cd   : > { %v5119_v63 = vpop.eup %5118  ;;  %v2808_v20 = vpack.c.bf16 %v2736_v40, %v7820_v59  ;;  %v2737_v14 = vadd.f32 0.5, %v2609_v56  ;;  %5134 = vtanh.f32 %v2362_v7  ;;  %v2365_v16 = vmul.f32 0.5, %v2236_v29  ;;  %3227 = vmatpush1.bf16.msra.mxu0 %v2802_v4 }
 0x2ce   : > { %v5121_v46 = vpop.eup %5120  ;;  %v2731_v32 = vadd.f32 0.5, %v2603_v55  ;;  %5136 = vtanh.f32 %v2364_v33  ;;  %v2805_v49 = vpack.c.bf16 %v7812_v2, %v2725_v57  ;;  %v2045_v30 = vadd.f32 %v8659_v51, %v1694_v35 }
 0x2cf   : > { %v5123_v37 = vpop.eup %5122  ;;  %v2733_v61 = vadd.f32 0.5, %v2605_v17  ;;  %5138 = vtanh.f32 %v2363_v6  ;;  %v2238_v38 = vadd.f32 %v7715_v39, %v1694_v35  ;;  %v2047_v11 = vadd.f32 %v8660_v28, %v1694_v35  ;;  %v4854_v28 = vld [vmem:[%s8627_s5 + $0x20] ss:$8 sps:$4 sm:$0xff]  }
 0x2d0   : > { %v5125_v21 = vpop.eup %5124  ;;  %3419 = vmatprep.subr.bf16.mxu1 %v2805_v49  ;;  %v2366_v42 = vmul.f32 0.5, %v2045_v30  ;;  %v2240_v50 = vadd.f32 %v7721_v43, %v1694_v35  ;;  %v2807_v25 = vpack.c.bf16 %v2735_v0, %v2731_v32  ;;  %v2610_v54 = vmul.f32 0.5, %v5119_v63 }
 0x2d1   : > { %5140 = vtanh.f32 %v2365_v16  ;;  %v2368_v4 = vmul.f32 0.5, %v2238_v38  ;;  %3420 = vmatpush1.bf16.msra.mxu1 %v2804_v27  ;;  %v2809_v2 = vpack.c.bf16 %v2737_v14, %v2733_v61  ;;  %v2612_v26 = vmul.f32 0.5, %v5121_v46  ;;  %v4846_v61 = vld [vmem:[%s8627_s5] ss:$8 sps:$4 sm:$0xff]   ;;  %v4849_v38 = vld [vmem:[%s8627_s5 + $0x14] ss:$8 sps:$4 sm:$0xff]  }
 0x2d2   : > { %v5127_v53 = vpop.eup %5126  ;;  %5142 = vtanh.f32 %v2366_v42  ;;  %v2367_v39 = vmul.f32 0.5, %v2047_v11  ;;  %v2369_v55 = vmul.f32 0.5, %v2240_v50  ;;  %3228 = vmatprep.subr.bf16.mxu0 %v2807_v25  ;;  %v2611_v58 = vmul.f32 0.5, %v5123_v37  ;;  %v4852_v42 = vld [vmem:[%s8627_s5 + $0x24] ss:$8 sps:$4 sm:$0xff]  }
 0x2d3   : > { %v5129_v22 = vpop.eup %5128  ;;  %v2614_v62 = vmul.f32 0.5, %v5127_v53  ;;  %5144 = vtanh.f32 %v2368_v4  ;;  %3421 = vmatprep.subr.bf16.mxu1 %v2809_v2  ;;  %3229 = vmatpush1.bf16.msra.mxu0 %v2806_v60  ;;  %v2613_v59 = vmul.f32 0.5, %v5125_v21  ;;  %v2738_v8 = vadd.f32 0.5, %v2610_v54  ;;  %v4851_v21 = vld [vmem:[%s8627_s5 + $0x10] ss:$8 sps:$4 sm:$0xff]  }
 0x2d4   : > { %v5131_v43 = vpop.eup %5130  ;;  %v2616_v3 = vmul.f32 0.5, %v5129_v22  ;;  %5146 = vtanh.f32 %v2367_v39  ;;  %v2740_v45 = vadd.f32 0.5, %v2612_v26  ;;  %v2739_v1 = vadd.f32 0.5, %v2611_v58  ;;  %v4855_v11 = vld [vmem:[%s8627_s5 + $0x34] ss:$8 sps:$4 sm:$0xff]  }
 0x2d5   : > { %v5133_v12 = vpop.eup %5132  ;;  %v2742_v44 = vadd.f32 0.5, %v2614_v62  ;;  %v2615_v27 = vmul.f32 0.5, %v5131_v43  ;;  %5148 = vtanh.f32 %v2369_v55  ;;  %3422 = vmatpush1.bf16.msra.mxu1 %v2808_v20  ;;  %v2741_v31 = vadd.f32 0.5, %v2613_v59  ;;  %v4857_v50 = vld [vmem:[%s8627_s5 + $0x30] ss:$8 sps:$4 sm:$0xff]  }
 0x2d6   : > { %v2744_v10 = vadd.f32 0.5, %v2616_v3  ;;  %v2617_v19 = vmul.f32 0.5, %v5133_v12  ;;  %v4858_v25 = vld [vmem:[%s8627_s5 + $0x44] ss:$8 sps:$4 sm:$0xff]   ;;  %v4860_v54 = vld [vmem:[%s8627_s5 + $0x40] ss:$8 sps:$4 sm:$0xff]  }
 0x2d7   : > { %v5135_v15 = vpop.eup %5134  ;;  %v2810_v47 = vpack.c.bf16 %v2742_v44, %v2738_v8  ;;  %v2743_v5 = vadd.f32 0.5, %v2615_v27  ;;  %v4861_v4 = vld [vmem:[%s8627_s5 + $0x54] ss:$8 sps:$4 sm:$0xff]   ;;  %v4863_v2 = vld [vmem:[%s8627_s5 + $0x50] ss:$8 sps:$4 sm:$0xff]  }
 0x2d8   : > { %v5137_v24 = vpop.eup %5136  ;;  %v2812_v34 = vpack.c.bf16 %v2744_v10, %v2740_v45  ;;  %v2745_v18 = vadd.f32 0.5, %v2617_v19  ;;  %v2618_v23 = vmul.f32 0.5, %v5135_v15  ;;  %v4864_v53 = vld [vmem:[%s8627_s5 + $0x64] ss:$8 sps:$4 sm:$0xff]   ;;  %v4866_v26 = vld [vmem:[%s8627_s5 + $0x60] ss:$8 sps:$4 sm:$0xff]  }
 0x2d9   : > { %v5139_v13 = vpop.eup %5138  ;;  %v2811_v52 = vpack.c.bf16 %v2743_v5, %v2739_v1  ;;  %v2620_v48 = vmul.f32 0.5, %v5137_v24  ;;  %v4867_v39 = vld [vmem:[%s8627_s5 + $0x74] ss:$8 sps:$4 sm:$0xff]   ;;  %v4869_v55 = vld [vmem:[%s8627_s5 + $0x70] ss:$8 sps:$4 sm:$0xff]   ;;  %v2885_v5 = vpop.permute.xlu0 %2884 }
 0x2da   : > { %v2813_v7 = vpack.c.bf16 %v2745_v18, %v2741_v31  ;;  %v2619_v29 = vmul.f32 0.5, %v5139_v13  ;;  %v2746_v6 = vadd.f32 0.5, %v2618_v23  ;;  %v4870_v22 = vld [vmem:[%s8627_s5 + $0x84] ss:$8 sps:$4 sm:$0xff]   ;;  %v4872_v58 = vld [vmem:[%s8627_s5 + $0x80] ss:$8 sps:$4 sm:$0xff]   ;;  %v2890_v24 = vpop.permute.xlu1 %2889 }
 0x2db   : > { %v5141_v33 = vpop.eup %5140  ;;  %3230 = vmatprep.subr.bf16.mxu0 %v2811_v52  ;;  %v2748_v20 = vadd.f32 0.5, %v2620_v48  ;;  %v4873_v62 = vld [vmem:[%s8627_s5 + $0x94] ss:$8 sps:$4 sm:$0xff]   ;;  %v4875_v43 = vld [vmem:[%s8627_s5 + $0x90] ss:$8 sps:$4 sm:$0xff]  }
 0x2dc   : > { %v5143_v41 = vpop.eup %5142  ;;  %3423 = vmatprep.subr.bf16.mxu1 %v2813_v7  ;;  %3231 = vmatpush1.bf16.msra.mxu0 %v2810_v47  ;;  %v2621_v9 = vmul.f32 0.5, %v5141_v33  ;;  %v2747_v35 = vadd.f32 0.5, %v2619_v29  ;;  %v4876_v59 = vld [vmem:[%s8627_s5 + $0xa4] ss:$8 sps:$4 sm:$0xff]   ;;  %v4878_v3 = vld [vmem:[%s8627_s5 + $0xa0] ss:$8 sps:$4 sm:$0xff]  }
 0x2dd   : > { %v5145_v36 = vpop.eup %5144  ;;  %v2622_v40 = vmul.f32 0.5, %v5143_v41  ;;  %3424 = vmatpush1.bf16.msra.mxu1 %v2812_v34  ;;  %v4879_v12 = vld [vmem:[%s8627_s5 + $0xb4] ss:$8 sps:$4 sm:$0xff]   ;;  %v4881_v8 = vld [vmem:[%s8627_s5 + $0xb0] ss:$8 sps:$4 sm:$0xff]   ;;  %v7940_v31 = vpop.permute.xlu0 %2894 }
 0x2de   : > { %v5147_v56 = vpop.eup %5146  ;;  %v2624_v17 = vmul.f32 0.5, %v5145_v36  ;;  %v2749_v37 = vadd.f32 0.5, %v2621_v9  ;;  %v4882_v44 = vld [vmem:[%s8627_s5 + $0xc4] ss:$8 sps:$4 sm:$0xff]   ;;  %v4884_v27 = vld [vmem:[%s8627_s5 + $0xc0] ss:$8 sps:$4 sm:$0xff]   ;;  %v7942_v34 = vpop.permute.xlu1 %2899 }
 0x2df   : > { %v5149_v60 = vpop.eup %5148  ;;  %v2750_v63 = vadd.f32 0.5, %v2622_v40  ;;  %v2623_v57 = vmul.f32 0.5, %v5147_v56  ;;  %v4885_v45 = vld [vmem:[%s8627_s5 + $0xd4] ss:$8 sps:$4 sm:$0xff]   ;;  %v4887_v10 = vld [vmem:[%s8627_s5 + $0xd0] ss:$8 sps:$4 sm:$0xff]  }
 0x2e0   : > { %v2752_v0 = vadd.f32 0.5, %v2624_v17  ;;  %v2625_v46 = vmul.f32 0.5, %v5149_v60  ;;  %v4888_v19 = vld [vmem:[%s8627_s5 + $0xe4] ss:$8 sps:$4 sm:$0xff]   ;;  %v4890_v15 = vld [vmem:[%s8627_s5 + $0xe0] ss:$8 sps:$4 sm:$0xff]  }
 0x2e1   : > { %v2814_v14 = vpack.c.bf16 %v2750_v63, %v2746_v6  ;;  %v2751_v16 = vadd.f32 0.5, %v2623_v57  ;;  %v4891_v1 = vld [vmem:[%s8627_s5 + $0xf4] ss:$8 sps:$4 sm:$0xff]   ;;  %v4893_v47 = vld [vmem:[%s8627_s5 + $0xf0] ss:$8 sps:$4 sm:$0xff]   ;;  %v7944_v18 = vpop.permute.xlu0 %2904 }
 0x2e2   : > { %v2816_v32 = vpack.c.bf16 %v2752_v0, %v2748_v20  ;;  %v2753_v49 = vadd.f32 0.5, %v2625_v46  ;;  %v7946_v13 = vpop.permute.xlu1 %2909 }
 0x2e3   : > { %v2815_v51 = vpack.c.bf16 %v2751_v16, %v2747_v35 }
 0x2e4   : > { %v2817_v30 = vpack.c.bf16 %v2753_v49, %v2749_v37 }
 0x2e5   : > { %3232 = vmatprep.subr.bf16.mxu0 %v2815_v51  ;;  %v7948_v52 = vpop.permute.xlu0 %2914 }
 0x2e6   : > { %3425 = vmatprep.subr.bf16.mxu1 %v2817_v30  ;;  %3233 = vmatpush1.bf16.msra.mxu0 %v2814_v14  ;;  %v7950_v7 = vpop.permute.xlu1 %2919 }
 0x2e7   : > { %3426 = vmatpush1.bf16.msra.mxu1 %v2816_v32 }
 0x2e9   : > { %3235 = vmatmul.mubr.bf16.vlgmr.msra.gmra.mrb[64].mxu0 %v4846_v61  ;;  %v7952_v33 = vpop.permute.xlu0 %2924 }
 0x2ea   : > { %3428 = vmatmul.mubr.bf16.vlgmr.msra.gmra.mrb[64].mxu1 %v4846_v61  ;;  %3244 = vmatprep.mubr.bf16.mxu0 %v4849_v38  ;;  %v7954_v23 = vpop.permute.xlu1 %2929 }
 0x2eb   : > { %3437 = vmatprep.mubr.bf16.mxu1 %v4849_v38 }
 0x2ed   : > { %v7956_v41 = vpop.permute.xlu0 %2934 }
 0x2ee   : > { %v7958_v48 = vpop.permute.xlu1 %2939 }
 0x2f1   : > { %3245 = vmatmul.mubr.bf16.gmra.mrb[68].mxu0 %v4851_v21  ;;  %v7960_v36 = vpop.permute.xlu0 %2944 }
 0x2f2   : > { %3438 = vmatmul.mubr.bf16.gmra.mrb[68].mxu1 %v4851_v21  ;;  %3254 = vmatprep.mubr.bf16.mxu0 %v4852_v42  ;;  %v7962_v29 = vpop.permute.xlu1 %2949 }
 0x2f3   : > { %3447 = vmatprep.mubr.bf16.mxu1 %v4852_v42 }
 0x2f5   : > { %v7964_v40 = vpop.permute.xlu0 %2954 }
 0x2f6   : > { %v7966_v56 = vpop.permute.xlu1 %2959 }
 0x2f7   : > { %8661 = vst [vmem:[#allocation8_spill] sm:$0xff] %v7966_v56 }
 0x2f9   : > { %3255 = vmatmul.mubr.bf16.gmra.mrb[72].mxu0 %v4854_v28  ;;  %v7968_v9 = vpop.permute.xlu0 %2964 }
 0x2fa   : > { %3448 = vmatmul.mubr.bf16.gmra.mrb[72].mxu1 %v4854_v28  ;;  %3264 = vmatprep.mubr.bf16.mxu0 %v4855_v11  ;;  %8662 = vst [vmem:[#allocation9_spill] sm:$0xff] %v7968_v9  ;;  %v7970_v17 = vpop.permute.xlu1 %2969 }
 0x2fb   : > { %3457 = vmatprep.mubr.bf16.mxu1 %v4855_v11  ;;  %8663 = vst [vmem:[#allocation10_spill] sm:$0xff] %v7970_v17 }
 0x2fd   : > { %v7972_v60 = vpop.permute.xlu0 %2974 }
 0x2fe   : > { %8664 = vst [vmem:[#allocation11_spill] sm:$0xff] %v7972_v60  ;;  %v7974_v6 = vpop.permute.xlu1 %2979 }
 0x2ff   : > { %8665 = vst [vmem:[#allocation12_spill] sm:$0xff] %v7974_v6 }
 0x301   : > { %3265 = vmatmul.mubr.bf16.gmra.mrb[76].mxu0 %v4857_v50  ;;  %v7976_v63 = vpop.permute.xlu0 %2984 }
 0x302   : > { %3458 = vmatmul.mubr.bf16.gmra.mrb[76].mxu1 %v4857_v50  ;;  %3274 = vmatprep.mubr.bf16.mxu0 %v4858_v25  ;;  %8666 = vst [vmem:[#allocation13_spill] sm:$0xff] %v7976_v63  ;;  %v7978_v57 = vpop.permute.xlu1 %2989 }
 0x303   : > { %3467 = vmatprep.mubr.bf16.mxu1 %v4858_v25  ;;  %8667 = vst [vmem:[#allocation14_spill] sm:$0xff] %v7978_v57 }
 0x305   : > { %v7980_v20 = vpop.permute.xlu0 %2994 }
 0x306   : > { %8668 = vst [vmem:[#allocation15_spill] sm:$0xff] %v7980_v20 }
 0x309   : > { %3275 = vmatmul.mubr.bf16.gmra.mrb[80].mxu0 %v4860_v54 }
 0x30a   : > { %3468 = vmatmul.mubr.bf16.gmra.mrb[80].mxu1 %v4860_v54  ;;  %3284 = vmatprep.mubr.bf16.mxu0 %v4861_v4 }
 0x30b   : > { %3477 = vmatprep.mubr.bf16.mxu1 %v4861_v4 }
 0x311   : > { %3285 = vmatmul.mubr.bf16.gmra.mrb[84].mxu0 %v4863_v2 }
 0x312   : > { %3478 = vmatmul.mubr.bf16.gmra.mrb[84].mxu1 %v4863_v2  ;;  %3294 = vmatprep.mubr.bf16.mxu0 %v4864_v53 }
 0x313   : > { %3487 = vmatprep.mubr.bf16.mxu1 %v4864_v53 }
 0x319   : > { %3295 = vmatmul.mubr.bf16.gmra.mrb[88].mxu0 %v4866_v26 }
 0x31a   : > { %3488 = vmatmul.mubr.bf16.gmra.mrb[88].mxu1 %v4866_v26  ;;  %3304 = vmatprep.mubr.bf16.mxu0 %v4867_v39  ;;  %v7982_v26 = vpop.permute.xlu1 %2999 }
 0x31b   : > { %3497 = vmatprep.mubr.bf16.mxu1 %v4867_v39  ;;  %8669 = vst [vmem:[#allocation16_spill] sm:$0xff] %v7982_v26 }
 0x321   : > { %3305 = vmatmul.mubr.bf16.gmra.mrb[92].mxu0 %v4869_v55 }
 0x322   : > { %3498 = vmatmul.mubr.bf16.gmra.mrb[92].mxu1 %v4869_v55  ;;  %3314 = vmatprep.mubr.bf16.mxu0 %v4870_v22  ;;  %v7984_v55 = vpop.permute.xlu0 %3004 }
 0x323   : > { %3507 = vmatprep.mubr.bf16.mxu1 %v4870_v22  ;;  %8670 = vst [vmem:[#allocation17_spill] sm:$0xff] %v7984_v55 }
 0x329   : > { %3315 = vmatmul.mubr.bf16.gmra.mrb[96].mxu0 %v4872_v58 }
 0x32a   : > { %3508 = vmatmul.mubr.bf16.gmra.mrb[96].mxu1 %v4872_v58  ;;  %3324 = vmatprep.mubr.bf16.mxu0 %v4873_v62 }
 0x32b   : > { %3517 = vmatprep.mubr.bf16.mxu1 %v4873_v62 }
 0x331   : > { %3325 = vmatmul.mubr.bf16.gmra.mrb[100].mxu0 %v4875_v43 }
 0x332   : > { %3518 = vmatmul.mubr.bf16.gmra.mrb[100].mxu1 %v4875_v43  ;;  %3334 = vmatprep.mubr.bf16.mxu0 %v4876_v59 }
 0x333   : > { %3527 = vmatprep.mubr.bf16.mxu1 %v4876_v59 }
 0x339   : > { %3335 = vmatmul.mubr.bf16.gmra.mrb[104].mxu0 %v4878_v3 }
 0x33a   : > { %3528 = vmatmul.mubr.bf16.gmra.mrb[104].mxu1 %v4878_v3  ;;  %3344 = vmatprep.mubr.bf16.mxu0 %v4879_v12 }
 0x33b   : > { %3537 = vmatprep.mubr.bf16.mxu1 %v4879_v12 }
 0x341   : > { %3345 = vmatmul.mubr.bf16.gmra.mrb[108].mxu0 %v4881_v8 }
 0x342   : > { %3538 = vmatmul.mubr.bf16.gmra.mrb[108].mxu1 %v4881_v8  ;;  %3354 = vmatprep.mubr.bf16.mxu0 %v4882_v44 }
 0x343   : > { %3547 = vmatprep.mubr.bf16.mxu1 %v4882_v44 }
 0x349   : > { %3355 = vmatmul.mubr.bf16.gmra.mrb[112].mxu0 %v4884_v27 }
 0x34a   : > { %3548 = vmatmul.mubr.bf16.gmra.mrb[112].mxu1 %v4884_v27  ;;  %3364 = vmatprep.mubr.bf16.mxu0 %v4885_v45 }
 0x34b   : > { %3557 = vmatprep.mubr.bf16.mxu1 %v4885_v45 }
 0x351   : > { %3365 = vmatmul.mubr.bf16.gmra.mrb[116].mxu0 %v4887_v10 }
 0x352   : > { %3558 = vmatmul.mubr.bf16.gmra.mrb[116].mxu1 %v4887_v10  ;;  %3374 = vmatprep.mubr.bf16.mxu0 %v4888_v19 }
 0x353   : > { %3567 = vmatprep.mubr.bf16.mxu1 %v4888_v19 }
 0x359   : > { %3375 = vmatmul.mubr.bf16.gmra.mrb[120].mxu0 %v4890_v15 }
 0x35a   : > { %3568 = vmatmul.mubr.bf16.gmra.mrb[120].mxu1 %v4890_v15  ;;  %3384 = vmatprep.mubr.bf16.mxu0 %v4891_v1 }
 0x35b   : > { %3577 = vmatprep.mubr.bf16.mxu1 %v4891_v1 }
 0x361   : > { %3385 = vmatmul.mubr.bf16.gmra.mrb[124].mxu0 %v4893_v47 }
 0x362   : > { %3578 = vmatmul.mubr.bf16.gmra.mrb[124].mxu1 %v4893_v47 }
 0x3bc   : > { %v3236_v0 = vpop.f32.mrb[64].mxu0 }
 0x3bd   : > { %v3237_v46 = vadd.f32 %v3236_v0, %v2885_v5  ;;  %v3429_v35 = vpop.f32.mrb[64].mxu1  ;;  %v3238_v14 = vpop.f32.mrb[65].mxu0 }
 0x3be   : > { %v3430_v16 = vadd.f32 %v3429_v35, %v2885_v5  ;;  %v3239_v37 = vadd.f32 %v3238_v14, %v2885_v5  ;;  %v3431_v32 = vpop.f32.mrb[65].mxu1  ;;  %v3240_v49 = vpop.f32.mrb[66].mxu0 }
 0x3bf   : > { %v3588_v51 = vmul.f32 0.5, %v3237_v46  ;;  %v3432_v30 = vadd.f32 %v3431_v32, %v2885_v5  ;;  %v3241_v61 = vadd.f32 %v3240_v49, %v2890_v24  ;;  %v3433_v38 = vpop.f32.mrb[66].mxu1  ;;  %v3242_v21 = vpop.f32.mrb[67].mxu0 }
 0x3c0   : > { %v3590_v42 = vmul.f32 0.5, %v3430_v16  ;;  %v3589_v28 = vmul.f32 0.5, %v3239_v37  ;;  %v3434_v11 = vadd.f32 %v3433_v38, %v2890_v24  ;;  %v3243_v50 = vadd.f32 %v3242_v21, %v2890_v24  ;;  %v3435_v25 = vpop.f32.mrb[67].mxu1  ;;  %v7994_v37 = vpop.permute.xlu1 %3009 }
 0x3c1   : > { %5150 = vtanh.f32 %v3588_v51  ;;  %v3591_v54 = vmul.f32 0.5, %v3432_v30  ;;  %v3592_v4 = vmul.f32 0.5, %v3241_v61  ;;  %v3436_v2 = vadd.f32 %v3435_v25, %v2890_v24  ;;  %8671 = vst [vmem:[#allocation18_spill] sm:$0xff] %v7994_v37  ;;  %v4135_v51 = vpop.permute.xlu0 %4134 }
 0x3c2   : > { %5152 = vtanh.f32 %v3590_v42  ;;  %v3594_v53 = vmul.f32 0.5, %v3434_v11  ;;  %v3593_v39 = vmul.f32 0.5, %v3243_v50 }
 0x3c3   : > { %5154 = vtanh.f32 %v3589_v28  ;;  %v3595_v22 = vmul.f32 0.5, %v3436_v2 }
 0x3c4   : > { %5156 = vtanh.f32 %v3591_v54  ;;  %v3246_v58 = vpop.f32.mrb[68].mxu0 }
 0x3c5   : > { %5158 = vtanh.f32 %v3592_v4  ;;  %v3247_v62 = vadd.f32 %v3246_v58, %v7940_v31  ;;  %v3439_v43 = vpop.f32.mrb[68].mxu1  ;;  %v3248_v59 = vpop.f32.mrb[69].mxu0 }
 0x3c6   : > { %5160 = vtanh.f32 %v3594_v53  ;;  %v3440_v3 = vadd.f32 %v3439_v43, %v7940_v31  ;;  %v3249_v12 = vadd.f32 %v3248_v59, %v7940_v31  ;;  %v3441_v8 = vpop.f32.mrb[69].mxu1  ;;  %v3250_v44 = vpop.f32.mrb[70].mxu0 }
 0x3c7   : > { %5162 = vtanh.f32 %v3593_v39  ;;  %v3596_v27 = vmul.f32 0.5, %v3247_v62  ;;  %v3442_v45 = vadd.f32 %v3441_v8, %v7940_v31  ;;  %v3251_v10 = vadd.f32 %v3250_v44, %v7942_v34  ;;  %v3443_v19 = vpop.f32.mrb[70].mxu1  ;;  %v3252_v15 = vpop.f32.mrb[71].mxu0 }
 0x3c8   : > { %5164 = vtanh.f32 %v3595_v22  ;;  %v3598_v1 = vmul.f32 0.5, %v3440_v3  ;;  %v3597_v47 = vmul.f32 0.5, %v3249_v12  ;;  %v3444_v5 = vadd.f32 %v3443_v19, %v7942_v34  ;;  %v3445_v24 = vpop.f32.mrb[71].mxu1 }
 0x3c9   : > { %5166 = vtanh.f32 %v3596_v27  ;;  %v3599_v0 = vmul.f32 0.5, %v3442_v45  ;;  %v3600_v46 = vmul.f32 0.5, %v3251_v10  ;;  %v3253_v35 = vadd.f32 %v3252_v15, %v7942_v34 }
 0x3ca   : > { %5168 = vtanh.f32 %v3598_v1  ;;  %v3602_v14 = vmul.f32 0.5, %v3444_v5  ;;  %v3446_v16 = vadd.f32 %v3445_v24, %v7942_v34 }
 0x3cb   : > { %v5151_v31 = vpop.eup %5150  ;;  %5170 = vtanh.f32 %v3597_v47  ;;  %v3601_v32 = vmul.f32 0.5, %v3253_v35  ;;  %v4140_v35 = vpop.permute.xlu1 %4139 }
 0x3cc   : > { %v5153_v49 = vpop.eup %5152  ;;  %v3844_v30 = vmul.f32 0.5, %v5151_v31  ;;  %5172 = vtanh.f32 %v3599_v0  ;;  %v3603_v61 = vmul.f32 0.5, %v3446_v16  ;;  %v3256_v38 = vpop.f32.mrb[72].mxu0 }
 0x3cd   : > { %v5155_v21 = vpop.eup %5154  ;;  %v3846_v42 = vmul.f32 0.5, %v5153_v49  ;;  %5174 = vtanh.f32 %v3600_v46  ;;  %v3257_v28 = vadd.f32 %v3256_v38, %v7944_v18  ;;  %v3449_v11 = vpop.f32.mrb[72].mxu1 }
 0x3ce   : > { %v3258_v50 = vpop.f32.mrb[73].mxu0  ;;  %v5157_v25 = vpop.eup %5156  ;;  %v3972_v34 = vadd.f32 0.5, %v3844_v30  ;;  %v3845_v54 = vmul.f32 0.5, %v5155_v21  ;;  %5176 = vtanh.f32 %v3602_v14  ;;  %v3450_v4 = vadd.f32 %v3449_v11, %v7944_v18 }
 0x3cf   : > { %v7998_v2 = vpop.f32.mrb[73].mxu1  ;;  %v8000_v53 = vpop.f32.mrb[74].mxu0  ;;  %v3974_v22 = vadd.f32 0.5, %v3846_v42  ;;  %v3847_v58 = vmul.f32 0.5, %v5157_v25  ;;  %5178 = vtanh.f32 %v3601_v32  ;;  %v3604_v62 = vmul.f32 0.5, %v3257_v28 }
 0x3d0   : > { %v5159_v39 = vpop.eup %5158  ;;  %v8002_v43 = vpop.f32.mrb[74].mxu1  ;;  %v4292_v12 = vmul.f32 %v4135_v51, %v3972_v34  ;;  %v3973_v8 = vadd.f32 0.5, %v3845_v54  ;;  %5180 = vtanh.f32 %v3603_v61  ;;  %v3606_v0 = vmul.f32 0.5, %v3450_v4 }
 0x3d1   : > { %v8004_v59 = vpop.f32.mrb[75].mxu0  ;;  %v5161_v3 = vpop.eup %5160  ;;  %v3848_v44 = vmul.f32 0.5, %v5159_v39  ;;  %v4294_v10 = vmul.f32 %v4135_v51, %v3974_v22  ;;  %v3975_v19 = vadd.f32 0.5, %v3847_v58  ;;  %5182 = vtanh.f32 %v3604_v62 }
 0x3d2   : > { %v8006_v27 = vpop.f32.mrb[75].mxu1  ;;  %v5163_v45 = vpop.eup %5162  ;;  %v3850_v15 = vmul.f32 0.5, %v5161_v3  ;;  %v4293_v47 = vmul.f32 %v4135_v51, %v3973_v8  ;;  %v3259_v32 = vadd.f32 %v3258_v50, %v7944_v18  ;;  %5184 = vtanh.f32 %v3606_v0 }
 0x3d3   : > { %v5165_v1 = vpop.eup %5164  ;;  %v3976_v5 = vadd.f32 0.5, %v3848_v44  ;;  %v3849_v24 = vmul.f32 0.5, %v5163_v45  ;;  %v4295_v14 = vmul.f32 %v4135_v51, %v3975_v19  ;;  %v4145_v30 = vpop.permute.xlu0 %4144 }
 0x3d4   : > { %v5167_v46 = vpop.eup %5166  ;;  %v3978_v16 = vadd.f32 0.5, %v3850_v15  ;;  %v3851_v31 = vmul.f32 0.5, %v5165_v1  ;;  %v8009_v42 = vpop.f32.mrb[76].mxu0  ;;  %v3605_v54 = vmul.f32 0.5, %v3259_v32 }
 0x3d5   : > { %v5169_v49 = vpop.eup %5168  ;;  %v4296_v61 = vmul.f32 %v4140_v35, %v3976_v5  ;;  %v3977_v38 = vadd.f32 0.5, %v3849_v24  ;;  %v3852_v21 = vmul.f32 0.5, %v5167_v46  ;;  %v8011_v4 = vpop.f32.mrb[76].mxu1 }
 0x3d6   : > { %v5171_v28 = vpop.eup %5170  ;;  %v4298_v11 = vmul.f32 %v4140_v35, %v3978_v16  ;;  %v3979_v25 = vadd.f32 0.5, %v3851_v31  ;;  %v3854_v34 = vmul.f32 0.5, %v5169_v49  ;;  %v8013_v51 = vpop.f32.mrb[77].mxu0  ;;  %5186 = vtanh.f32 %v3605_v54 }
 0x3d7   : > { %v5173_v39 = vpop.eup %5172  ;;  %v4420_v22 = vadd.f32 %v4296_v61, %v4292_v12  ;;  %v4297_v50 = vmul.f32 %v4140_v35, %v3977_v38  ;;  %v3980_v58 = vadd.f32 0.5, %v3852_v21  ;;  %v3853_v62 = vmul.f32 0.5, %v5171_v28  ;;  %v8015_v3 = vpop.f32.mrb[77].mxu1 }
 0x3d8   : > { %v8017_v8 = vpop.f32.mrb[78].mxu0  ;;  %v5175_v44 = vpop.eup %5174  ;;  %v4494_v45 = vadd.f32 %v4298_v11, %v4294_v10  ;;  %v4299_v19 = vmul.f32 %v4140_v35, %v3979_v25  ;;  %v3982_v15 = vadd.f32 0.5, %v3854_v34  ;;  %v3855_v1 = vmul.f32 0.5, %v5173_v39 }
 0x3d9   : > { %v8019_v5 = vpop.f32.mrb[78].mxu1  ;;  %v8021_v24 = vpop.f32.mrb[79].mxu0  ;;  %v4457_v46 = vadd.f32 %v4297_v50, %v4293_v47  ;;  %v4300_v16 = vmul.f32 %v4145_v30, %v3980_v58  ;;  %v3981_v12 = vadd.f32 0.5, %v3853_v62  ;;  %v3856_v31 = vmul.f32 0.5, %v5175_v44 }
 0x3da   : > { %v5177_v0 = vpop.eup %5176  ;;  %v8023_v32 = vpop.f32.mrb[79].mxu1  ;;  %v4531_v61 = vadd.f32 %v4299_v19, %v4295_v14  ;;  %v4302_v38 = vmul.f32 %v4145_v30, %v3982_v15  ;;  %v3983_v21 = vadd.f32 0.5, %v3855_v1  ;;  %v3261_v54 = vadd.f32 %v8000_v53, %v7946_v13 }
 0x3db   : > { %v5179_v49 = vpop.eup %5178  ;;  %v3858_v28 = vmul.f32 0.5, %v5177_v0  ;;  %v4421_v35 = vadd.f32 %v4420_v22, %v4300_v16  ;;  %v4301_v11 = vmul.f32 %v4145_v30, %v3981_v12  ;;  %v3984_v25 = vadd.f32 0.5, %v3856_v31  ;;  %v4150_v37 = vpop.permute.xlu1 %4149 }
 0x3dc   : > { %v5181_v10 = vpop.eup %5180  ;;  %v3857_v34 = vmul.f32 0.5, %v5179_v49  ;;  %v4495_v55 = vadd.f32 %v4494_v45, %v4302_v38  ;;  %v4303_v26 = vmul.f32 %v4145_v30, %v3983_v21  ;;  %v8025_v58 = vpop.permute.xlu0 %4154  ;;  %v3263_v53 = vadd.f32 %v8004_v59, %v7946_v13 }
 0x3dd   : > { %v5183_v39 = vpop.eup %5182  ;;  %v3986_v47 = vadd.f32 0.5, %v3858_v28  ;;  %v3859_v50 = vmul.f32 0.5, %v5181_v10  ;;  %v4458_v62 = vadd.f32 %v4457_v46, %v4301_v11  ;;  %v4304_v44 = vmul.f32 %v4150_v37, %v3984_v25  ;;  %v8027_v19 = vpop.f32.mrb[80].mxu0 }
 0x3de   : > { %v3985_v20 = vadd.f32 0.5, %v3857_v34  ;;  %v3860_v14 = vmul.f32 0.5, %v5183_v39  ;;  %v4532_v15 = vadd.f32 %v4531_v61, %v4303_v26  ;;  %v8029_v0 = vpop.f32.mrb[80].mxu1  ;;  %v8031_v16 = vpop.f32.mrb[81].mxu0  ;;  %v3452_v46 = vadd.f32 %v7998_v2, %v7944_v18 }
 0x3df   : > { %v4306_v1 = vmul.f32 %v4150_v37, %v3986_v47  ;;  %v3987_v22 = vadd.f32 0.5, %v3859_v50  ;;  %v5185_v45 = vpop.eup %5184  ;;  %v4422_v30 = vadd.f32 %v4421_v35, %v4304_v44  ;;  %v8035_v49 = vpop.f32.mrb[81].mxu1  ;;  %v3454_v18 = vadd.f32 %v8002_v43, %v7946_v13 }
 0x3e0   : > { %v4305_v12 = vmul.f32 %v4150_v37, %v3985_v20  ;;  %v3988_v31 = vadd.f32 0.5, %v3860_v14  ;;  %v8037_v38 = vpop.f32.mrb[82].mxu0  ;;  %v3862_v61 = vmul.f32 0.5, %v5185_v45  ;;  %v8041_v28 = vpop.f32.mrb[82].mxu1  ;;  %v3607_v11 = vmul.f32 0.5, %v3452_v46 }
 0x3e1   : > { %v4496_v21 = vadd.f32 %v4495_v55, %v4306_v1  ;;  %v4307_v26 = vmul.f32 %v4150_v37, %v3987_v22  ;;  %v8043_v10 = vpop.f32.mrb[83].mxu0  ;;  %v8050_v2 = vpop.f32.mrb[83].mxu1  ;;  %v3608_v25 = vmul.f32 0.5, %v3261_v54  ;;  %v3610_v39 = vmul.f32 0.5, %v3454_v18 }
 0x3e2   : > { %v8045_v35 = vadd.f32 %v4458_v62, %v4305_v12  ;;  %v4308_v20 = vmul.f32 %v8025_v58, %v3988_v31  ;;  %v3990_v37 = vadd.f32 0.5, %v3862_v61  ;;  %5188 = vtanh.f32 %v3607_v11  ;;  %v5187_v31 = vpop.eup %5186 }
 0x3e3   : > { %v8052_v55 = vadd.f32 %v4532_v15, %v4307_v26  ;;  %v3456_v47 = vadd.f32 %v8006_v27, %v7946_v13  ;;  %5190 = vtanh.f32 %v3608_v25  ;;  %v3609_v43 = vmul.f32 0.5, %v3263_v53 }
 0x3e4   : > { %v8056_v34 = vadd.f32 %v4422_v30, %v4308_v20  ;;  %v4310_v50 = vmul.f32 %v8025_v58, %v3990_v37  ;;  %v3267_v62 = vadd.f32 %v8009_v42, %v7948_v52  ;;  %5192 = vtanh.f32 %v3610_v39  ;;  %v8067_v15 = vpop.f32.mrb[84].mxu0 }
 0x3e5   : > { %v3611_v44 = vmul.f32 0.5, %v3456_v47  ;;  %v3460_v14 = vadd.f32 %v8011_v4, %v7948_v52  ;;  %v3269_v59 = vadd.f32 %v8013_v51, %v7948_v52  ;;  %5194 = vtanh.f32 %v3609_v43  ;;  %v8073_v22 = vpop.f32.mrb[84].mxu1  ;;  %v8075_v42 = vpop.f32.mrb[85].mxu0 }
 0x3e6   : > { %v8069_v1 = vadd.f32 %v4496_v21, %v4310_v50  ;;  %v3612_v13 = vmul.f32 0.5, %v3267_v62  ;;  %v3462_v27 = vadd.f32 %v8015_v3, %v7948_v52  ;;  %v3271_v4 = vadd.f32 %v8017_v8, %v7950_v7  ;;  %v8079_v51 = vpop.f32.mrb[85].mxu1  ;;  %v8081_v12 = vpop.f32.mrb[86].mxu0 }
 0x3e7   : > { %5196 = vtanh.f32 %v3611_v44  ;;  %v3614_v45 = vmul.f32 0.5, %v3460_v14  ;;  %v3613_v30 = vmul.f32 0.5, %v3269_v59  ;;  %v3464_v52 = vadd.f32 %v8019_v5, %v7950_v7  ;;  %v8087_v21 = vpop.f32.mrb[86].mxu1  ;;  %v8089_v26 = vpop.f32.mrb[87].mxu0 }
 0x3e8   : > { %5198 = vtanh.f32 %v3612_v13  ;;  %v3615_v46 = vmul.f32 0.5, %v3462_v27  ;;  %v3273_v3 = vadd.f32 %v8021_v24, %v7950_v7  ;;  %v3861_v61 = vmul.f32 0.5, %v5187_v31  ;;  %v8093_v20 = vpop.f32.mrb[87].mxu1 }
 0x3e9   : > { %5200 = vtanh.f32 %v3614_v45  ;;  %v3616_v8 = vmul.f32 0.5, %v3271_v4  ;;  %v3466_v54 = vadd.f32 %v8023_v32, %v7950_v7  ;;  %v3618_v11 = vmul.f32 0.5, %v3464_v52 }
 0x3ea   : > { %5202 = vtanh.f32 %v3613_v30  ;;  %v3617_v18 = vmul.f32 0.5, %v3273_v3  ;;  %v3277_v5 = vadd.f32 %v8027_v19, %v7952_v33  ;;  %v3989_v37 = vadd.f32 0.5, %v3861_v61 }
 0x3eb   : > { %5204 = vtanh.f32 %v3615_v46  ;;  %v3619_v24 = vmul.f32 0.5, %v3466_v54  ;;  %v3470_v25 = vadd.f32 %v8029_v0, %v7952_v33  ;;  %v3279_v39 = vadd.f32 %v8031_v16, %v7952_v33 }
 0x3ec   : > { %5206 = vtanh.f32 %v3616_v8  ;;  %v3620_v53 = vmul.f32 0.5, %v3277_v5  ;;  %v3472_v7 = vadd.f32 %v8035_v49, %v7952_v33  ;;  %v5189_v32 = vpop.eup %5188  ;;  %v4309_v47 = vmul.f32 %v8025_v58, %v3989_v37  ;;  %v8106_v43 = vpop.f32.mrb[88].mxu0 }
 0x3ed   : > { %5208 = vtanh.f32 %v3618_v11  ;;  %v3622_v50 = vmul.f32 0.5, %v3470_v25  ;;  %v3281_v19 = vadd.f32 %v8037_v38, %v7954_v23  ;;  %v5191_v62 = vpop.eup %5190  ;;  %v3863_v0 = vmul.f32 0.5, %v5189_v32  ;;  %v8108_v59 = vpop.f32.mrb[88].mxu1 }
 0x3ee   : > { %5210 = vtanh.f32 %v3617_v18  ;;  %v3621_v44 = vmul.f32 0.5, %v3279_v39  ;;  %v3623_v14 = vmul.f32 0.5, %v3472_v7  ;;  %v8110_v16 = vpop.f32.mrb[89].mxu0  ;;  %v5193_v33 = vpop.eup %5192  ;;  %v4460_v49 = vadd.f32 %v8045_v35, %v4309_v47 }
 0x3ef   : > { %v3864_v13 = vmul.f32 0.5, %v5191_v62  ;;  %5212 = vtanh.f32 %v3619_v24  ;;  %v8113_v27 = vmul.f32 0.5, %v3281_v19  ;;  %v8115_v45 = vpop.f32.mrb[89].mxu1  ;;  %v8117_v38 = vpop.f32.mrb[90].mxu0  ;;  %v3991_v4 = vadd.f32 0.5, %v3863_v0 }
 0x3f0   : > { %v5195_v30 = vpop.eup %5194  ;;  %v3866_v31 = vmul.f32 0.5, %v5193_v33  ;;  %5214 = vtanh.f32 %v3620_v53  ;;  %v8121_v46 = vadd.f32 %v8041_v28, %v7954_v23  ;;  %v8123_v52 = vpop.f32.mrb[90].mxu1  ;;  %v8129_v54 = vadd.f32 %v8043_v10, %v7954_v23 }
 0x3f1   : > { %v8125_v3 = vpop.f32.mrb[91].mxu0  ;;  %v5197_v35 = vpop.eup %5196  ;;  %v3992_v61 = vadd.f32 0.5, %v3864_v13  ;;  %v3865_v8 = vmul.f32 0.5, %v5195_v30  ;;  %5216 = vtanh.f32 %v3622_v50  ;;  %v4311_v37 = vmul.f32 %v8025_v58, %v3991_v4 }
 0x3f2   : > { %v8131_v11 = vpop.f32.mrb[91].mxu1  ;;  %v5199_v18 = vpop.eup %5198  ;;  %v3994_v28 = vadd.f32 0.5, %v3866_v31  ;;  %v3867_v24 = vmul.f32 0.5, %v5197_v35  ;;  %5218 = vtanh.f32 %v3621_v44 }
 0x3f3   : > { %v4160_v5 = vpop.permute.xlu1 %4159  ;;  %v5201_v25 = vpop.eup %5200  ;;  %v3993_v39 = vadd.f32 0.5, %v3865_v8  ;;  %v3868_v7 = vmul.f32 0.5, %v5199_v18  ;;  %5220 = vtanh.f32 %v3623_v14  ;;  %v4534_v47 = vadd.f32 %v8052_v55, %v4311_v37 }
 0x3f4   : > { %v4312_v53 = vmul.f32 %v4160_v5, %v3992_v61  ;;  %v5203_v32 = vpop.eup %5202  ;;  %v4314_v50 = vmul.f32 %v4160_v5, %v3994_v28  ;;  %v3995_v10 = vadd.f32 0.5, %v3867_v24  ;;  %v3870_v19 = vmul.f32 0.5, %v5201_v25  ;;  %v4165_v0 = vpop.permute.xlu0 %4164 }
 0x3f5   : > { %v5205_v62 = vpop.eup %5204  ;;  %v4313_v13 = vmul.f32 %v4160_v5, %v3993_v39  ;;  %v3996_v58 = vadd.f32 0.5, %v3868_v7  ;;  %v3869_v30 = vmul.f32 0.5, %v5203_v32  ;;  %v8136_v4 = vpop.f32.mrb[92].mxu0  ;;  %5222 = vtanh.f32 %v8113_v27 }
 0x3f6   : > { %v4424_v33 = vadd.f32 %v8056_v34, %v4312_v53  ;;  %v5207_v44 = vpop.eup %5206  ;;  %v4498_v31 = vadd.f32 %v8069_v1, %v4314_v50  ;;  %v4315_v35 = vmul.f32 %v4160_v5, %v3995_v10  ;;  %v3998_v14 = vadd.f32 0.5, %v3870_v19  ;;  %v8139_v8 = vpop.f32.mrb[92].mxu1 }
 0x3f7   : > { %v3871_v61 = vmul.f32 0.5, %v5205_v62  ;;  %v8141_v55 = vpop.f32.mrb[93].mxu0  ;;  %v5209_v18 = vpop.eup %5208  ;;  %v4461_v37 = vadd.f32 %v4460_v49, %v4313_v13  ;;  %v4316_v28 = vmul.f32 %v4165_v0, %v3996_v58  ;;  %v3997_v24 = vadd.f32 0.5, %v3869_v30 }
 0x3f8   : > { %v3872_v34 = vmul.f32 0.5, %v5207_v44  ;;  %v8143_v25 = vpop.f32.mrb[93].mxu1  ;;  %v8145_v53 = vpop.f32.mrb[94].mxu0  ;;  %v4535_v7 = vadd.f32 %v4534_v47, %v4315_v35  ;;  %v4318_v32 = vmul.f32 %v4165_v0, %v3998_v14  ;;  %v3874_v5 = vmul.f32 0.5, %v5209_v18 }
 0x3f9   : > { %8672 = vst [vmem:[#allocation19_spill] sm:$0xff] %v8145_v53  ;;  %v5211_v39 = vpop.eup %5210  ;;  %v3999_v1 = vadd.f32 0.5, %v3871_v61  ;;  %v8147_v50 = vpop.f32.mrb[94].mxu1  ;;  %v4425_v62 = vadd.f32 %v4424_v33, %v4316_v28  ;;  %v4317_v57 = vmul.f32 %v4165_v0, %v3997_v24  ;;  %v3476_v27 = vadd.f32 %v8050_v2, %v7954_v23 }
 0x3fa   : > { %8673 = vst [vmem:[#allocation20_spill] sm:$0xff] %v8147_v50  ;;  %v8149_v10 = vpop.f32.mrb[95].mxu0  ;;  %v5213_v19 = vpop.eup %5212  ;;  %v4000_v49 = vadd.f32 0.5, %v3872_v34  ;;  %v3873_v13 = vmul.f32 0.5, %v5211_v39  ;;  %v4499_v63 = vadd.f32 %v4498_v31, %v4318_v32  ;;  %v4002_v60 = vadd.f32 0.5, %v3874_v5 }
 0x3fb   : > { %8674 = vst [vmem:[#allocation21_spill] sm:$0xff] %v8149_v10  ;;  %v8151_v58 = vpop.f32.mrb[95].mxu1  ;;  %v5215_v30 = vpop.eup %5214  ;;  %v4319_v6 = vmul.f32 %v4165_v0, %v3999_v1  ;;  %v3875_v47 = vmul.f32 0.5, %v5213_v19  ;;  %v4462_v14 = vadd.f32 %v4461_v37, %v4317_v57  ;;  %v3289_v23 = vadd.f32 %v8075_v42, %v7956_v41 }
 0x3fc   : > { %8675 = vst [vmem:[#allocation22_spill] sm:$0xff] %v8151_v58  ;;  %v4170_v44 = vpop.permute.xlu1 %4169  ;;  %v5217_v35 = vpop.eup %5216  ;;  %v4001_v18 = vadd.f32 0.5, %v3873_v13  ;;  %v3876_v17 = vmul.f32 0.5, %v5215_v30  ;;  %v3482_v2 = vadd.f32 %v8079_v51, %v7956_v41 }
 0x3fd   : > { %v4320_v61 = vmul.f32 %v4170_v44, %v4000_v49  ;;  %v5219_v9 = vpop.eup %5218  ;;  %v4536_v10 = vadd.f32 %v4535_v7, %v4319_v6  ;;  %v4322_v50 = vmul.f32 %v4170_v44, %v4002_v60  ;;  %v4003_v33 = vadd.f32 0.5, %v3875_v47  ;;  %v4175_v34 = vpop.permute.xlu0 %4174 }
 0x3fe   : > { %v3878_v28 = vmul.f32 0.5, %v5217_v35  ;;  %v5221_v24 = vpop.eup %5220  ;;  %v4321_v58 = vmul.f32 %v4170_v44, %v4001_v18  ;;  %v4004_v53 = vadd.f32 0.5, %v3876_v17  ;;  %v3877_v56 = vmul.f32 0.5, %v5219_v9  ;;  %v8153_v31 = vpop.f32.mrb[96].mxu0 }
 0x3ff   : > { %v4426_v39 = vadd.f32 %v4425_v62, %v4320_v61  ;;  %v4500_v0 = vadd.f32 %v4499_v63, %v4322_v50  ;;  %v4323_v32 = vmul.f32 %v4170_v44, %v4003_v33  ;;  %v3879_v57 = vmul.f32 0.5, %v5221_v24  ;;  %v8155_v37 = vpop.f32.mrb[96].mxu1  ;;  %v8157_v5 = vpop.f32.mrb[97].mxu0 }
 0x400   : > { %v4006_v1 = vadd.f32 0.5, %v3878_v28  ;;  %v4463_v6 = vadd.f32 %v4462_v14, %v4321_v58  ;;  %v4324_v60 = vmul.f32 %v4175_v34, %v4004_v53  ;;  %v4005_v7 = vadd.f32 0.5, %v3877_v56  ;;  %v8160_v19 = vpop.f32.mrb[97].mxu1  ;;  %v8162_v62 = vpop.f32.mrb[98].mxu0 }
 0x401   : > { %v4537_v9 = vadd.f32 %v4536_v10, %v4323_v32  ;;  %v4007_v49 = vadd.f32 0.5, %v3879_v57  ;;  %v3626_v63 = vmul.f32 0.5, %v8121_v46  ;;  %v8165_v50 = vpop.f32.mrb[98].mxu1  ;;  %v8167_v13 = vpop.f32.mrb[99].mxu0  ;;  %v3625_v56 = vmul.f32 0.5, %v8129_v54 }
 0x402   : > { %v4326_v17 = vmul.f32 %v4175_v34, %v4006_v1  ;;  %v8169_v30 = vadd.f32 %v4426_v39, %v4324_v60  ;;  %v4325_v58 = vmul.f32 %v4175_v34, %v4005_v7  ;;  %v8174_v53 = vpop.f32.mrb[99].mxu1  ;;  %v3287_v46 = vadd.f32 %v8067_v15, %v7956_v41  ;;  %v5223_v60 = vpop.eup %5222 }
 0x403   : > { %v4327_v10 = vmul.f32 %v4175_v34, %v4007_v49  ;;  %5224 = vtanh.f32 %v3626_v63  ;;  %v3627_v35 = vmul.f32 0.5, %v3476_v27  ;;  %v3480_v14 = vadd.f32 %v8073_v22, %v7956_v41 }
 0x404   : > { %v8176_v44 = vadd.f32 %v4500_v0, %v4326_v17  ;;  %v8180_v47 = vadd.f32 %v4463_v6, %v4325_v58  ;;  %5226 = vtanh.f32 %v3625_v56  ;;  %v3628_v61 = vmul.f32 0.5, %v3287_v46  ;;  %v8194_v28 = vpop.f32.mrb[100].mxu0 }
 0x405   : > { %v8184_v54 = vadd.f32 %v4537_v9, %v4327_v10  ;;  %5228 = vtanh.f32 %v3627_v35  ;;  %v3630_v18 = vmul.f32 0.5, %v3480_v14  ;;  %v3291_v15 = vadd.f32 %v8081_v12, %v7958_v48  ;;  %v8198_v42 = vpop.f32.mrb[100].mxu1  ;;  %v8200_v39 = vpop.f32.mrb[101].mxu0 }
 0x406   : > { %v3484_v33 = vadd.f32 %v8087_v21, %v7958_v48  ;;  %5230 = vtanh.f32 %v3628_v61  ;;  %v3629_v22 = vmul.f32 0.5, %v3289_v23  ;;  %v3631_v24 = vmul.f32 0.5, %v3482_v2  ;;  %v8204_v0 = vpop.f32.mrb[101].mxu1  ;;  %v8206_v21 = vpop.f32.mrb[102].mxu0 }
 0x407   : > { %v3293_v34 = vadd.f32 %v8089_v26, %v7958_v48  ;;  %5232 = vtanh.f32 %v3630_v18  ;;  %v3632_v41 = vmul.f32 0.5, %v3291_v15  ;;  %v3486_v12 = vadd.f32 %v8093_v20, %v7958_v48  ;;  %v8212_v57 = vpop.f32.mrb[102].mxu1  ;;  %v8214_v6 = vpop.f32.mrb[103].mxu0 }
 0x408   : > { %v3634_v51 = vmul.f32 0.5, %v3484_v33  ;;  %5234 = vtanh.f32 %v3629_v22  ;;  %v3297_v1 = vadd.f32 %v8106_v43, %v7960_v36  ;;  %v3490_v26 = vadd.f32 %v8108_v59, %v7960_v36  ;;  %v8220_v9 = vpop.f32.mrb[103].mxu1  ;;  %v4180_v10 = vpop.permute.xlu1 %4179 }
 0x409   : > { %v3633_v32 = vmul.f32 0.5, %v3293_v34  ;;  %5236 = vtanh.f32 %v3631_v24  ;;  %v3635_v7 = vmul.f32 0.5, %v3486_v12  ;;  %v3299_v48 = vadd.f32 %v8110_v16, %v7960_v36 }
 0x40a   : > { %v3492_v20 = vadd.f32 %v8115_v45, %v7960_v36  ;;  %v3880_v17 = vmul.f32 0.5, %v5223_v60  ;;  %5238 = vtanh.f32 %v3632_v41  ;;  %v3636_v43 = vmul.f32 0.5, %v3297_v1 }
 0x40b   : > { %v3638_v49 = vmul.f32 0.5, %v3490_v26  ;;  %5240 = vtanh.f32 %v3634_v51  ;;  %v3637_v59 = vmul.f32 0.5, %v3299_v48  ;;  %v3301_v58 = vadd.f32 %v8117_v38, %v7962_v29 }
 0x40c   : > { %v3639_v63 = vmul.f32 0.5, %v3492_v20  ;;  %v4008_v27 = vadd.f32 0.5, %v3880_v17  ;;  %5242 = vtanh.f32 %v3633_v32  ;;  %v3494_v16 = vadd.f32 %v8123_v52, %v7962_v29  ;;  %v8230_v61 = vpop.f32.mrb[104].mxu0 }
 0x40d   : > { %v5225_v56 = vpop.eup %5224  ;;  %v3303_v36 = vadd.f32 %v8125_v3, %v7962_v29  ;;  %5244 = vtanh.f32 %v3635_v7  ;;  %v3640_v35 = vmul.f32 0.5, %v3301_v58  ;;  %v3496_v14 = vadd.f32 %v8131_v11, %v7962_v29  ;;  %v8232_v18 = vpop.f32.mrb[104].mxu1 }
 0x40e   : > { %v5227_v45 = vpop.eup %5226  ;;  %v3882_v46 = vmul.f32 0.5, %v5225_v56  ;;  %v4328_v38 = vmul.f32 %v4180_v10, %v4008_v27  ;;  %5246 = vtanh.f32 %v3636_v43  ;;  %v3642_v2 = vmul.f32 0.5, %v3494_v16  ;;  %v8234_v52 = vpop.f32.mrb[105].mxu0 }
 0x40f   : > { %v3881_v23 = vmul.f32 0.5, %v5227_v45  ;;  %v5229_v15 = vpop.eup %5228  ;;  %5248 = vtanh.f32 %v3638_v49  ;;  %v3641_v33 = vmul.f32 0.5, %v3303_v36  ;;  %v8236_v22 = vmul.f32 0.5, %v3496_v14  ;;  %v8238_v24 = vpop.f32.mrb[105].mxu1 }
 0x410   : > { %v4010_v3 = vadd.f32 0.5, %v3882_v46  ;;  %v8240_v34 = vpop.f32.mrb[106].mxu0  ;;  %v5231_v29 = vpop.eup %5230  ;;  %v4428_v11 = vadd.f32 %v8169_v30, %v4328_v38  ;;  %v3883_v51 = vmul.f32 0.5, %v5229_v15  ;;  %5250 = vtanh.f32 %v3637_v59 }
 0x411   : > { %v4009_v41 = vadd.f32 0.5, %v3881_v23  ;;  %v8243_v12 = vpop.f32.mrb[106].mxu1  ;;  %v8245_v32 = vpop.f32.mrb[107].mxu0  ;;  %v3884_v60 = vmul.f32 0.5, %v5231_v29  ;;  %5252 = vtanh.f32 %v3639_v63  ;;  %v8249_v7 = vadd.f32 %v8136_v4, %v7964_v40 }
 0x412   : > { %v5233_v1 = vpop.eup %5232  ;;  %v4330_v26 = vmul.f32 %v4180_v10, %v4010_v3  ;;  %v8251_v48 = vpop.f32.mrb[107].mxu1  ;;  %v4011_v30 = vadd.f32 0.5, %v3883_v51  ;;  %5254 = vtanh.f32 %v3640_v35 }
 0x413   : > { %v5235_v20 = vpop.eup %5234  ;;  %v4329_v17 = vmul.f32 %v4180_v10, %v4009_v41  ;;  %v3886_v43 = vmul.f32 0.5, %v5233_v1  ;;  %v4012_v58 = vadd.f32 0.5, %v3884_v60  ;;  %5256 = vtanh.f32 %v3642_v2  ;;  %v4185_v16 = vpop.permute.xlu0 %4184 }
 0x414   : > { %v5237_v49 = vpop.eup %5236  ;;  %v4502_v59 = vadd.f32 %v8176_v44, %v4330_v26  ;;  %v3885_v56 = vmul.f32 0.5, %v5235_v20  ;;  %v4331_v36 = vmul.f32 %v4180_v10, %v4011_v30  ;;  %v4190_v14 = vpop.permute.xlu1 %4189  ;;  %5258 = vtanh.f32 %v3641_v33 }
 0x415   : > { %v5239_v27 = vpop.eup %5238  ;;  %v4465_v63 = vadd.f32 %v8180_v47, %v4329_v17  ;;  %v4014_v4 = vadd.f32 0.5, %v3886_v43  ;;  %v3887_v45 = vmul.f32 0.5, %v5237_v49  ;;  %v4332_v38 = vmul.f32 %v4185_v16, %v4012_v58  ;;  %v8255_v35 = vpop.f32.mrb[108].mxu0 }
 0x416   : > { %v5241_v46 = vpop.eup %5240  ;;  %v4013_v23 = vadd.f32 0.5, %v3885_v56  ;;  %v3888_v15 = vmul.f32 0.5, %v5239_v27  ;;  %v4539_v44 = vadd.f32 %v8184_v54, %v4331_v36  ;;  %v8258_v51 = vpop.f32.mrb[108].mxu1  ;;  %5260 = vtanh.f32 %v8236_v22 }
 0x417   : > { %v5243_v3 = vpop.eup %5242  ;;  %v4334_v29 = vmul.f32 %v4185_v16, %v4014_v4  ;;  %v4015_v2 = vadd.f32 0.5, %v3887_v45  ;;  %v3890_v41 = vmul.f32 0.5, %v5241_v46  ;;  %v8260_v47 = vpop.f32.mrb[109].mxu0  ;;  %v4429_v1 = vadd.f32 %v4428_v11, %v4332_v38 }
 0x418   : > { %8676 = vst [vmem:[#allocation23_spill] sm:$0xff] %v8260_v47  ;;  %v5245_v10 = vpop.eup %5244  ;;  %v4333_v26 = vmul.f32 %v4185_v16, %v4013_v23  ;;  %v4016_v60 = vadd.f32 0.5, %v3888_v15  ;;  %v3889_v20 = vmul.f32 0.5, %v5243_v3  ;;  %v8262_v17 = vpop.f32.mrb[109].mxu1  ;;  %v3500_v22 = vadd.f32 %v8139_v8, %v7964_v40 }
 0x419   : > { %8677 = vst [vmem:[#allocation24_spill] sm:$0xff] %v8262_v17  ;;  %v8264_v33 = vpop.f32.mrb[110].mxu0  ;;  %v5247_v30 = vpop.eup %5246  ;;  %v4503_v43 = vadd.f32 %v4502_v59, %v4334_v29  ;;  %v4335_v49 = vmul.f32 %v4185_v16, %v4015_v2  ;;  %v4018_v54 = vadd.f32 0.5, %v3890_v41  ;;  %v3891_v58 = vmul.f32 0.5, %v5245_v10 }
 0x41a   : > { %8678 = vst [vmem:[#allocation25_spill] sm:$0xff] %v8264_v33  ;;  %v8266_v56 = vpop.f32.mrb[110].mxu1  ;;  %v8268_v27 = vpop.f32.mrb[111].mxu0  ;;  %v4466_v4 = vadd.f32 %v4465_v63, %v4333_v26  ;;  %v4336_v45 = vmul.f32 %v4190_v14, %v4016_v60  ;;  %v4017_v11 = vadd.f32 0.5, %v3889_v20  ;;  %v3892_v46 = vmul.f32 0.5, %v5247_v30 }
 0x41b   : > { %8679 = vst [vmem:[#allocation26_spill] sm:$0xff] %v8266_v56  ;;  %8680 = vst [vmem:[#allocation27_spill] sm:$0xff] %v8268_v27  ;;  %v5249_v36 = vpop.eup %5248  ;;  %v8270_v38 = vpop.f32.mrb[111].mxu1  ;;  %v4540_v15 = vadd.f32 %v4539_v44, %v4335_v49  ;;  %v4338_v3 = vmul.f32 %v4190_v14, %v4018_v54  ;;  %v4019_v33 = vadd.f32 0.5, %v3891_v58 }
 0x41c   : > { %8681 = vst [vmem:[#allocation28_spill] sm:$0xff] %v8270_v38  ;;  %v5251_v23 = vpop.eup %5250  ;;  %v3894_v17 = vmul.f32 0.5, %v5249_v36  ;;  %v4430_v16 = vadd.f32 %v4429_v1, %v4336_v45  ;;  %v4337_v29 = vmul.f32 %v4190_v14, %v4017_v11  ;;  %v4020_v2 = vadd.f32 0.5, %v3892_v46  ;;  %v4195_v56 = vpop.permute.xlu0 %4194 }
 0x41d   : > { %v5253_v59 = vpop.eup %5252  ;;  %v3893_v41 = vmul.f32 0.5, %v5251_v23  ;;  %v4504_v27 = vadd.f32 %v4503_v43, %v4338_v3  ;;  %v4339_v47 = vmul.f32 %v4190_v14, %v4019_v33  ;;  %v8272_v20 = vpop.permute.xlu1 %4199 }
 0x41e   : > { %v5255_v10 = vpop.eup %5254  ;;  %v4022_v63 = vadd.f32 0.5, %v3894_v17  ;;  %v3895_v26 = vmul.f32 0.5, %v5253_v59  ;;  %v4467_v30 = vadd.f32 %v4466_v4, %v4337_v29  ;;  %v4340_v38 = vmul.f32 %v4195_v56, %v4020_v2  ;;  %v8274_v54 = vpop.f32.mrb[112].mxu0 }
 0x41f   : > { %v5257_v60 = vpop.eup %5256  ;;  %v4021_v44 = vadd.f32 0.5, %v3893_v41  ;;  %v3896_v49 = vmul.f32 0.5, %v5255_v10  ;;  %v4541_v58 = vadd.f32 %v4540_v15, %v4339_v47  ;;  %v8276_v11 = vpop.f32.mrb[112].mxu1 }
 0x420   : > { %v4342_v1 = vmul.f32 %v4195_v56, %v4022_v63  ;;  %v4023_v36 = vadd.f32 0.5, %v3895_v26  ;;  %v3898_v45 = vmul.f32 0.5, %v5257_v60  ;;  %v8278_v46 = vpop.f32.mrb[113].mxu0  ;;  %v5259_v14 = vpop.eup %5258  ;;  %v4431_v17 = vadd.f32 %v4430_v16, %v4340_v38 }
 0x421   : > { %v4341_v33 = vmul.f32 %v4195_v56, %v4021_v44  ;;  %v4024_v43 = vadd.f32 0.5, %v3896_v49  ;;  %v8281_v4 = vpop.f32.mrb[113].mxu1  ;;  %v8283_v23 = vpop.f32.mrb[114].mxu0  ;;  %v3897_v15 = vmul.f32 0.5, %v5259_v14  ;;  %v3644_v38 = vmul.f32 0.5, %v8249_v7  ;;  %v8684_v14 = vld [vmem:[#allocation20_spill] sm:$0xff] }
 0x422   : > { %v4505_v3 = vadd.f32 %v4504_v27, %v4342_v1  ;;  %v4343_v59 = vmul.f32 %v4195_v56, %v4023_v36  ;;  %v4026_v47 = vadd.f32 0.5, %v3898_v45  ;;  %v8285_v29 = vpop.f32.mrb[114].mxu1  ;;  %v8287_v2 = vpop.f32.mrb[115].mxu0  ;;  %v3309_v26 = vadd.f32 %v8141_v55, %v7964_v40  ;;  %v8683_v1 = vld [vmem:[#allocation19_spill] sm:$0xff] }
 0x423   : > { %v4468_v41 = vadd.f32 %v4467_v30, %v4341_v33  ;;  %v4344_v10 = vmul.f32 %v8272_v20, %v4024_v43  ;;  %v8293_v16 = vpop.f32.mrb[115].mxu1  ;;  %v4025_v27 = vadd.f32 0.5, %v3897_v15  ;;  %5262 = vtanh.f32 %v3644_v38 }
 0x424   : > { %v8295_v63 = vadd.f32 %v4541_v58, %v4343_v59  ;;  %v4346_v56 = vmul.f32 %v8272_v20, %v4026_v47  ;;  %v3646_v30 = vmul.f32 0.5, %v3500_v22  ;;  %v3502_v7 = vadd.f32 %v8143_v25, %v7964_v40  ;;  %v8682_v58 = vld [vmem:[#allocation8_spill] sm:$0xff]  ;;  %v8313_v43 = vpop.f32.mrb[116].mxu0  ;;  %v8686_v25 = vld [vmem:[#allocation22_spill] sm:$0xff]  ;;  %v8687_v22 = vld [vmem:[#allocation9_spill] sm:$0xff] }
 0x425   : > { %v8300_v60 = vadd.f32 %v4431_v17, %v4344_v10  ;;  %v4345_v8 = vmul.f32 %v8272_v20, %v4025_v27  ;;  %v3645_v49 = vmul.f32 0.5, %v3309_v26  ;;  %v3311_v36 = vadd.f32 %v8683_v1, %v8682_v58  ;;  %v8685_v17 = vld [vmem:[#allocation21_spill] sm:$0xff]  ;;  %v8319_v47 = vpop.f32.mrb[116].mxu1  ;;  %v8321_v15 = vpop.f32.mrb[117].mxu0 }
 0x426   : > { %v8304_v44 = vadd.f32 %v4505_v3, %v4346_v56  ;;  %5264 = vtanh.f32 %v3646_v30  ;;  %v3647_v45 = vmul.f32 0.5, %v3502_v7  ;;  %v3504_v55 = vadd.f32 %v8684_v14, %v8682_v58  ;;  %v8325_v27 = vpop.f32.mrb[117].mxu1  ;;  %v8327_v26 = vpop.f32.mrb[118].mxu0 }
 0x427   : > { %v3313_v33 = vadd.f32 %v8685_v17, %v8682_v58  ;;  %v8315_v59 = vadd.f32 %v4468_v41, %v4345_v8  ;;  %5266 = vtanh.f32 %v3645_v49  ;;  %v3648_v40 = vmul.f32 0.5, %v3311_v36  ;;  %v8333_v8 = vpop.f32.mrb[118].mxu1  ;;  %v8335_v49 = vpop.f32.mrb[119].mxu0  ;;  %v8690_v36 = vld [vmem:[#allocation10_spill] sm:$0xff] }
 0x428   : > { %v3506_v3 = vadd.f32 %v8686_v25, %v8682_v58  ;;  %5268 = vtanh.f32 %v3647_v45  ;;  %v3650_v10 = vmul.f32 0.5, %v3504_v55  ;;  %v3317_v56 = vadd.f32 %v8153_v31, %v8687_v22  ;;  %8688 = vst [vmem:[#allocation8_spill] sm:$0xff] %v8333_v8  ;;  %8689 = vst [vmem:[#allocation19_spill] sm:$0xff] %v8335_v49  ;;  %v5261_v58 = vpop.eup %5260  ;;  %v8341_v14 = vpop.f32.mrb[119].mxu1 }
 0x429   : > { %v3649_v38 = vmul.f32 0.5, %v3313_v33  ;;  %5270 = vtanh.f32 %v3648_v40  ;;  %v3510_v30 = vadd.f32 %v8155_v37, %v8687_v22  ;;  %v3319_v7 = vadd.f32 %v8157_v5, %v8687_v22  ;;  %8691 = vst [vmem:[#allocation20_spill] sm:$0xff] %v8341_v14 }
 0x42a   : > { %v3651_v41 = vmul.f32 0.5, %v3506_v3  ;;  %5272 = vtanh.f32 %v3650_v10  ;;  %v3652_v1 = vmul.f32 0.5, %v3317_v56  ;;  %v3512_v31 = vadd.f32 %v8160_v19, %v8687_v22  ;;  %v4205_v10 = vpop.permute.xlu0 %4204  ;;  %v8692_v22 = vld [vmem:[#allocation11_spill] sm:$0xff] }
 0x42b   : > { %v3321_v45 = vadd.f32 %v8162_v62, %v8690_v36  ;;  %v3899_v55 = vmul.f32 0.5, %v5261_v58  ;;  %5274 = vtanh.f32 %v3649_v38  ;;  %v3654_v37 = vmul.f32 0.5, %v3510_v30 }
 0x42c   : > { %v3653_v17 = vmul.f32 0.5, %v3319_v7  ;;  %5276 = vtanh.f32 %v3651_v41  ;;  %v3655_v5 = vmul.f32 0.5, %v3512_v31  ;;  %v3514_v40 = vadd.f32 %v8165_v50, %v8690_v36  ;;  %v8353_v30 = vpop.f32.mrb[120].mxu0 }
 0x42d   : > { %v3656_v33 = vmul.f32 0.5, %v3321_v45  ;;  %v4027_v25 = vadd.f32 0.5, %v3899_v55  ;;  %5278 = vtanh.f32 %v3652_v1  ;;  %v3323_v19 = vadd.f32 %v8167_v13, %v8690_v36  ;;  %v5263_v3 = vpop.eup %5262  ;;  %8693 = vst [vmem:[#allocation21_spill] sm:$0xff] %v8353_v30  ;;  %v8356_v58 = vpop.f32.mrb[120].mxu1 }
 0x42e   : > { %v3516_v62 = vadd.f32 %v8174_v53, %v8690_v36  ;;  %5280 = vtanh.f32 %v3654_v37  ;;  %v3658_v38 = vmul.f32 0.5, %v3514_v40  ;;  %v3327_v56 = vadd.f32 %v8194_v28, %v8692_v22  ;;  %8694 = vst [vmem:[#allocation22_spill] sm:$0xff] %v8356_v58  ;;  %v8358_v53 = vpop.f32.mrb[121].mxu0  ;;  %v8362_v28 = vpop.f32.mrb[121].mxu1 }
 0x42f   : > { %v3520_v41 = vadd.f32 %v8198_v42, %v8692_v22  ;;  %v4347_v50 = vmul.f32 %v8272_v20, %v4027_v25  ;;  %v3900_v7 = vmul.f32 0.5, %v5263_v3  ;;  %5282 = vtanh.f32 %v3653_v17  ;;  %8695 = vst [vmem:[#allocation9_spill] sm:$0xff] %v8358_v53  ;;  %8696 = vst [vmem:[#allocation10_spill] sm:$0xff] %v8362_v28  ;;  %v8364_v42 = vpop.f32.mrb[122].mxu0  ;;  %v8367_v40 = vpop.f32.mrb[122].mxu1 }
 0x430   : > { %v3657_v13 = vmul.f32 0.5, %v3323_v19  ;;  %v5265_v1 = vpop.eup %5264  ;;  %5284 = vtanh.f32 %v3655_v5  ;;  %v3659_v31 = vmul.f32 0.5, %v3516_v62  ;;  %v3660_v36 = vmul.f32 0.5, %v3327_v56  ;;  %8697 = vst [vmem:[#allocation11_spill] sm:$0xff] %v8364_v42  ;;  %8698 = vst [vmem:[#allocation29_spill] sm:$0xff] %v8367_v40  ;;  %v8369_v25 = vpop.f32.mrb[123].mxu0 }
 0x431   : > { %v8360_v45 = vmul.f32 0.5, %v3520_v41  ;;  %v5267_v55 = vpop.eup %5266  ;;  %v4543_v20 = vadd.f32 %v8295_v63, %v4347_v50  ;;  %v4028_v37 = vadd.f32 0.5, %v3900_v7  ;;  %v3902_v17 = vmul.f32 0.5, %v5265_v1  ;;  %8699 = vst [vmem:[#allocation30_spill] sm:$0xff] %v8369_v25  ;;  %v8377_v56 = vpop.f32.mrb[123].mxu1 }
 0x432   : > { %5286 = vtanh.f32 %v3656_v33  ;;  %v5269_v19 = vpop.eup %5268  ;;  %v3901_v5 = vmul.f32 0.5, %v5267_v55  ;;  %v3329_v62 = vadd.f32 %v8200_v39, %v8692_v22  ;;  %v8375_v3 = vadd.f32 %v8204_v0, %v8692_v22  ;;  %8700 = vst [vmem:[#allocation31_spill] sm:$0xff] %v8377_v56  ;;  %v4210_v40 = vpop.permute.xlu1 %4209 }
 0x433   : > { %5288 = vtanh.f32 %v3658_v38  ;;  %v5271_v63 = vpop.eup %5270  ;;  %v4348_v41 = vmul.f32 %v4205_v10, %v4028_v37  ;;  %v4030_v50 = vadd.f32 0.5, %v3902_v17  ;;  %v3903_v33 = vmul.f32 0.5, %v5269_v19  ;;  %v4215_v56 = vpop.permute.xlu0 %4214 }
 0x434   : > { %5290 = vtanh.f32 %v3657_v13  ;;  %v5273_v7 = vpop.eup %5272  ;;  %v4029_v1 = vadd.f32 0.5, %v3901_v5  ;;  %v3904_v25 = vmul.f32 0.5, %v5271_v63  ;;  %v8379_v55 = vmul.f32 0.5, %v3329_v62  ;;  %v8382_v13 = vpop.f32.mrb[124].mxu0 }
 0x435   : > { %5292 = vtanh.f32 %v3659_v31  ;;  %v5275_v38 = vpop.eup %5274  ;;  %v4433_v39 = vadd.f32 %v8300_v60, %v4348_v41  ;;  %v4350_v42 = vmul.f32 %v4205_v10, %v4030_v50  ;;  %v4031_v0 = vadd.f32 0.5, %v3903_v33  ;;  %8701 = vst [vmem:[#allocation32_spill] sm:$0xff] %v8382_v13  ;;  %v8385_v58 = vpop.f32.mrb[124].mxu1 }
 0x436   : > { %v3906_v22 = vmul.f32 0.5, %v5273_v7  ;;  %v5277_v28 = vpop.eup %5276  ;;  %v4349_v53 = vmul.f32 %v4205_v10, %v4029_v1  ;;  %v4032_v37 = vadd.f32 0.5, %v3904_v25  ;;  %v3905_v17 = vmul.f32 0.5, %v5275_v38  ;;  %8702 = vst [vmem:[#allocation33_spill] sm:$0xff] %v8385_v58  ;;  %v8387_v60 = vpop.f32.mrb[125].mxu0 }
 0x437   : > { %5294 = vtanh.f32 %v3660_v36  ;;  %v5279_v19 = vpop.eup %5278  ;;  %v4507_v31 = vadd.f32 %v8304_v44, %v4350_v42  ;;  %v4351_v5 = vmul.f32 %v4205_v10, %v4031_v0  ;;  %v3907_v63 = vmul.f32 0.5, %v5277_v28  ;;  %8703 = vst [vmem:[#allocation34_spill] sm:$0xff] %v8387_v60  ;;  %v8390_v1 = vpop.f32.mrb[125].mxu1 }
 0x438   : > { %v4034_v62 = vadd.f32 0.5, %v3906_v22  ;;  %v5281_v41 = vpop.eup %5280  ;;  %v4470_v50 = vadd.f32 %v8315_v59, %v4349_v53  ;;  %v4352_v33 = vmul.f32 %v4210_v40, %v4032_v37  ;;  %v4033_v7 = vadd.f32 0.5, %v3905_v17  ;;  %8704 = vst [vmem:[#allocation35_spill] sm:$0xff] %v8390_v1  ;;  %v8392_v36 = vpop.f32.mrb[126].mxu0 }
 0x439   : > { %v3908_v25 = vmul.f32 0.5, %v5279_v19  ;;  %8705 = vst [vmem:[#allocation36_spill] sm:$0xff] %v8392_v36  ;;  %v5283_v38 = vpop.eup %5282  ;;  %v4544_v13 = vadd.f32 %v4543_v20, %v4351_v5  ;;  %v4035_v10 = vadd.f32 0.5, %v3907_v63  ;;  %v3910_v42 = vmul.f32 0.5, %v5281_v41  ;;  %v8394_v28 = vpop.f32.mrb[126].mxu1 }
 0x43a   : > { %v4354_v44 = vmul.f32 %v4210_v40, %v4034_v62  ;;  %8706 = vst [vmem:[#allocation37_spill] sm:$0xff] %v8394_v28  ;;  %v8396_v0 = vpop.f32.mrb[127].mxu0  ;;  %v5285_v22 = vpop.eup %5284  ;;  %v4434_v60 = vadd.f32 %v4433_v39, %v4352_v33  ;;  %v4353_v58 = vmul.f32 %v4210_v40, %v4033_v7  ;;  %v3909_v53 = vmul.f32 0.5, %v5283_v38 }
 0x43b   : > { %8707 = vst [vmem:[#allocation38_spill] sm:$0xff] %v8396_v0  ;;  %v4036_v59 = vadd.f32 0.5, %v3908_v25  ;;  %v8398_v37 = vpop.f32.mrb[127].mxu1  ;;  %v4355_v1 = vmul.f32 %v4210_v40, %v4035_v10  ;;  %v4038_v36 = vadd.f32 0.5, %v3910_v42  ;;  %v3911_v30 = vmul.f32 0.5, %v5285_v22  ;;  %v4220_v7 = vpop.permute.xlu0 %4219 }
 0x43c   : > { %8708 = vst [vmem:[#allocation39_spill] sm:$0xff] %v8398_v37  ;;  %v5287_v17 = vpop.eup %5286  ;;  %v4508_v19 = vadd.f32 %v4507_v31, %v4354_v44  ;;  %v4471_v5 = vadd.f32 %v4470_v50, %v4353_v58  ;;  %v4037_v63 = vadd.f32 0.5, %v3909_v53  ;;  %5296 = vtanh.f32 %v8360_v45 }
 0x43d   : > { %v5289_v20 = vpop.eup %5288  ;;  %v4356_v62 = vmul.f32 %v4215_v56, %v4036_v59  ;;  %v3912_v41 = vmul.f32 0.5, %v5287_v17  ;;  %v4545_v14 = vadd.f32 %v4544_v13, %v4355_v1  ;;  %v4358_v0 = vmul.f32 %v4215_v56, %v4038_v36  ;;  %v8401_v13 = vpop.permute.xlu1 %3014 }
 0x43e   : > { %v5291_v28 = vpop.eup %5290  ;;  %v4039_v49 = vadd.f32 0.5, %v3911_v30  ;;  %v3914_v39 = vmul.f32 0.5, %v5289_v20  ;;  %v4357_v38 = vmul.f32 %v4215_v56, %v4037_v63  ;;  %5298 = vtanh.f32 %v8379_v55  ;;  %v8710_v63 = vld [vmem:[#allocation13_spill] sm:$0xff] }
 0x43f   : > { %v5293_v33 = vpop.eup %5292  ;;  %v4435_v25 = vadd.f32 %v4434_v60, %v4356_v62  ;;  %v4040_v37 = vadd.f32 0.5, %v3912_v41  ;;  %v3913_v8 = vmul.f32 0.5, %v5291_v28  ;;  %v4509_v31 = vadd.f32 %v4508_v19, %v4358_v0  ;;  %v8409_v45 = vpop.permute.xlu0 %4224 }
 0x440   : > { %v4359_v40 = vmul.f32 %v4215_v56, %v4039_v49  ;;  %v4042_v44 = vadd.f32 0.5, %v3914_v39  ;;  %v3915_v10 = vmul.f32 0.5, %v5293_v33  ;;  %v4472_v58 = vadd.f32 %v4471_v5, %v4357_v38 }
 0x441   : > { %v5295_v42 = vpop.eup %5294  ;;  %v4360_v50 = vmul.f32 %v4220_v7, %v4040_v37  ;;  %v4041_v22 = vadd.f32 0.5, %v3913_v8  ;;  %v3663_v49 = vmul.f32 0.5, %v8375_v3  ;;  %v8709_v37 = vld [vmem:[#allocation12_spill] sm:$0xff]  ;;  %v3337_v41 = vadd.f32 %v8230_v61, %v8710_v63 }
 0x442   : > { %v4546_v30 = vadd.f32 %v4545_v14, %v4359_v40  ;;  %v4362_v1 = vmul.f32 %v4220_v7, %v4042_v44  ;;  %v4043_v36 = vadd.f32 0.5, %v3915_v10  ;;  %v3916_v59 = vmul.f32 0.5, %v5295_v42 }
 0x443   : > { %v4436_v60 = vadd.f32 %v4435_v25, %v4360_v50  ;;  %v4361_v53 = vmul.f32 %v4220_v7, %v4041_v22  ;;  %v3331_v8 = vadd.f32 %v8206_v21, %v8709_v37  ;;  %5300 = vtanh.f32 %v3663_v49  ;;  %v8713_v49 = vld [vmem:[#allocation23_spill] sm:$0xff] }
 0x444   : > { %v8405_v56 = vadd.f32 %v4509_v31, %v4362_v1  ;;  %v4363_v28 = vmul.f32 %v4220_v7, %v4043_v36  ;;  %v4044_v0 = vadd.f32 0.5, %v3916_v59  ;;  %v3524_v14 = vadd.f32 %v8212_v57, %v8709_v37  ;;  %v8426_v57 = vpop.permute.xlu1 %3019  ;;  %v8711_v31 = vld [vmem:[#allocation14_spill] sm:$0xff]  ;;  %v8712_v1 = vld [vmem:[#allocation15_spill] sm:$0xff] }
 0x445   : > { %v8411_v17 = vadd.f32 %v4472_v58, %v4361_v53  ;;  %v3333_v55 = vadd.f32 %v8214_v6, %v8709_v37  ;;  %v3664_v20 = vmul.f32 0.5, %v3331_v8  ;;  %v3526_v5 = vadd.f32 %v8220_v9, %v8709_v37  ;;  %v4230_v8 = vpop.permute.xlu0 %4229 }
 0x446   : > { %v8417_v19 = vadd.f32 %v4546_v30, %v4363_v28  ;;  %v4364_v3 = vmul.f32 %v8409_v45, %v4044_v0  ;;  %v3666_v21 = vmul.f32 0.5, %v3524_v14  ;;  %v3530_v39 = vadd.f32 %v8232_v18, %v8710_v63  ;;  %v5297_v44 = vpop.eup %5296  ;;  %v8714_v0 = vld [vmem:[#allocation24_spill] sm:$0xff] }
 0x447   : > { %v3665_v62 = vmul.f32 0.5, %v3333_v55  ;;  %5302 = vtanh.f32 %v3664_v20  ;;  %v3667_v6 = vmul.f32 0.5, %v3526_v5  ;;  %v3339_v7 = vadd.f32 %v8234_v52, %v8710_v63 }
 0x448   : > { %v8428_v33 = vadd.f32 %v4436_v60, %v4364_v3  ;;  %5304 = vtanh.f32 %v3666_v21  ;;  %v3668_v25 = vmul.f32 0.5, %v3337_v41  ;;  %v3670_v9 = vmul.f32 0.5, %v3530_v39  ;;  %v5299_v22 = vpop.eup %5298  ;;  %v8444_v36 = vpop.permute.xlu1 %3024 }
 0x449   : > { %v3532_v38 = vadd.f32 %v8238_v24, %v8710_v63  ;;  %5306 = vtanh.f32 %v3665_v62  ;;  %v3669_v61 = vmul.f32 0.5, %v3339_v7  ;;  %v3341_v18 = vadd.f32 %v8240_v34, %v8711_v31  ;;  %v8716_v7 = vld [vmem:[#allocation25_spill] sm:$0xff] }
 0x44a   : > { %v3534_v40 = vadd.f32 %v8243_v12, %v8711_v31  ;;  %5308 = vtanh.f32 %v3667_v6  ;;  %v3343_v52 = vadd.f32 %v8245_v32, %v8711_v31  ;;  %v3536_v42 = vadd.f32 %v8251_v48, %v8711_v31  ;;  %v8715_v6 = vld [vmem:[#allocation16_spill] sm:$0xff] }
 0x44b   : > { %v3671_v10 = vmul.f32 0.5, %v3532_v38  ;;  %v3918_v58 = vmul.f32 0.5, %v5297_v44  ;;  %5310 = vtanh.f32 %v3668_v25  ;;  %v3672_v24 = vmul.f32 0.5, %v3341_v18 }
 0x44c   : > { %v3674_v50 = vmul.f32 0.5, %v3534_v40  ;;  %5312 = vtanh.f32 %v3670_v9  ;;  %v3673_v30 = vmul.f32 0.5, %v3343_v52  ;;  %v3675_v34 = vmul.f32 0.5, %v3536_v42  ;;  %v8717_v9 = vld [vmem:[#allocation26_spill] sm:$0xff]  ;;  %v8461_v31 = vpop.permute.xlu1 %3029 }
 0x44d   : > { %v3347_v12 = vadd.f32 %v8255_v35, %v8712_v1  ;;  %v4046_v59 = vadd.f32 0.5, %v3918_v58  ;;  %v3917_v60 = vmul.f32 0.5, %v5299_v22  ;;  %5314 = vtanh.f32 %v3669_v61  ;;  %v5301_v48 = vpop.eup %5300 }
 0x44e   : > { %v3540_v32 = vadd.f32 %v8258_v51, %v8712_v1  ;;  %5316 = vtanh.f32 %v3671_v10  ;;  %v3349_v28 = vadd.f32 %v8713_v49, %v8712_v1  ;;  %v3542_v37 = vadd.f32 %v8714_v0, %v8712_v1 }
 0x44f   : > { %v3676_v53 = vmul.f32 0.5, %v3347_v12  ;;  %v4366_v35 = vmul.f32 %v8409_v45, %v4046_v59  ;;  %v4045_v14 = vadd.f32 0.5, %v3917_v60  ;;  %v3919_v55 = vmul.f32 0.5, %v5301_v48 }
 0x450   : > { %5318 = vtanh.f32 %v3672_v24  ;;  %v3678_v3 = vmul.f32 0.5, %v3540_v32  ;;  %v3677_v20 = vmul.f32 0.5, %v3349_v28  ;;  %v3679_v5 = vmul.f32 0.5, %v3542_v37  ;;  %v4235_v24 = vpop.permute.xlu0 %4234  ;;  %v8467_v37 = vpop.permute.xlu1 %3034 }
 0x451   : > { %5320 = vtanh.f32 %v3674_v50  ;;  %v5303_v51 = vpop.eup %5302  ;;  %v4511_v21 = vadd.f32 %v8405_v56, %v4366_v35  ;;  %v4365_v62 = vmul.f32 %v8409_v45, %v4045_v14  ;;  %v4047_v63 = vadd.f32 0.5, %v3919_v55 }
 0x452   : > { %5322 = vtanh.f32 %v3673_v30  ;;  %v5305_v41 = vpop.eup %5304  ;;  %v3920_v39 = vmul.f32 0.5, %v5303_v51  ;;  %v3351_v25 = vadd.f32 %v8716_v7, %v8715_v6  ;;  %v8459_v38 = vadd.f32 %v8717_v9, %v8715_v6 }
 0x453   : > { %5324 = vtanh.f32 %v3675_v34  ;;  %v5307_v61 = vpop.eup %5306  ;;  %v4474_v18 = vadd.f32 %v8411_v17, %v4365_v62  ;;  %v4367_v56 = vmul.f32 %v8409_v45, %v4047_v63  ;;  %v3922_v40 = vmul.f32 0.5, %v5305_v41 }
 0x454   : > { %5326 = vtanh.f32 %v3676_v53  ;;  %v5309_v44 = vpop.eup %5308  ;;  %v4048_v10 = vadd.f32 0.5, %v3920_v39  ;;  %v3921_v52 = vmul.f32 0.5, %v5307_v61  ;;  %v3680_v42 = vmul.f32 0.5, %v3351_v25  ;;  %v4240_v39 = vpop.permute.xlu0 %4239 }
 0x455   : > { %5328 = vtanh.f32 %v3678_v3  ;;  %v5311_v58 = vpop.eup %5310  ;;  %v4548_v50 = vadd.f32 %v8417_v19, %v4367_v56  ;;  %v4050_v22 = vadd.f32 0.5, %v3922_v40  ;;  %v3923_v30 = vmul.f32 0.5, %v5309_v44 }
 0x456   : > { %5330 = vtanh.f32 %v3677_v20  ;;  %v5313_v34 = vpop.eup %5312  ;;  %v4368_v1 = vmul.f32 %v4230_v8, %v4048_v10  ;;  %v4049_v12 = vadd.f32 0.5, %v3921_v52  ;;  %v3924_v17 = vmul.f32 0.5, %v5311_v58 }
 0x457   : > { %5332 = vtanh.f32 %v3679_v5  ;;  %v5315_v45 = vpop.eup %5314  ;;  %v4370_v59 = vmul.f32 %v4230_v8, %v4050_v22  ;;  %v4051_v60 = vadd.f32 0.5, %v3923_v30  ;;  %v3926_v32 = vmul.f32 0.5, %v5313_v34 }
 0x458   : > { %5334 = vtanh.f32 %v3680_v42  ;;  %v5317_v48 = vpop.eup %5316  ;;  %v4438_v53 = vadd.f32 %v8428_v33, %v4368_v1  ;;  %v4369_v49 = vmul.f32 %v4230_v8, %v4049_v12  ;;  %v4052_v28 = vadd.f32 0.5, %v3924_v17 }
 0x459   : > { %v3925_v0 = vmul.f32 0.5, %v5315_v45  ;;  %v4512_v35 = vadd.f32 %v4511_v21, %v4370_v59  ;;  %v4371_v14 = vmul.f32 %v4230_v8, %v4051_v60  ;;  %v4054_v55 = vadd.f32 0.5, %v3926_v32 }
 0x45a   : > { %v5319_v19 = vpop.eup %5318  ;;  %v3927_v3 = vmul.f32 0.5, %v5317_v48  ;;  %v4475_v5 = vadd.f32 %v4474_v18, %v4369_v49  ;;  %v4372_v51 = vmul.f32 %v4235_v24, %v4052_v28 }
 0x45b   : > { %v5321_v20 = vpop.eup %5320  ;;  %v4053_v62 = vadd.f32 0.5, %v3925_v0  ;;  %v3928_v63 = vmul.f32 0.5, %v5319_v19  ;;  %v4549_v7 = vadd.f32 %v4548_v50, %v4371_v14  ;;  %v4374_v25 = vmul.f32 %v4235_v24, %v4054_v55  ;;  %v8469_v50 = vpop.permute.xlu1 %3039 }
 0x45c   : > { %v5323_v41 = vpop.eup %5322  ;;  %v4055_v33 = vadd.f32 0.5, %v3927_v3  ;;  %v3930_v9 = vmul.f32 0.5, %v5321_v20  ;;  %v4439_v56 = vadd.f32 %v4438_v53, %v4372_v51  ;;  %v4245_v0 = vpop.permute.xlu0 %4244 }
 0x45d   : > { %v5325_v61 = vpop.eup %5324  ;;  %v4373_v40 = vmul.f32 %v4235_v24, %v4053_v62  ;;  %v4056_v44 = vadd.f32 0.5, %v3928_v63  ;;  %v3929_v10 = vmul.f32 0.5, %v5323_v41  ;;  %v4513_v8 = vadd.f32 %v4512_v35, %v4374_v25 }
 0x45e   : > { %v5327_v21 = vpop.eup %5326  ;;  %v4375_v52 = vmul.f32 %v4235_v24, %v4055_v33  ;;  %v4058_v42 = vadd.f32 0.5, %v3930_v9  ;;  %v3931_v58 = vmul.f32 0.5, %v5325_v61  ;;  %v8718_v61 = vld [vmem:[#allocation27_spill] sm:$0xff] }
 0x45f   : > { %v5329_v18 = vpop.eup %5328  ;;  %v4476_v22 = vadd.f32 %v4475_v5, %v4373_v40  ;;  %v4376_v30 = vmul.f32 %v4240_v39, %v4056_v44  ;;  %v4057_v34 = vadd.f32 0.5, %v3929_v10  ;;  %v3932_v1 = vmul.f32 0.5, %v5327_v21  ;;  %v8474_v40 = vpop.permute.xlu1 %4249  ;;  %v8719_v10 = vld [vmem:[#allocation28_spill] sm:$0xff] }
 0x460   : > { %v5331_v12 = vpop.eup %5330  ;;  %v4550_v17 = vadd.f32 %v4549_v7, %v4375_v52  ;;  %v4378_v45 = vmul.f32 %v4240_v39, %v4058_v42  ;;  %v4059_v59 = vadd.f32 0.5, %v3931_v58  ;;  %v3934_v60 = vmul.f32 0.5, %v5329_v18  ;;  %v8720_v42 = vld [vmem:[#allocation17_spill] sm:$0xff] }
 0x461   : > { %v5333_v32 = vpop.eup %5332  ;;  %v4440_v48 = vadd.f32 %v4439_v56, %v4376_v30  ;;  %v4377_v53 = vmul.f32 %v4240_v39, %v4057_v34  ;;  %v4060_v49 = vadd.f32 0.5, %v3932_v1  ;;  %v3933_v28 = vmul.f32 0.5, %v5331_v12 }
 0x462   : > { %v5335_v24 = vpop.eup %5334  ;;  %v4514_v19 = vadd.f32 %v4513_v8, %v4378_v45  ;;  %v4379_v35 = vmul.f32 %v4240_v39, %v4059_v59  ;;  %v4062_v14 = vadd.f32 0.5, %v3934_v60  ;;  %v3935_v55 = vmul.f32 0.5, %v5333_v32 }
 0x463   : > { %v4477_v3 = vadd.f32 %v4476_v22, %v4377_v53  ;;  %v4380_v20 = vmul.f32 %v4245_v0, %v4060_v49  ;;  %v4061_v5 = vadd.f32 0.5, %v3933_v28  ;;  %v3936_v51 = vmul.f32 0.5, %v5335_v24 }
 0x464   : > { %v4551_v62 = vadd.f32 %v4550_v17, %v4379_v35  ;;  %v4382_v63 = vmul.f32 %v4245_v0, %v4062_v14  ;;  %v4063_v41 = vadd.f32 0.5, %v3935_v55  ;;  %v3682_v7 = vmul.f32 0.5, %v8459_v38  ;;  %v8722_v35 = vld [vmem:[#allocation8_spill] sm:$0xff]  ;;  %v8723_v14 = vld [vmem:[#allocation19_spill] sm:$0xff] }
 0x465   : > { %v4441_v25 = vadd.f32 %v4440_v48, %v4380_v20  ;;  %v4381_v33 = vmul.f32 %v4245_v0, %v4061_v5  ;;  %v4064_v9 = vadd.f32 0.5, %v3936_v51  ;;  %v3353_v56 = vadd.f32 %v8718_v61, %v8715_v6 }
 0x466   : > { %v8476_v39 = vadd.f32 %v4514_v19, %v4382_v63  ;;  %v4383_v44 = vmul.f32 %v4245_v0, %v4063_v41  ;;  %5336 = vtanh.f32 %v3682_v7  ;;  %v3546_v21 = vadd.f32 %v8719_v10, %v8715_v6  ;;  %v8725_v63 = vld [vmem:[#allocation21_spill] sm:$0xff]  ;;  %v8726_v7 = vld [vmem:[#allocation22_spill] sm:$0xff] }
 0x467   : > { %v8480_v8 = vadd.f32 %v4477_v3, %v4381_v33  ;;  %v4384_v52 = vmul.f32 %v8474_v40, %v4064_v9  ;;  %v3681_v38 = vmul.f32 0.5, %v3353_v56  ;;  %v3357_v58 = vadd.f32 %v8274_v54, %v8720_v42  ;;  %v8721_v54 = vld [vmem:[#allocation18_spill] sm:$0xff]  ;;  %v8727_v56 = vld [vmem:[#allocation9_spill] sm:$0xff] }
 0x468   : > { %v8485_v18 = vadd.f32 %v4551_v62, %v4383_v44  ;;  %v3683_v22 = vmul.f32 0.5, %v3546_v21  ;;  %v3550_v30 = vadd.f32 %v8276_v11, %v8720_v42  ;;  %v3359_v34 = vadd.f32 %v8278_v46, %v8720_v42 }
 0x469   : > { %v8491_v1 = vadd.f32 %v4441_v25, %v4384_v52  ;;  %5338 = vtanh.f32 %v3681_v38  ;;  %v3684_v6 = vmul.f32 0.5, %v3357_v58  ;;  %v3552_v12 = vadd.f32 %v8281_v4, %v8720_v42 }
 0x46a   : > { %5340 = vtanh.f32 %v3683_v22  ;;  %v3686_v17 = vmul.f32 0.5, %v3550_v30  ;;  %v3685_v45 = vmul.f32 0.5, %v3359_v34  ;;  %v3361_v59 = vadd.f32 %v8283_v23, %v8721_v54 }
 0x46b   : > { %5342 = vtanh.f32 %v3684_v6  ;;  %v3687_v60 = vmul.f32 0.5, %v3552_v12  ;;  %v3554_v11 = vadd.f32 %v8285_v29, %v8721_v54  ;;  %v3363_v46 = vadd.f32 %v8287_v2, %v8721_v54 }
 0x46c   : > { %5344 = vtanh.f32 %v3686_v17  ;;  %v3688_v32 = vmul.f32 0.5, %v3361_v59  ;;  %v3556_v48 = vadd.f32 %v8293_v16, %v8721_v54  ;;  %v3367_v4 = vadd.f32 %v8313_v43, %v8401_v13 }
 0x46d   : > { %5346 = vtanh.f32 %v3685_v45  ;;  %v3690_v53 = vmul.f32 0.5, %v3554_v11  ;;  %v3689_v49 = vmul.f32 0.5, %v3363_v46  ;;  %v3560_v23 = vadd.f32 %v8319_v47, %v8401_v13  ;;  %v4255_v11 = vpop.permute.xlu0 %4254 }
 0x46e   : > { %5348 = vtanh.f32 %v3687_v60  ;;  %v3691_v28 = vmul.f32 0.5, %v3556_v48  ;;  %v3692_v29 = vmul.f32 0.5, %v3367_v4  ;;  %v3369_v2 = vadd.f32 %v8321_v15, %v8401_v13 }
 0x46f   : > { %5350 = vtanh.f32 %v3688_v32  ;;  %v3694_v24 = vmul.f32 0.5, %v3560_v23  ;;  %v3562_v16 = vadd.f32 %v8325_v27, %v8401_v13  ;;  %v3371_v43 = vadd.f32 %v8327_v26, %v8426_v57  ;;  %v8724_v27 = vld [vmem:[#allocation20_spill] sm:$0xff] }
 0x470   : > { %v5337_v0 = vpop.eup %5336  ;;  %5352 = vtanh.f32 %v3690_v53  ;;  %v3693_v19 = vmul.f32 0.5, %v3369_v2  ;;  %v3564_v47 = vadd.f32 %v8722_v35, %v8426_v57  ;;  %v3373_v55 = vadd.f32 %v8723_v14, %v8426_v57  ;;  %v4260_v14 = vpop.permute.xlu1 %4259 }
 0x471   : > { %v3938_v3 = vmul.f32 0.5, %v5337_v0  ;;  %5354 = vtanh.f32 %v3689_v49  ;;  %v3695_v15 = vmul.f32 0.5, %v3562_v16  ;;  %v3696_v20 = vmul.f32 0.5, %v3371_v43 }
 0x472   : > { %5356 = vtanh.f32 %v3691_v28  ;;  %v3698_v5 = vmul.f32 0.5, %v3564_v47  ;;  %v3697_v51 = vmul.f32 0.5, %v3373_v55  ;;  %v3566_v13 = vadd.f32 %v8724_v27, %v8426_v57 }
 0x473   : > { %v5339_v26 = vpop.eup %5338  ;;  %v4066_v62 = vadd.f32 0.5, %v3938_v3  ;;  %5358 = vtanh.f32 %v3692_v29  ;;  %v3377_v41 = vadd.f32 %v8725_v63, %v8444_v36  ;;  %v3570_v25 = vadd.f32 %v8726_v7, %v8444_v36 }
 0x474   : > { %v5341_v33 = vpop.eup %5340  ;;  %v3937_v9 = vmul.f32 0.5, %v5339_v26  ;;  %5360 = vtanh.f32 %v3694_v24  ;;  %v8523_v61 = vmul.f32 0.5, %v3566_v13  ;;  %v8527_v44 = vadd.f32 %v8727_v56, %v8444_v36 }
 0x475   : > { %v5343_v10 = vpop.eup %5342  ;;  %v4386_v57 = vmul.f32 %v8474_v40, %v4066_v62  ;;  %v3939_v21 = vmul.f32 0.5, %v5341_v33  ;;  %5362 = vtanh.f32 %v3693_v19  ;;  %v8530_v52 = vmul.f32 0.5, %v3377_v41 }
 0x476   : > { %v5345_v38 = vpop.eup %5344  ;;  %v4065_v42 = vadd.f32 0.5, %v3937_v9  ;;  %v3940_v58 = vmul.f32 0.5, %v5343_v10  ;;  %5364 = vtanh.f32 %v3695_v15  ;;  %v8532_v22 = vmul.f32 0.5, %v3570_v25  ;;  %v4265_v10 = vpop.permute.xlu0 %4264 }
 0x477   : > { %v5347_v30 = vpop.eup %5346  ;;  %v4516_v34 = vadd.f32 %v8476_v39, %v4386_v57  ;;  %v4067_v6 = vadd.f32 0.5, %v3939_v21  ;;  %v3942_v12 = vmul.f32 0.5, %v5345_v38  ;;  %5366 = vtanh.f32 %v3696_v20 }
 0x478   : > { %v5349_v17 = vpop.eup %5348  ;;  %v4385_v45 = vmul.f32 %v8474_v40, %v4065_v42  ;;  %v4068_v54 = vadd.f32 0.5, %v3940_v58  ;;  %v3941_v59 = vmul.f32 0.5, %v5347_v30  ;;  %5368 = vtanh.f32 %v3698_v5 }
 0x479   : > { %v5351_v60 = vpop.eup %5350  ;;  %v4387_v46 = vmul.f32 %v8474_v40, %v4067_v6  ;;  %v4070_v32 = vadd.f32 0.5, %v3942_v12  ;;  %v3943_v48 = vmul.f32 0.5, %v5349_v17  ;;  %5370 = vtanh.f32 %v3697_v51 }
 0x47a   : > { %v5353_v4 = vpop.eup %5352  ;;  %v4479_v53 = vadd.f32 %v8480_v8, %v4385_v45  ;;  %v4388_v39 = vmul.f32 %v4255_v11, %v4068_v54  ;;  %v4069_v49 = vadd.f32 0.5, %v3941_v59  ;;  %v3944_v23 = vmul.f32 0.5, %v5351_v60 }
 0x47b   : > { %v5355_v28 = vpop.eup %5354  ;;  %v4553_v29 = vadd.f32 %v8485_v18, %v4387_v46  ;;  %v4390_v2 = vmul.f32 %v4255_v11, %v4070_v32  ;;  %v4071_v24 = vadd.f32 0.5, %v3943_v48  ;;  %v3946_v16 = vmul.f32 0.5, %v5353_v4  ;;  %v4270_v4 = vpop.permute.xlu1 %4269 }
 0x47c   : > { %v5357_v43 = vpop.eup %5356  ;;  %v4443_v0 = vadd.f32 %v8491_v1, %v4388_v39  ;;  %v4389_v19 = vmul.f32 %v4255_v11, %v4069_v49  ;;  %v4072_v40 = vadd.f32 0.5, %v3944_v23  ;;  %v3945_v35 = vmul.f32 0.5, %v5355_v28 }
 0x47d   : > { %v5359_v47 = vpop.eup %5358  ;;  %v4517_v55 = vadd.f32 %v4516_v34, %v4390_v2  ;;  %v4391_v3 = vmul.f32 %v4255_v11, %v4071_v24  ;;  %v4074_v8 = vadd.f32 0.5, %v3946_v16  ;;  %v3947_v15 = vmul.f32 0.5, %v5357_v43 }
 0x47e   : > { %v5361_v20 = vpop.eup %5360  ;;  %v4480_v5 = vadd.f32 %v4479_v53, %v4389_v19  ;;  %v4392_v51 = vmul.f32 %v4260_v14, %v4072_v40  ;;  %v4073_v27 = vadd.f32 0.5, %v3945_v35  ;;  %v3948_v18 = vmul.f32 0.5, %v5359_v47  ;;  %v8728_v19 = vld [vmem:[#allocation10_spill] sm:$0xff]  ;;  %v8729_v35 = vld [vmem:[#allocation11_spill] sm:$0xff] }
 0x47f   : > { %v5363_v13 = vpop.eup %5362  ;;  %v4554_v26 = vadd.f32 %v4553_v29, %v4391_v3  ;;  %v4394_v62 = vmul.f32 %v4260_v14, %v4074_v8  ;;  %v4075_v63 = vadd.f32 0.5, %v3947_v15  ;;  %v3950_v41 = vmul.f32 0.5, %v5361_v20  ;;  %v8732_v15 = vld [vmem:[#allocation31_spill] sm:$0xff] }
 0x480   : > { %v5365_v1 = vpop.eup %5364  ;;  %v4444_v7 = vadd.f32 %v4443_v0, %v4392_v51  ;;  %v4393_v25 = vmul.f32 %v4260_v14, %v4073_v27  ;;  %v4076_v33 = vadd.f32 0.5, %v3948_v18  ;;  %v3949_v9 = vmul.f32 0.5, %v5363_v13  ;;  %v8733_v51 = vld [vmem:[#allocation32_spill] sm:$0xff]  ;;  %v8734_v18 = vld [vmem:[#allocation33_spill] sm:$0xff] }
 0x481   : > { %v5367_v56 = vpop.eup %5366  ;;  %v4518_v57 = vadd.f32 %v4517_v55, %v4394_v62  ;;  %v4395_v21 = vmul.f32 %v4260_v14, %v4075_v63  ;;  %v4078_v38 = vadd.f32 0.5, %v3950_v41  ;;  %v3951_v42 = vmul.f32 0.5, %v5365_v1  ;;  %v8730_v14 = vld [vmem:[#allocation29_spill] sm:$0xff]  ;;  %v8735_v62 = vld [vmem:[#allocation34_spill] sm:$0xff]  ;;  %v8736_v41 = vld [vmem:[#allocation35_spill] sm:$0xff] }
 0x482   : > { %v5369_v58 = vpop.eup %5368  ;;  %v4481_v30 = vadd.f32 %v4480_v5, %v4393_v25  ;;  %v4396_v34 = vmul.f32 %v4265_v10, %v4076_v33  ;;  %v4077_v6 = vadd.f32 0.5, %v3949_v9  ;;  %v3952_v12 = vmul.f32 0.5, %v5367_v56  ;;  %v8738_v9 = vld [vmem:[#allocation37_spill] sm:$0xff] }
 0x483   : > { %v5371_v17 = vpop.eup %5370  ;;  %v4555_v45 = vadd.f32 %v4554_v26, %v4395_v21  ;;  %v4398_v54 = vmul.f32 %v4265_v10, %v4078_v38  ;;  %v4079_v59 = vadd.f32 0.5, %v3951_v42  ;;  %v3954_v60 = vmul.f32 0.5, %v5369_v58  ;;  %v8739_v21 = vld [vmem:[#allocation38_spill] sm:$0xff]  ;;  %v8740_v42 = vld [vmem:[#allocation39_spill] sm:$0xff] }
 0x484   : > { %v4445_v11 = vadd.f32 %v4444_v7, %v4396_v34  ;;  %v4397_v46 = vmul.f32 %v4265_v10, %v4077_v6  ;;  %v4080_v32 = vadd.f32 0.5, %v3952_v12  ;;  %v3953_v48 = vmul.f32 0.5, %v5371_v17 }
 0x485   : > { %v4519_v53 = vadd.f32 %v4518_v57, %v4398_v54  ;;  %v4399_v39 = vmul.f32 %v4265_v10, %v4079_v59  ;;  %v4082_v49 = vadd.f32 0.5, %v3954_v60  ;;  %5372 = vtanh.f32 %v8523_v61 }
 0x486   : > { %v4482_v23 = vadd.f32 %v4481_v30, %v4397_v46  ;;  %v4400_v28 = vmul.f32 %v4270_v4, %v4080_v32  ;;  %v4081_v29 = vadd.f32 0.5, %v3953_v48  ;;  %5374 = vtanh.f32 %v8530_v52  ;;  %v8731_v52 = vld [vmem:[#allocation30_spill] sm:$0xff]  ;;  %v4275_v48 = vpop.permute.xlu0 %4274 }
 0x487   : > { %v4556_v2 = vadd.f32 %v4555_v45, %v4399_v39  ;;  %v4402_v24 = vmul.f32 %v4270_v4, %v4082_v49  ;;  %5376 = vtanh.f32 %v8532_v22  ;;  %v3701_v16 = vmul.f32 0.5, %v8527_v44 }
 0x488   : > { %v4446_v43 = vadd.f32 %v4445_v11, %v4400_v28  ;;  %v4401_v0 = vmul.f32 %v4270_v4, %v4081_v29  ;;  %v3572_v40 = vadd.f32 %v8728_v19, %v8444_v36  ;;  %v3381_v47 = vadd.f32 %v8729_v35, %v8461_v31 }
 0x489   : > { %v4520_v61 = vadd.f32 %v4519_v53, %v4402_v24  ;;  %5378 = vtanh.f32 %v3701_v16  ;;  %v3574_v55 = vadd.f32 %v8730_v14, %v8461_v31  ;;  %v3383_v3 = vadd.f32 %v8731_v52, %v8461_v31 }
 0x48a   : > { %v8552_v8 = vadd.f32 %v4482_v23, %v4401_v0  ;;  %v3703_v22 = vmul.f32 0.5, %v3572_v40  ;;  %v3704_v44 = vmul.f32 0.5, %v3381_v47  ;;  %v3576_v20 = vadd.f32 %v8732_v15, %v8461_v31  ;;  %v8737_v31 = vld [vmem:[#allocation36_spill] sm:$0xff] }
 0x48b   : > { %v3706_v5 = vmul.f32 0.5, %v3574_v55  ;;  %v3705_v36 = vmul.f32 0.5, %v3383_v3  ;;  %v3387_v27 = vadd.f32 %v8733_v51, %v8467_v37  ;;  %v3580_v13 = vadd.f32 %v8734_v18, %v8467_v37 }
 0x48c   : > { %5380 = vtanh.f32 %v3703_v22  ;;  %v3707_v26 = vmul.f32 0.5, %v3576_v20  ;;  %v3389_v63 = vadd.f32 %v8735_v62, %v8467_v37  ;;  %v3582_v1 = vadd.f32 %v8736_v41, %v8467_v37  ;;  %v4280_v20 = vpop.permute.xlu1 %4279 }
 0x48d   : > { %5382 = vtanh.f32 %v3704_v44  ;;  %v3708_v7 = vmul.f32 0.5, %v3387_v27  ;;  %v3391_v25 = vadd.f32 %v8737_v31, %v8469_v50  ;;  %v3710_v33 = vmul.f32 0.5, %v3580_v13 }
 0x48e   : > { %5384 = vtanh.f32 %v3706_v5  ;;  %v3584_v56 = vadd.f32 %v8738_v9, %v8469_v50  ;;  %v3709_v57 = vmul.f32 0.5, %v3389_v63  ;;  %v3393_v38 = vadd.f32 %v8739_v21, %v8469_v50  ;;  %v4285_v9 = vpop.permute.xlu0 %4284 }
 0x48f   : > { %v5373_v10 = vpop.eup %5372  ;;  %5386 = vtanh.f32 %v3705_v36  ;;  %v3586_v58 = vadd.f32 %v8740_v42, %v8469_v50  ;;  %v3711_v34 = vmul.f32 0.5, %v3582_v1  ;;  %v3712_v17 = vmul.f32 0.5, %v3391_v25 }
 0x490   : > { %v5375_v37 = vpop.eup %5374  ;;  %v3955_v30 = vmul.f32 0.5, %v5373_v10  ;;  %5388 = vtanh.f32 %v3707_v26  ;;  %v3714_v59 = vmul.f32 0.5, %v3584_v56  ;;  %v3713_v46 = vmul.f32 0.5, %v3393_v38 }
 0x491   : > { %v5377_v6 = vpop.eup %5376  ;;  %v3956_v12 = vmul.f32 0.5, %v5375_v37  ;;  %5390 = vtanh.f32 %v3708_v7  ;;  %v3715_v32 = vmul.f32 0.5, %v3586_v58 }
 0x492   : > { %v4083_v45 = vadd.f32 0.5, %v3955_v30  ;;  %v3958_v54 = vmul.f32 0.5, %v5377_v6  ;;  %5392 = vtanh.f32 %v3710_v33 }
 0x493   : > { %v5379_v60 = vpop.eup %5378  ;;  %v4084_v11 = vadd.f32 0.5, %v3956_v12  ;;  %5394 = vtanh.f32 %v3709_v57 }
 0x494   : > { %v4403_v53 = vmul.f32 %v4270_v4, %v4083_v45  ;;  %v4086_v50 = vadd.f32 0.5, %v3958_v54  ;;  %v3957_v39 = vmul.f32 0.5, %v5379_v60  ;;  %5396 = vtanh.f32 %v3711_v34 }
 0x495   : > { %v4404_v49 = vmul.f32 %v4275_v48, %v4084_v11  ;;  %5398 = vtanh.f32 %v3712_v17 }
 0x496   : > { %v5381_v23 = vpop.eup %5380  ;;  %v4557_v28 = vadd.f32 %v4556_v2, %v4403_v53  ;;  %v4406_v29 = vmul.f32 %v4275_v48, %v4086_v50  ;;  %v4085_v24 = vadd.f32 0.5, %v3957_v39  ;;  %5400 = vtanh.f32 %v3714_v59 }
 0x497   : > { %v5383_v16 = vpop.eup %5382  ;;  %v4447_v0 = vadd.f32 %v4446_v43, %v4404_v49  ;;  %v3959_v19 = vmul.f32 0.5, %v5381_v23  ;;  %5402 = vtanh.f32 %v3713_v46 }
 0x498   : > { %v5385_v40 = vpop.eup %5384  ;;  %v4521_v35 = vadd.f32 %v4520_v61, %v4406_v29  ;;  %v4405_v47 = vmul.f32 %v4275_v48, %v4085_v24  ;;  %v3960_v14 = vmul.f32 0.5, %v5383_v16  ;;  %5404 = vtanh.f32 %v3715_v32  ;;  %v4290_v32 = vpop.permute.xlu1 %4289 }
 0x499   : > { %v5387_v4 = vpop.eup %5386  ;;  %v4087_v55 = vadd.f32 0.5, %v3959_v19  ;;  %v3962_v52 = vmul.f32 0.5, %v5385_v40 }
 0x49a   : > { %v5389_v3 = vpop.eup %5388  ;;  %v4484_v22 = vadd.f32 %v8552_v8, %v4405_v47  ;;  %v4088_v44 = vadd.f32 0.5, %v3960_v14  ;;  %v3961_v2 = vmul.f32 0.5, %v5387_v4 }
 0x49b   : > { %v5391_v15 = vpop.eup %5390  ;;  %v4407_v5 = vmul.f32 %v4275_v48, %v4087_v55  ;;  %v4090_v36 = vadd.f32 0.5, %v3962_v52  ;;  %v3963_v43 = vmul.f32 0.5, %v5389_v3 }
 0x49c   : > { %v5393_v51 = vpop.eup %5392  ;;  %v4408_v27 = vmul.f32 %v4280_v20, %v4088_v44  ;;  %v4089_v18 = vadd.f32 0.5, %v3961_v2  ;;  %v3964_v61 = vmul.f32 0.5, %v5391_v15 }
 0x49d   : > { %v5395_v13 = vpop.eup %5394  ;;  %v4558_v26 = vadd.f32 %v4557_v28, %v4407_v5  ;;  %v4410_v62 = vmul.f32 %v4280_v20, %v4090_v36  ;;  %v4091_v63 = vadd.f32 0.5, %v3963_v43  ;;  %v3966_v41 = vmul.f32 0.5, %v5393_v51 }
 0x49e   : > { %v5397_v1 = vpop.eup %5396  ;;  %v4448_v7 = vadd.f32 %v4447_v0, %v4408_v27  ;;  %v4409_v31 = vmul.f32 %v4280_v20, %v4089_v18  ;;  %v4092_v8 = vadd.f32 0.5, %v3964_v61  ;;  %v3965_v25 = vmul.f32 0.5, %v5395_v13 }
 0x49f   : > { %v5399_v33 = vpop.eup %5398  ;;  %v4522_v56 = vadd.f32 %v4521_v35, %v4410_v62  ;;  %v4411_v10 = vmul.f32 %v4280_v20, %v4091_v63  ;;  %v4094_v57 = vadd.f32 0.5, %v3966_v41  ;;  %v3967_v21 = vmul.f32 0.5, %v5397_v1 }
 0x4a0   : > { %v5401_v38 = vpop.eup %5400  ;;  %v4485_v42 = vadd.f32 %v4484_v22, %v4409_v31  ;;  %v4412_v58 = vmul.f32 %v4285_v9, %v4092_v8  ;;  %v4093_v37 = vadd.f32 0.5, %v3965_v25  ;;  %v3968_v30 = vmul.f32 0.5, %v5399_v33 }
 0x4a1   : > { %v5403_v34 = vpop.eup %5402  ;;  %v4559_v6 = vadd.f32 %v4558_v26, %v4411_v10  ;;  %v4414_v12 = vmul.f32 %v4285_v9, %v4094_v57  ;;  %v4095_v17 = vadd.f32 0.5, %v3967_v21  ;;  %v3970_v45 = vmul.f32 0.5, %v5401_v38  ;;  %v8741_v21 = vld [vmem:[#allocation7_spill] sm:$0xff] }
 0x4a2   : > { %v5405_v54 = vpop.eup %5404  ;;  %v4449_v59 = vadd.f32 %v4448_v7, %v4412_v58  ;;  %v4413_v60 = vmul.f32 %v4285_v9, %v4093_v37  ;;  %v4096_v11 = vadd.f32 0.5, %v3968_v30  ;;  %v3969_v46 = vmul.f32 0.5, %v5403_v34 }
 0x4a3   : > { %v4523_v48 = vadd.f32 %v4522_v56, %v4414_v12  ;;  %v4415_v53 = vmul.f32 %v4285_v9, %v4095_v17  ;;  %v4098_v50 = vadd.f32 0.5, %v3970_v45  ;;  %v3971_v39 = vmul.f32 0.5, %v5405_v54 }
 0x4a4   : > { %v4486_v49 = vadd.f32 %v4485_v42, %v4413_v60  ;;  %v4416_v23 = vmul.f32 %v4290_v32, %v4096_v11  ;;  %v4097_v28 = vadd.f32 0.5, %v3969_v46  ;;  %v5471_v51 = vmov 1966171168  }
 0x4a5   : > { %v4560_v29 = vadd.f32 %v4559_v6, %v4415_v53  ;;  %v4418_v24 = vmul.f32 %v4290_v32, %v4098_v50  ;;  %v4099_v16 = vadd.f32 0.5, %v3971_v39  ;;  %v4581_v27 = vunpack.c.l.s4 %v5471_v51 }
 0x4a6   : > { %v4450_v0 = vadd.f32 %v4449_v59, %v4416_v23  ;;  %v4417_v19 = vmul.f32 %v4290_v32, %v4097_v28  ;;  %v4569_v41 = vstv %s4568_s23  ;;  %v8742_v12 = vlaneseq }
 0x4a7   : > { %v4524_v40 = vadd.f32 %v4523_v48, %v4418_v24  ;;  %v4419_v35 = vmul.f32 %v4290_v32, %v4099_v16  ;;  %v4582_v31 = vunpack.c.0.s8 %v4581_v27 }
 0x4a8   : > { %v4451_v47 = vrot.slane %v4450_v0, 4  ;;  %v4487_v14 = vadd.f32 %v4486_v49, %v4417_v19  ;;  %vm4605_vm0 = vcmp.lt.s32.totalorder %v8742_v12, 512 }
 0x4a9   : > { %v4525_v4 = vrot.slane %v4524_v40, 4  ;;  %v4561_v55 = vadd.f32 %v4560_v29, %v4419_v35  ;;  %v4585_v38 = vsub.s32 %v4582_v31, %v8741_v21 }
 0x4aa   : > { %v4452_v52 = vadd.f32 %v4451_v47, %v4450_v0  ;;  %v4488_v3 = vrot.slane %v4487_v14, 4 }
 0x4ab   : > { %v4526_v22 = vadd.f32 %v4525_v4, %v4524_v40  ;;  %v4562_v44 = vrot.slane %v4561_v55, 4 }
 0x4ac   : > { %v4453_v2 = vrot.slane %v4452_v52, 2  ;;  %v4489_v15 = vadd.f32 %v4488_v3, %v4487_v14 }
 0x4ad   : > { %v4527_v20 = vrot.slane %v4526_v22, 2  ;;  %v4563_v5 = vadd.f32 %v4562_v44, %v4561_v55 }
 0x4ae   : > { %v4454_v36 = vadd.f32 %v4453_v2, %v4452_v52  ;;  %v4490_v43 = vrot.slane %v4489_v15, 2 }
 0x4af   : > { %v4528_v18 = vadd.f32 %v4527_v20, %v4526_v22  ;;  %v4564_v61 = vrot.slane %v4563_v5, 2 }
 0x4b0   : > { %v4455_v13 = vrot.slane %v4454_v36, 1  ;;  %v4491_v26 = vadd.f32 %v4490_v43, %v4489_v15 }
 0x4b1   : > { %v4529_v62 = vrot.slane %v4528_v18, 1  ;;  %v4565_v63 = vadd.f32 %v4564_v61, %v4563_v5 }
 0x4b2   : > { %v4456_v1 = vadd.f32 %v4455_v13, %v4454_v36  ;;  %v4492_v7 = vrot.slane %v4491_v26, 1 }
 0x4b3   : > { %v4530_v8 = vadd.f32 %v4529_v62, %v4528_v18  ;;  %v4566_v25 = vrot.slane %v4565_v63, 1 }
 0x4b4   : > { %v4493_v33 = vadd.f32 %v4492_v7, %v4491_v26  ;;  %v4570_v9 = vadd.f32 %v4569_v41, %v4456_v1 }
 0x4b5   : > { %v4567_v56 = vadd.f32 %v4566_v25, %v4565_v63  ;;  %v4572_v10 = vadd.f32 %v4569_v41, %v4530_v8 }
 0x4b6   : > { %v4571_v57 = vadd.f32 %v4569_v41, %v4493_v33 }
 0x4b7   : > { %v4573_v42 = vadd.f32 %v4569_v41, %v4567_v56 }
 0x4b8   : > { %v4578_v58 = vcombine.low %v4570_v9, %v4571_v57 }
 0x4b9   : > { %v4579_v37 = vcombine.low %v4572_v10, %v4573_v42 }
 0x4ba   : > { %v4586_v30 = vrot.slane %v4578_v58, %v4585_v38 }
 0x4bb   : > { %v4593_v34 = vrot.slane %v4579_v37, %v4585_v38 }
 0x4bd   : > { %v4594_v6 = vcombine.low %v4586_v30, %v4593_v34 }
 0x4bf   : > { %v4601_v17 = vrot.slane %v4594_v6, %v4585_v38 }
 0x4c1   : > { %4607 = vst.msk [vmem:[%s353_s15] sm:$0xf] %vm4605_vm0, %v4601_v17 }
 0x4c2   : > { %5419 = shalt.err (!%p5416_p3)
}
 0x4c3   : > { %s5420_s23 = scalar_lea.hbm %s8580_s13, 64  ;;  %s5424_s29 = scalar_lea.hbm %s8632_s10, 128 }
 0x4c4   : > { %p5421_p4 = scmp.ne.s32.totalorder %s8580_s13, %s5420_s23  ;;  %p5425_p9 = scmp.lt.u32.totalorder %s8580_s13, %s8632_s10 }
 0x4c5   : > { %p5426_p10 = scmp.lt.u32.totalorder %s5424_s29, %s5420_s23  ;;  %p5428_p12 = scmp.lt.u32.totalorder %s5420_s23, %s8580_s13 }
 0x4c6   : > { %p5422_p7 = pnand %p5421_p4, %p5572_p5 }
 0x4c7   : > { %p5427_p11 = por %p5426_p10, %p5425_p9 }
 0x4c8   : > { %p5423_p8 = pneg %p5422_p7 }
 0x4c9   : > { %p5429_p13 = por %p5428_p12, %p5427_p11 }
 0x4cb   : > { %p5430_p0 = pnand %p5429_p13, %p5423_p8 }
 0x4cd   : > { %5433 = shalt.err (!%p5430_p0)
}
 0x4ce   : > { %4755 = dma.vmem_to_hbm [thread:$0]  (%p5572_p5), %s8582_s30, 64, %s8580_s13, %s4609_s14  }
 0x4cf PF: > { %p4761_p1 = scmp.ge.s32.totalorder %s5468_s20, 2  ;;  %s4635_s12 = sand.u32 1, %s5456_s17  }
 0x4d0   : > { %s4636_s16 = scalar_lea.sflag [#allocation5], %s4635_s12 }
 0x4d1   : > { %p4758_p2 = pnand %p4761_p1, %p5576_p6 }
 0x4d3   : > { %5451 = dma.done.wait (!%p4758_p2), %s4636_s16, 64  }
 0x4d4   : > { %5453 = vsyncadd (!%p4758_p2), %s4636_s16, 4294967232  ;;  %p22_p3 = scmp.ge.s32.totalorder %s5559_s21, 4   ;;  %s8743_s17 = smov %s5460_s18 }
 0x4d5   : > { %s8744_s18 = smov %s5464_s19  ;;  %s8745_s19 = smov %s5570_s24 }
 0x4d6   : > { %s8746_s20 = smov %s5559_s21  ;;  %24 = sbr.rel (!%p22_p3) target bundleno = 6 (0x6), region = 95 }
 0x4dd   :  { %4641 = vsyncpa [#allocation5], 1 }
 0x4de   :  { %4643 = vsyncpa [#allocation5 + $0x1], 1 }

</bundles_post_ra>
